<compile_context>
chip_gen: v6e
topology: v6e:2x2x1
jax: 0.10.0
libtpu: 0.0.40
codegen_flags: <defaults>
</compile_context>

<pallas_src>
import numpy as np
import jax
import jax.numpy as jnp
from jax import lax
from jax.experimental import pallas as pl
from jax.experimental.pallas import tpu as pltpu


def _dot_bf16(a, b):
    # single-pass MXU matmul: bf16 operands, f32 accumulation
    return jnp.dot(a, b, preferred_element_type=jnp.float32)


def _lstm_cell(pre, c, Hh):
    """pre: (B, 4*Hh) gate pre-activations in (i, f, o, g) lane order."""
    sig = jax.nn.sigmoid(pre[:, :3 * Hh])        # one EUP slab for i, f, o
    gi = sig[:, :Hh]
    gf = sig[:, Hh:2 * Hh]
    go = sig[:, 2 * Hh:3 * Hh]
    gg = jnp.tanh(pre[:, 3 * Hh:])
    c_new = gf * c + gi * gg
    h_new = go * jnp.tanh(c_new)
    return h_new, c_new


# ----------------------------------------------------------------------------
# Pallas kernel
# ----------------------------------------------------------------------------
def bert_crf_kernel(x_ref, mask_ref, tags_ref,
                    wih_ref, whhf_ref, whhb_ref, bcat_ref,
                    weT_ref, be_ref, start_ref, end_ref, transT_ref,
                    llh_ref, henc_ref):
    B = llh_ref.shape[0]
    SB = mask_ref.shape[0]
    S = SB // B
    Hh = whhf_ref.shape[0]
    G = whhf_ref.shape[1]            # 4*Hh
    H = henc_ref.shape[1]            # 2*Hh
    L = transT_ref.shape[0]
    f32 = jnp.float32
    bf16 = jnp.bfloat16

    mask_all = mask_ref[...]         # (S*B, 1) f32, time-major rows
    whh_f = whhf_ref[...]            # (Hh, 4*Hh) bf16
    whh_b = whhb_ref[...]

    # -------- hoisted input projection: one matmul, both directions, all t ----
    xproj = _dot_bf16(x_ref[...], wih_ref[...]) + bcat_ref[...]   # (S*B, 8*Hh) f32

    # -------- fused bidirectional LSTM recurrence (fully unrolled, S tiny) ----
    h_f = jnp.zeros((B, Hh), f32)
    c_f = jnp.zeros((B, Hh), f32)
    h_b = jnp.zeros((B, Hh), f32)
    c_b = jnp.zeros((B, Hh), f32)
    for s in range(S):
        tf, tb = s, S - 1 - s
        m_f = mask_all[tf * B:(tf + 1) * B, :]
        m_b = mask_all[tb * B:(tb + 1) * B, :]
        pre_f = xproj[tf * B:(tf + 1) * B, :G] + _dot_bf16(h_f.astype(bf16), whh_f)
        pre_b = xproj[tb * B:(tb + 1) * B, G:] + _dot_bf16(h_b.astype(bf16), whh_b)
        hn_f, cn_f = _lstm_cell(pre_f, c_f, Hh)
        hn_b, cn_b = _lstm_cell(pre_b, c_b, Hh)
        # mask-gated state update == pack_padded_sequence semantics
        h_f = m_f * hn_f + (1.0 - m_f) * h_f
        c_f = m_f * cn_f + (1.0 - m_f) * c_f
        h_b = m_b * hn_b + (1.0 - m_b) * h_b
        c_b = m_b * cn_b + (1.0 - m_b) * c_b
        # pad positions emit 0 (pad_packed_sequence padding_value=0)
        henc_ref[tf * B:(tf + 1) * B, 0:Hh] = h_f * m_f
        henc_ref[tb * B:(tb + 1) * B, Hh:H] = h_b * m_b

    # -------- crf_emission: one batched matmul over all timesteps ------------
    em = _dot_bf16(henc_ref[...].astype(bf16), weT_ref[...]) + be_ref[...]  # (S*B, L)

    # -------- CRF -------------------------------------------------------------
    start = start_ref[...]           # (1, L)
    end = end_ref[...]               # (1, L)
    transT = transT_ref[...]         # (L, L), transT[j, i] = trans[i, j]

    iota = lax.broadcasted_iota(jnp.int32, (SB, L), 1)
    oh = (iota == tags_ref[...]).astype(f32)                  # (S*B, L) one-hots
    # (padded-position tags are gated out by the mask below)

    # gold-path score: no recurrence -> fully vectorized, off the serial chain
    em_gold = jnp.sum(oh * em, axis=-1, keepdims=True)        # (S*B, 1)
    oh_prev = oh[:(S - 1) * B, :]
    oh_cur = oh[B:, :]
    # exact f32 row-select of the transition matrix (tiny, off the critical path)
    sel = jnp.dot(oh_cur, transT, preferred_element_type=f32,
                  precision=lax.Precision.HIGHEST)            # ((S-1)*B, L)
    trans_gold = jnp.sum(sel * oh_prev, axis=-1, keepdims=True)
    gated = mask_all[B:, :] * (trans_gold + em_gold[B:, :])   # ((S-1)*B, 1)

    score = jnp.sum(oh[:B, :] * start, axis=-1, keepdims=True) + em_gold[:B, :]
    for t in range(1, S):
        score = score + gated[(t - 1) * B:t * B, :]

    # one-hot of the tag at the last valid position (trailing-pad masks)
    lastoh = jnp.zeros((B, L), f32)
    for t in range(S):
        m_t = mask_all[t * B:(t + 1) * B, :]
        if t + 1 < S:
            w_t = m_t * (1.0 - mask_all[(t + 1) * B:(t + 2) * B, :])
        else:
            w_t = m_t
        lastoh = lastoh + w_t * oh[t * B:(t + 1) * B, :]
    score = score + jnp.sum(lastoh * end, axis=-1, keepdims=True)

    # forward algorithm: the only true serial chain, exact stabilized f32 LSE
    alpha = start + em[:B, :]                                 # (B, L)
    for t in range(1, S):
        m_t = mask_all[t * B:(t + 1) * B, :]
        em_t = em[t * B:(t + 1) * B, :]
        tmp = alpha[:, None, :] + transT[None, :, :]          # tmp[b,j,i] = a[b,i]+trans[i,j]
        mrow = jnp.max(tmp, axis=-1)                          # (B, L)
        lse = mrow + jnp.log(jnp.sum(jnp.exp(tmp - mrow[:, :, None]), axis=-1))
        alpha = jnp.where(m_t > 0.0, lse + em_t, alpha)

    fin = alpha + end
    fmax = jnp.max(fin, axis=-1, keepdims=True)
    logz = fmax + jnp.log(jnp.sum(jnp.exp(fin - fmax), axis=-1, keepdims=True))
    llh_ref[...] = score - logz


# ----------------------------------------------------------------------------
# Parameter construction (PyTorch-shaped, then packed to kernel layout)
# ----------------------------------------------------------------------------
def init_params(key, vocab, E, H, L):
    Hh = H // 2
    ks = jax.random.split(key, 14)
    u = lambda k, shape, lim: jax.random.uniform(k, shape, jnp.float32, -lim, lim)
    klstm = 1.0 / float(np.sqrt(Hh))
    klin = 1.0 / float(np.sqrt(H))

    embed = jax.random.normal(ks[0], (vocab, E), jnp.float32) * 0.5

    order = jnp.array([0, 1, 3, 2])   # PyTorch gate order (i,f,g,o) -> (i,f,o,g)

    def lstm_dir(k0, k1, k2, k3):
        wih = u(k0, (4 * Hh, E), klstm)       # PyTorch weight_ih (4H, E)
        whh = u(k1, (4 * Hh, Hh), klstm)      # PyTorch weight_hh (4H, H)
        bih = u(k2, (4 * Hh,), klstm)
        bhh = u(k3, (4 * Hh,), klstm)
        wih_p = jnp.transpose(wih.reshape(4, Hh, E)[order], (2, 0, 1)).reshape(E, 4 * Hh)
        whh_p = jnp.transpose(whh.reshape(4, Hh, Hh)[order], (2, 0, 1)).reshape(Hh, 4 * Hh)
        b_p = (bih + bhh).reshape(4, Hh)[order].reshape(1, 4 * Hh)
        return wih_p, whh_p, b_p

    wih_f, whh_f, b_f = lstm_dir(ks[1], ks[2], ks[3], ks[4])
    wih_b, whh_b, b_b = lstm_dir(ks[5], ks[6], ks[7], ks[8])

    We = u(ks[9], (L, H), klin)               # crf_emission.weight (L, H)
    be = u(ks[10], (L,), klin)

    start = u(ks[11], (L,), 0.1).reshape(1, L)   # CRF.reset_parameters: U(-0.1, 0.1)
    end = u(ks[12], (L,), 0.1).reshape(1, L)
    trans = u(ks[13], (L, L), 0.1)

    return dict(embed=embed,
                wih_cat=jnp.concatenate([wih_f, wih_b], axis=1),   # (E, 8*Hh)
                whh_f=whh_f, whh_b=whh_b,                          # (Hh, 4*Hh)
                b_cat=jnp.concatenate([b_f, b_b], axis=1),         # (1, 8*Hh)
                weT=jnp.transpose(We), be=be.reshape(1, L),
                start=start, end=end, trans=trans)


def prepare(params, input_ix, attention_mask, labels):
    """Layout plumbing only: embedding gather + time-major (S*B, ...) packing."""
    B, S = input_ix.shape
    bf16 = jnp.bfloat16
    x = params["embed"][input_ix]                                   # (B,S,E) gather (glue)
    x2d = jnp.transpose(x, (1, 0, 2)).reshape(S * B, -1).astype(bf16)
    mask2d = jnp.transpose(attention_mask).astype(jnp.float32).reshape(S * B, 1)
    tags2d = jnp.transpose(labels).astype(jnp.int32).reshape(S * B, 1)
    return (x2d, mask2d, tags2d,
            params["wih_cat"].astype(bf16),
            params["whh_f"].astype(bf16), params["whh_b"].astype(bf16),
            params["b_cat"],
            params["weT"].astype(bf16), params["be"],
            params["start"], params["end"], jnp.transpose(params["trans"]))


# ----------------------------------------------------------------------------
# Pallas wrapper
# ----------------------------------------------------------------------------
def bert_crf_loss_pallas(params, input_ix, attention_mask, labels):
    args = prepare(params, input_ix, attention_mask, labels)
    B, S = input_ix.shape
    Hh = params["whh_f"].shape[0]
    H = 2 * Hh

    llh = pl.pallas_call(
        bert_crf_kernel,
        out_shape=jax.ShapeDtypeStruct((B, 1), jnp.float32),
        in_specs=[pl.BlockSpec(memory_space=pltpu.MemorySpace.VMEM)] * len(args),
        out_specs=pl.BlockSpec(memory_space=pltpu.MemorySpace.VMEM),
        scratch_shapes=[
            pltpu.VMEM((S * B, H), jnp.float32),   # encoder outputs [h_fwd | h_bwd]
        ],
    )(*args)
    return -jnp.mean(llh)                          # reduction='mean', negated


# ----------------------------------------------------------------------------
# Pure-JAX reference (same math, same bf16 matmul operands, standard logsumexp)
# ----------------------------------------------------------------------------
def reference_loss(args, S, B):
    (x2d, mask2d, tags2d, wih_cat, whh_f, whh_b, b_cat,
     weT, be, start, end, transT) = args
    f32 = jnp.float32
    bf16 = jnp.bfloat16
    Hh = whh_f.shape[0]
    G = 4 * Hh
    H = 2 * Hh
    L = transT.shape[0]
    trans = transT.T

    xproj = jnp.dot(x2d, wih_cat, preferred_element_type=f32) + b_cat   # (S*B, 8*Hh)
    mask = mask2d.reshape(S, B, 1)
    tags = tags2d.reshape(S, B)

    def cell(pre, c):
        sig = jax.nn.sigmoid(pre[:, :3 * Hh])
        gi, gf, go = sig[:, :Hh], sig[:, Hh:2 * Hh], sig[:, 2 * Hh:3 * Hh]
        gg = jnp.tanh(pre[:, 3 * Hh:])
        c_new = gf * c + gi * gg
        return go * jnp.tanh(c_new), c_new

    h_f = jnp.zeros((B, Hh), f32); c_f = jnp.zeros((B, Hh), f32)
    h_b = jnp.zeros((B, Hh), f32); c_b = jnp.zeros((B, Hh), f32)
    out_f = [None] * S
    out_b = [None] * S
    for s in range(S):
        tf, tb = s, S - 1 - s
        m_f, m_b = mask[tf], mask[tb]
        pre_f = xproj[tf * B:(tf + 1) * B, :G] + jnp.dot(
            h_f.astype(bf16), whh_f, preferred_element_type=f32)
        pre_b = xproj[tb * B:(tb + 1) * B, G:] + jnp.dot(
            h_b.astype(bf16), whh_b, preferred_element_type=f32)
        hn_f, cn_f = cell(pre_f, c_f)
        hn_b, cn_b = cell(pre_b, c_b)
        h_f = m_f * hn_f + (1 - m_f) * h_f
        c_f = m_f * cn_f + (1 - m_f) * c_f
        h_b = m_b * hn_b + (1 - m_b) * h_b
        c_b = m_b * cn_b + (1 - m_b) * c_b
        out_f[tf] = h_f * m_f
        out_b[tb] = h_b * m_b

    henc = jnp.concatenate([jnp.stack(out_f, 0), jnp.stack(out_b, 0)], axis=-1)  # (S,B,H)
    em = jnp.dot(henc.reshape(S * B, H).astype(bf16), weT,
                 preferred_element_type=f32) + be
    em = em.reshape(S, B, L)

    oh = jax.nn.one_hot(tags, L, dtype=f32)                     # (S,B,L)
    score = jnp.sum(oh[0] * (start + em[0]), -1)                # (B,)
    alpha = start + em[0]
    last_oh = oh[0]
    for t in range(1, S):
        mt = mask[t]                                            # (B,1)
        tg = trans[tags[t - 1], tags[t]]                        # exact gather
        eg = jnp.sum(oh[t] * em[t], -1)
        score = score + mt[:, 0] * (tg + eg)
        last_oh = mt * oh[t] + (1 - mt) * last_oh
        nxt = jax.nn.logsumexp(alpha[:, :, None] + trans[None], axis=1) + em[t]
        alpha = jnp.where(mt > 0, nxt, alpha)
    score = score + jnp.sum(last_oh * end, -1)
    logz = jax.nn.logsumexp(alpha + end, axis=-1)
    return -jnp.mean(score - logz)


# ----------------------------------------------------------------------------
if __name__ == "__main__":
    B, S = 2, 8
    vocab, E, H, L = 50, 16, 32, 5     # hidden_size=32, num_labels=5

    key = jax.random.PRNGKey(0)
    pkey, k1, k2 = jax.random.split(key, 3)
    params = init_params(pkey, vocab, E, H, L)

    lengths = jnp.array([8, 5])
    pos = jnp.arange(S)[None, :]
    ids = jax.random.randint(k1, (B, S), 1, vocab)
    input_ix = jnp.where(pos < lengths[:, None], ids, 0).astype(jnp.int32)
    attention_mask = (input_ix != 0).astype(jnp.int32)
    labels = jax.random.randint(k2, (B, S), 0, L).astype(jnp.int32)

    loss = bert_crf_loss_pallas(params, input_ix, attention_mask, labels)
    loss = jax.block_until_ready(loss)

    ref = reference_loss(prepare(params, input_ix, attention_mask, labels), S, B)
    assert np.isfinite(float(loss))
    np.testing.assert_allclose(float(loss), float(ref), rtol=1e-3, atol=1e-3)

    print("KERNEL_OK")
</pallas_src>

<mosaic_0001>
module attributes {stable_mosaic.version = 11 : i64} {
  func.func @bert_crf_kernel(%arg0: memref<16x16xbf16, #tpu.memory_space<vmem>>, %arg1: memref<16x1xf32, #tpu.memory_space<vmem>>, %arg2: memref<16x1xi32, #tpu.memory_space<vmem>>, %arg3: memref<16x128xbf16, #tpu.memory_space<vmem>>, %arg4: memref<16x64xbf16, #tpu.memory_space<vmem>>, %arg5: memref<16x64xbf16, #tpu.memory_space<vmem>>, %arg6: memref<1x128xf32, #tpu.memory_space<vmem>>, %arg7: memref<32x5xbf16, #tpu.memory_space<vmem>>, %arg8: memref<1x5xf32, #tpu.memory_space<vmem>>, %arg9: memref<1x5xf32, #tpu.memory_space<vmem>>, %arg10: memref<1x5xf32, #tpu.memory_space<vmem>>, %arg11: memref<5x5xf32, #tpu.memory_space<vmem>>, %arg12: memref<2x1xf32, #tpu.memory_space<vmem>>, %arg13: memref<16x32xf32, #tpu.memory_space<vmem>>) attributes {dimension_semantics = [], scalar_prefetch = 0 : i64, scratch_operands = 1 : i64, tpu.core_type = #tpu.core_type<tc>} {
    %c0 = arith.constant 0 : index
    %c0_0 = arith.constant 0 : index
    %0 = vector.load %arg1[%c0, %c0_0] : memref<16x1xf32, #tpu.memory_space<vmem>>, vector<16x1xf32>
    %c0_1 = arith.constant 0 : index
    %c0_2 = arith.constant 0 : index
    %1 = vector.load %arg4[%c0_1, %c0_2] : memref<16x64xbf16, #tpu.memory_space<vmem>>, vector<16x64xbf16>
    %c0_3 = arith.constant 0 : index
    %c0_4 = arith.constant 0 : index
    %2 = vector.load %arg5[%c0_3, %c0_4] : memref<16x64xbf16, #tpu.memory_space<vmem>>, vector<16x64xbf16>
    %c0_5 = arith.constant 0 : index
    %c0_6 = arith.constant 0 : index
    %3 = vector.load %arg0[%c0_5, %c0_6] : memref<16x16xbf16, #tpu.memory_space<vmem>>, vector<16x16xbf16>
    %c0_7 = arith.constant 0 : index
    %c0_8 = arith.constant 0 : index
    %4 = vector.load %arg3[%c0_7, %c0_8] : memref<16x128xbf16, #tpu.memory_space<vmem>>, vector<16x128xbf16>
    %cst = arith.constant dense<0.000000e+00> : vector<16x128xf32>
    %5 = tpu.matmul %3, %4, %cst {dimension_numbers = #tpu.dot_dimension_numbers<[1], [0], [0], [1], [0, 0, 1, 1], [], []>} : vector<16x16xbf16>, vector<16x128xbf16>, vector<16x128xf32> -> vector<16x128xf32>
    %c0_9 = arith.constant 0 : index
    %c0_10 = arith.constant 0 : index
    %6 = vector.load %arg6[%c0_9, %c0_10] : memref<1x128xf32, #tpu.memory_space<vmem>>, vector<1x128xf32>
    %7 = vector.broadcast %6 : vector<1x128xf32> to vector<16x128xf32>
    %8 = arith.addf %5, %7 : vector<16x128xf32>
    %cst_11 = arith.constant 0.000000e+00 : f32
    %9 = vector.broadcast %cst_11 : f32 to vector<2x16xf32>
    %cst_12 = arith.constant 0.000000e+00 : f32
    %10 = vector.broadcast %cst_12 : f32 to vector<2x16xf32>
    %cst_13 = arith.constant 0.000000e+00 : f32
    %11 = vector.broadcast %cst_13 : f32 to vector<2x16xf32>
    %cst_14 = arith.constant 0.000000e+00 : f32
    %12 = vector.broadcast %cst_14 : f32 to vector<2x16xf32>
    %13 = vector.extract_strided_slice %0 {offsets = [0, 0], sizes = [2, 1], strides = [1, 1]} : vector<16x1xf32> to vector<2x1xf32>
    %14 = vector.extract_strided_slice %0 {offsets = [14, 0], sizes = [2, 1], strides = [1, 1]} : vector<16x1xf32> to vector<2x1xf32>
    %15 = vector.extract_strided_slice %8 {offsets = [0, 0], sizes = [2, 64], strides = [1, 1]} : vector<16x128xf32> to vector<2x64xf32>
    %16 = arith.truncf %9 : vector<2x16xf32> to vector<2x16xbf16>
    %cst_15 = arith.constant dense<0.000000e+00> : vector<2x64xf32>
    %17 = tpu.matmul %16, %1, %cst_15 {dimension_numbers = #tpu.dot_dimension_numbers<[1], [0], [0], [1], [0, 0, 1, 1], [], []>} : vector<2x16xbf16>, vector<16x64xbf16>, vector<2x64xf32> -> vector<2x64xf32>
    %18 = arith.addf %15, %17 : vector<2x64xf32>
    %19 = vector.extract_strided_slice %8 {offsets = [14, 64], sizes = [2, 64], strides = [1, 1]} : vector<16x128xf32> to vector<2x64xf32>
    %20 = arith.truncf %11 : vector<2x16xf32> to vector<2x16xbf16>
    %cst_16 = arith.constant dense<0.000000e+00> : vector<2x64xf32>
    %21 = tpu.matmul %20, %2, %cst_16 {dimension_numbers = #tpu.dot_dimension_numbers<[1], [0], [0], [1], [0, 0, 1, 1], [], []>} : vector<2x16xbf16>, vector<16x64xbf16>, vector<2x64xf32> -> vector<2x64xf32>
    %22 = arith.addf %19, %21 : vector<2x64xf32>
    %23 = vector.extract_strided_slice %18 {offsets = [0, 0], sizes = [2, 48], strides = [1, 1]} : vector<2x64xf32> to vector<2x48xf32>
    %24 = arith.negf %23 : vector<2x48xf32>
    %25 = math.exp %24 : vector<2x48xf32>
    %cst_17 = arith.constant 1.000000e+00 : f32
    %26 = vector.broadcast %cst_17 : f32 to vector<2x48xf32>
    %27 = arith.addf %26, %25 : vector<2x48xf32>
    %28 = arith.divf %26, %27 : vector<2x48xf32>
    %29 = vector.extract_strided_slice %28 {offsets = [0, 0], sizes = [2, 16], strides = [1, 1]} : vector<2x48xf32> to vector<2x16xf32>
    %30 = vector.extract_strided_slice %28 {offsets = [0, 16], sizes = [2, 16], strides = [1, 1]} : vector<2x48xf32> to vector<2x16xf32>
    %31 = vector.extract_strided_slice %28 {offsets = [0, 32], sizes = [2, 16], strides = [1, 1]} : vector<2x48xf32> to vector<2x16xf32>
    %32 = vector.extract_strided_slice %18 {offsets = [0, 48], sizes = [2, 16], strides = [1, 1]} : vector<2x64xf32> to vector<2x16xf32>
    %33 = math.tanh %32 : vector<2x16xf32>
    %34 = arith.mulf %30, %10 : vector<2x16xf32>
    %35 = arith.mulf %29, %33 : vector<2x16xf32>
    %36 = arith.addf %34, %35 : vector<2x16xf32>
    %37 = math.tanh %36 : vector<2x16xf32>
    %38 = arith.mulf %31, %37 : vector<2x16xf32>
    %39 = vector.extract_strided_slice %22 {offsets = [0, 0], sizes = [2, 48], strides = [1, 1]} : vector<2x64xf32> to vector<2x48xf32>
    %40 = arith.negf %39 : vector<2x48xf32>
    %41 = math.exp %40 : vector<2x48xf32>
    %cst_18 = arith.constant 1.000000e+00 : f32
    %42 = vector.broadcast %cst_18 : f32 to vector<2x48xf32>
    %43 = arith.addf %42, %41 : vector<2x48xf32>
    %44 = arith.divf %42, %43 : vector<2x48xf32>
    %45 = vector.extract_strided_slice %44 {offsets = [0, 0], sizes = [2, 16], strides = [1, 1]} : vector<2x48xf32> to vector<2x16xf32>
    %46 = vector.extract_strided_slice %44 {offsets = [0, 16], sizes = [2, 16], strides = [1, 1]} : vector<2x48xf32> to vector<2x16xf32>
    %47 = vector.extract_strided_slice %44 {offsets = [0, 32], sizes = [2, 16], strides = [1, 1]} : vector<2x48xf32> to vector<2x16xf32>
    %48 = vector.extract_strided_slice %22 {offsets = [0, 48], sizes = [2, 16], strides = [1, 1]} : vector<2x64xf32> to vector<2x16xf32>
    %49 = math.tanh %48 : vector<2x16xf32>
    %50 = arith.mulf %46, %12 : vector<2x16xf32>
    %51 = arith.mulf %45, %49 : vector<2x16xf32>
    %52 = arith.addf %50, %51 : vector<2x16xf32>
    %53 = math.tanh %52 : vector<2x16xf32>
    %54 = arith.mulf %47, %53 : vector<2x16xf32>
    %55 = vector.broadcast %13 : vector<2x1xf32> to vector<2x16xf32>
    %56 = arith.mulf %55, %38 : vector<2x16xf32>
    %cst_19 = arith.constant 1.000000e+00 : f32
    %57 = vector.broadcast %cst_19 : f32 to vector<2x1xf32>
    %58 = arith.subf %57, %13 : vector<2x1xf32>
    %59 = vector.broadcast %58 : vector<2x1xf32> to vector<2x16xf32>
    %60 = arith.mulf %59, %9 : vector<2x16xf32>
    %61 = arith.addf %56, %60 : vector<2x16xf32>
    %62 = vector.broadcast %13 : vector<2x1xf32> to vector<2x16xf32>
    %63 = arith.mulf %62, %36 : vector<2x16xf32>
    %cst_20 = arith.constant 1.000000e+00 : f32
    %64 = vector.broadcast %cst_20 : f32 to vector<2x1xf32>
    %65 = arith.subf %64, %13 : vector<2x1xf32>
    %66 = vector.broadcast %65 : vector<2x1xf32> to vector<2x16xf32>
    %67 = arith.mulf %66, %10 : vector<2x16xf32>
    %68 = arith.addf %63, %67 : vector<2x16xf32>
    %69 = vector.broadcast %14 : vector<2x1xf32> to vector<2x16xf32>
    %70 = arith.mulf %69, %54 : vector<2x16xf32>
    %cst_21 = arith.constant 1.000000e+00 : f32
    %71 = vector.broadcast %cst_21 : f32 to vector<2x1xf32>
    %72 = arith.subf %71, %14 : vector<2x1xf32>
    %73 = vector.broadcast %72 : vector<2x1xf32> to vector<2x16xf32>
    %74 = arith.mulf %73, %11 : vector<2x16xf32>
    %75 = arith.addf %70, %74 : vector<2x16xf32>
    %76 = vector.broadcast %14 : vector<2x1xf32> to vector<2x16xf32>
    %77 = arith.mulf %76, %52 : vector<2x16xf32>
    %cst_22 = arith.constant 1.000000e+00 : f32
    %78 = vector.broadcast %cst_22 : f32 to vector<2x1xf32>
    %79 = arith.subf %78, %14 : vector<2x1xf32>
    %80 = vector.broadcast %79 : vector<2x1xf32> to vector<2x16xf32>
    %81 = arith.mulf %80, %12 : vector<2x16xf32>
    %82 = arith.addf %77, %81 : vector<2x16xf32>
    %83 = vector.broadcast %13 : vector<2x1xf32> to vector<2x16xf32>
    %84 = arith.mulf %61, %83 : vector<2x16xf32>
    %c0_23 = arith.constant 0 : index
    %c0_24 = arith.constant 0 : index
    %85 = vector.load %arg13[%c0_23, %c0_24] : memref<16x32xf32, #tpu.memory_space<vmem>>, vector<2x16xf32>
    tpu.vector_store %arg13[%c0_23, %c0_24], %84 {strides = array<i32>} : memref<16x32xf32, #tpu.memory_space<vmem>>, vector<2x16xf32>,
    %86 = vector.broadcast %14 : vector<2x1xf32> to vector<2x16xf32>
    %87 = arith.mulf %75, %86 : vector<2x16xf32>
    %c14 = arith.constant 14 : index
    %c16 = arith.constant 16 : index
    %88 = vector.load %arg13[%c14, %c16] : memref<16x32xf32, #tpu.memory_space<vmem>>, vector<2x16xf32>
    tpu.vector_store %arg13[%c14, %c16], %87 {strides = array<i32>} : memref<16x32xf32, #tpu.memory_space<vmem>>, vector<2x16xf32>,
    %89 = vector.extract_strided_slice %0 {offsets = [2, 0], sizes = [2, 1], strides = [1, 1]} : vector<16x1xf32> to vector<2x1xf32>
    %90 = vector.extract_strided_slice %0 {offsets = [12, 0], sizes = [2, 1], strides = [1, 1]} : vector<16x1xf32> to vector<2x1xf32>
    %91 = vector.extract_strided_slice %8 {offsets = [2, 0], sizes = [2, 64], strides = [1, 1]} : vector<16x128xf32> to vector<2x64xf32>
    %92 = arith.truncf %61 : vector<2x16xf32> to vector<2x16xbf16>
    %cst_25 = arith.constant dense<0.000000e+00> : vector<2x64xf32>
    %93 = tpu.matmul %92, %1, %cst_25 {dimension_numbers = #tpu.dot_dimension_numbers<[1], [0], [0], [1], [0, 0, 1, 1], [], []>} : vector<2x16xbf16>, vector<16x64xbf16>, vector<2x64xf32> -> vector<2x64xf32>
    %94 = arith.addf %91, %93 : vector<2x64xf32>
    %95 = vector.extract_strided_slice %8 {offsets = [12, 64], sizes = [2, 64], strides = [1, 1]} : vector<16x128xf32> to vector<2x64xf32>
    %96 = arith.truncf %75 : vector<2x16xf32> to vector<2x16xbf16>
    %cst_26 = arith.constant dense<0.000000e+00> : vector<2x64xf32>
    %97 = tpu.matmul %96, %2, %cst_26 {dimension_numbers = #tpu.dot_dimension_numbers<[1], [0], [0], [1], [0, 0, 1, 1], [], []>} : vector<2x16xbf16>, vector<16x64xbf16>, vector<2x64xf32> -> vector<2x64xf32>
    %98 = arith.addf %95, %97 : vector<2x64xf32>
    %99 = vector.extract_strided_slice %94 {offsets = [0, 0], sizes = [2, 48], strides = [1, 1]} : vector<2x64xf32> to vector<2x48xf32>
    %100 = arith.negf %99 : vector<2x48xf32>
    %101 = math.exp %100 : vector<2x48xf32>
    %cst_27 = arith.constant 1.000000e+00 : f32
    %102 = vector.broadcast %cst_27 : f32 to vector<2x48xf32>
    %103 = arith.addf %102, %101 : vector<2x48xf32>
    %104 = arith.divf %102, %103 : vector<2x48xf32>
    %105 = vector.extract_strided_slice %104 {offsets = [0, 0], sizes = [2, 16], strides = [1, 1]} : vector<2x48xf32> to vector<2x16xf32>
    %106 = vector.extract_strided_slice %104 {offsets = [0, 16], sizes = [2, 16], strides = [1, 1]} : vector<2x48xf32> to vector<2x16xf32>
    %107 = vector.extract_strided_slice %104 {offsets = [0, 32], sizes = [2, 16], strides = [1, 1]} : vector<2x48xf32> to vector<2x16xf32>
    %108 = vector.extract_strided_slice %94 {offsets = [0, 48], sizes = [2, 16], strides = [1, 1]} : vector<2x64xf32> to vector<2x16xf32>
    %109 = math.tanh %108 : vector<2x16xf32>
    %110 = arith.mulf %106, %68 : vector<2x16xf32>
    %111 = arith.mulf %105, %109 : vector<2x16xf32>
    %112 = arith.addf %110, %111 : vector<2x16xf32>
    %113 = math.tanh %112 : vector<2x16xf32>
    %114 = arith.mulf %107, %113 : vector<2x16xf32>
    %115 = vector.extract_strided_slice %98 {offsets = [0, 0], sizes = [2, 48], strides = [1, 1]} : vector<2x64xf32> to vector<2x48xf32>
    %116 = arith.negf %115 : vector<2x48xf32>
    %117 = math.exp %116 : vector<2x48xf32>
    %cst_28 = arith.constant 1.000000e+00 : f32
    %118 = vector.broadcast %cst_28 : f32 to vector<2x48xf32>
    %119 = arith.addf %118, %117 : vector<2x48xf32>
    %120 = arith.divf %118, %119 : vector<2x48xf32>
    %121 = vector.extract_strided_slice %120 {offsets = [0, 0], sizes = [2, 16], strides = [1, 1]} : vector<2x48xf32> to vector<2x16xf32>
    %122 = vector.extract_strided_slice %120 {offsets = [0, 16], sizes = [2, 16], strides = [1, 1]} : vector<2x48xf32> to vector<2x16xf32>
    %123 = vector.extract_strided_slice %120 {offsets = [0, 32], sizes = [2, 16], strides = [1, 1]} : vector<2x48xf32> to vector<2x16xf32>
    %124 = vector.extract_strided_slice %98 {offsets = [0, 48], sizes = [2, 16], strides = [1, 1]} : vector<2x64xf32> to vector<2x16xf32>
    %125 = math.tanh %124 : vector<2x16xf32>
    %126 = arith.mulf %122, %82 : vector<2x16xf32>
    %127 = arith.mulf %121, %125 : vector<2x16xf32>
    %128 = arith.addf %126, %127 : vector<2x16xf32>
    %129 = math.tanh %128 : vector<2x16xf32>
    %130 = arith.mulf %123, %129 : vector<2x16xf32>
    %131 = vector.broadcast %89 : vector<2x1xf32> to vector<2x16xf32>
    %132 = arith.mulf %131, %114 : vector<2x16xf32>
    %cst_29 = arith.constant 1.000000e+00 : f32
    %133 = vector.broadcast %cst_29 : f32 to vector<2x1xf32>
    %134 = arith.subf %133, %89 : vector<2x1xf32>
    %135 = vector.broadcast %134 : vector<2x1xf32> to vector<2x16xf32>
    %136 = arith.mulf %135, %61 : vector<2x16xf32>
    %137 = arith.addf %132, %136 : vector<2x16xf32>
    %138 = vector.broadcast %89 : vector<2x1xf32> to vector<2x16xf32>
    %139 = arith.mulf %138, %112 : vector<2x16xf32>
    %cst_30 = arith.constant 1.000000e+00 : f32
    %140 = vector.broadcast %cst_30 : f32 to vector<2x1xf32>
    %141 = arith.subf %140, %89 : vector<2x1xf32>
    %142 = vector.broadcast %141 : vector<2x1xf32> to vector<2x16xf32>
    %143 = arith.mulf %142, %68 : vector<2x16xf32>
    %144 = arith.addf %139, %143 : vector<2x16xf32>
    %145 = vector.broadcast %90 : vector<2x1xf32> to vector<2x16xf32>
    %146 = arith.mulf %145, %130 : vector<2x16xf32>
    %cst_31 = arith.constant 1.000000e+00 : f32
    %147 = vector.broadcast %cst_31 : f32 to vector<2x1xf32>
    %148 = arith.subf %147, %90 : vector<2x1xf32>
    %149 = vector.broadcast %148 : vector<2x1xf32> to vector<2x16xf32>
    %150 = arith.mulf %149, %75 : vector<2x16xf32>
    %151 = arith.addf %146, %150 : vector<2x16xf32>
    %152 = vector.broadcast %90 : vector<2x1xf32> to vector<2x16xf32>
    %153 = arith.mulf %152, %128 : vector<2x16xf32>
    %cst_32 = arith.constant 1.000000e+00 : f32
    %154 = vector.broadcast %cst_32 : f32 to vector<2x1xf32>
    %155 = arith.subf %154, %90 : vector<2x1xf32>
    %156 = vector.broadcast %155 : vector<2x1xf32> to vector<2x16xf32>
    %157 = arith.mulf %156, %82 : vector<2x16xf32>
    %158 = arith.addf %153, %157 : vector<2x16xf32>
    %159 = vector.broadcast %89 : vector<2x1xf32> to vector<2x16xf32>
    %160 = arith.mulf %137, %159 : vector<2x16xf32>
    %c2 = arith.constant 2 : index
    %c0_33 = arith.constant 0 : index
    %161 = vector.load %arg13[%c2, %c0_33] : memref<16x32xf32, #tpu.memory_space<vmem>>, vector<2x16xf32>
    tpu.vector_store %arg13[%c2, %c0_33], %160 {strides = array<i32>} : memref<16x32xf32, #tpu.memory_space<vmem>>, vector<2x16xf32>,
    %162 = vector.broadcast %90 : vector<2x1xf32> to vector<2x16xf32>
    %163 = arith.mulf %151, %162 : vector<2x16xf32>
    %c12 = arith.constant 12 : index
    %c16_34 = arith.constant 16 : index
    %164 = vector.load %arg13[%c12, %c16_34] : memref<16x32xf32, #tpu.memory_space<vmem>>, vector<2x16xf32>
    tpu.vector_store %arg13[%c12, %c16_34], %163 {strides = array<i32>} : memref<16x32xf32, #tpu.memory_space<vmem>>, vector<2x16xf32>,
    %165 = vector.extract_strided_slice %0 {offsets = [4, 0], sizes = [2, 1], strides = [1, 1]} : vector<16x1xf32> to vector<2x1xf32>
    %166 = vector.extract_strided_slice %0 {offsets = [10, 0], sizes = [2, 1], strides = [1, 1]} : vector<16x1xf32> to vector<2x1xf32>
    %167 = vector.extract_strided_slice %8 {offsets = [4, 0], sizes = [2, 64], strides = [1, 1]} : vector<16x128xf32> to vector<2x64xf32>
    %168 = arith.truncf %137 : vector<2x16xf32> to vector<2x16xbf16>
    %cst_35 = arith.constant dense<0.000000e+00> : vector<2x64xf32>
    %169 = tpu.matmul %168, %1, %cst_35 {dimension_numbers = #tpu.dot_dimension_numbers<[1], [0], [0], [1], [0, 0, 1, 1], [], []>} : vector<2x16xbf16>, vector<16x64xbf16>, vector<2x64xf32> -> vector<2x64xf32>
    %170 = arith.addf %167, %169 : vector<2x64xf32>
    %171 = vector.extract_strided_slice %8 {offsets = [10, 64], sizes = [2, 64], strides = [1, 1]} : vector<16x128xf32> to vector<2x64xf32>
    %172 = arith.truncf %151 : vector<2x16xf32> to vector<2x16xbf16>
    %cst_36 = arith.constant dense<0.000000e+00> : vector<2x64xf32>
    %173 = tpu.matmul %172, %2, %cst_36 {dimension_numbers = #tpu.dot_dimension_numbers<[1], [0], [0], [1], [0, 0, 1, 1], [], []>} : vector<2x16xbf16>, vector<16x64xbf16>, vector<2x64xf32> -> vector<2x64xf32>
    %174 = arith.addf %171, %173 : vector<2x64xf32>
    %175 = vector.extract_strided_slice %170 {offsets = [0, 0], sizes = [2, 48], strides = [1, 1]} : vector<2x64xf32> to vector<2x48xf32>
    %176 = arith.negf %175 : vector<2x48xf32>
    %177 = math.exp %176 : vector<2x48xf32>
    %cst_37 = arith.constant 1.000000e+00 : f32
    %178 = vector.broadcast %cst_37 : f32 to vector<2x48xf32>
    %179 = arith.addf %178, %177 : vector<2x48xf32>
    %180 = arith.divf %178, %179 : vector<2x48xf32>
    %181 = vector.extract_strided_slice %180 {offsets = [0, 0], sizes = [2, 16], strides = [1, 1]} : vector<2x48xf32> to vector<2x16xf32>
    %182 = vector.extract_strided_slice %180 {offsets = [0, 16], sizes = [2, 16], strides = [1, 1]} : vector<2x48xf32> to vector<2x16xf32>
    %183 = vector.extract_strided_slice %180 {offsets = [0, 32], sizes = [2, 16], strides = [1, 1]} : vector<2x48xf32> to vector<2x16xf32>
    %184 = vector.extract_strided_slice %170 {offsets = [0, 48], sizes = [2, 16], strides = [1, 1]} : vector<2x64xf32> to vector<2x16xf32>
    %185 = math.tanh %184 : vector<2x16xf32>
    %186 = arith.mulf %182, %144 : vector<2x16xf32>
    %187 = arith.mulf %181, %185 : vector<2x16xf32>
    %188 = arith.addf %186, %187 : vector<2x16xf32>
    %189 = math.tanh %188 : vector<2x16xf32>
    %190 = arith.mulf %183, %189 : vector<2x16xf32>
    %191 = vector.extract_strided_slice %174 {offsets = [0, 0], sizes = [2, 48], strides = [1, 1]} : vector<2x64xf32> to vector<2x48xf32>
    %192 = arith.negf %191 : vector<2x48xf32>
    %193 = math.exp %192 : vector<2x48xf32>
    %cst_38 = arith.constant 1.000000e+00 : f32
    %194 = vector.broadcast %cst_38 : f32 to vector<2x48xf32>
    %195 = arith.addf %194, %193 : vector<2x48xf32>
    %196 = arith.divf %194, %195 : vector<2x48xf32>
    %197 = vector.extract_strided_slice %196 {offsets = [0, 0], sizes = [2, 16], strides = [1, 1]} : vector<2x48xf32> to vector<2x16xf32>
    %198 = vector.extract_strided_slice %196 {offsets = [0, 16], sizes = [2, 16], strides = [1, 1]} : vector<2x48xf32> to vector<2x16xf32>
    %199 = vector.extract_strided_slice %196 {offsets = [0, 32], sizes = [2, 16], strides = [1, 1]} : vector<2x48xf32> to vector<2x16xf32>
    %200 = vector.extract_strided_slice %174 {offsets = [0, 48], sizes = [2, 16], strides = [1, 1]} : vector<2x64xf32> to vector<2x16xf32>
    %201 = math.tanh %200 : vector<2x16xf32>
    %202 = arith.mulf %198, %158 : vector<2x16xf32>
    %203 = arith.mulf %197, %201 : vector<2x16xf32>
    %204 = arith.addf %202, %203 : vector<2x16xf32>
    %205 = math.tanh %204 : vector<2x16xf32>
    %206 = arith.mulf %199, %205 : vector<2x16xf32>
    %207 = vector.broadcast %165 : vector<2x1xf32> to vector<2x16xf32>
    %208 = arith.mulf %207, %190 : vector<2x16xf32>
    %cst_39 = arith.constant 1.000000e+00 : f32
    %209 = vector.broadcast %cst_39 : f32 to vector<2x1xf32>
    %210 = arith.subf %209, %165 : vector<2x1xf32>
    %211 = vector.broadcast %210 : vector<2x1xf32> to vector<2x16xf32>
    %212 = arith.mulf %211, %137 : vector<2x16xf32>
    %213 = arith.addf %208, %212 : vector<2x16xf32>
    %214 = vector.broadcast %165 : vector<2x1xf32> to vector<2x16xf32>
    %215 = arith.mulf %214, %188 : vector<2x16xf32>
    %cst_40 = arith.constant 1.000000e+00 : f32
    %216 = vector.broadcast %cst_40 : f32 to vector<2x1xf32>
    %217 = arith.subf %216, %165 : vector<2x1xf32>
    %218 = vector.broadcast %217 : vector<2x1xf32> to vector<2x16xf32>
    %219 = arith.mulf %218, %144 : vector<2x16xf32>
    %220 = arith.addf %215, %219 : vector<2x16xf32>
    %221 = vector.broadcast %166 : vector<2x1xf32> to vector<2x16xf32>
    %222 = arith.mulf %221, %206 : vector<2x16xf32>
    %cst_41 = arith.constant 1.000000e+00 : f32
    %223 = vector.broadcast %cst_41 : f32 to vector<2x1xf32>
    %224 = arith.subf %223, %166 : vector<2x1xf32>
    %225 = vector.broadcast %224 : vector<2x1xf32> to vector<2x16xf32>
    %226 = arith.mulf %225, %151 : vector<2x16xf32>
    %227 = arith.addf %222, %226 : vector<2x16xf32>
    %228 = vector.broadcast %166 : vector<2x1xf32> to vector<2x16xf32>
    %229 = arith.mulf %228, %204 : vector<2x16xf32>
    %cst_42 = arith.constant 1.000000e+00 : f32
    %230 = vector.broadcast %cst_42 : f32 to vector<2x1xf32>
    %231 = arith.subf %230, %166 : vector<2x1xf32>
    %232 = vector.broadcast %231 : vector<2x1xf32> to vector<2x16xf32>
    %233 = arith.mulf %232, %158 : vector<2x16xf32>
    %234 = arith.addf %229, %233 : vector<2x16xf32>
    %235 = vector.broadcast %165 : vector<2x1xf32> to vector<2x16xf32>
    %236 = arith.mulf %213, %235 : vector<2x16xf32>
    %c4 = arith.constant 4 : index
    %c0_43 = arith.constant 0 : index
    %237 = vector.load %arg13[%c4, %c0_43] : memref<16x32xf32, #tpu.memory_space<vmem>>, vector<2x16xf32>
    tpu.vector_store %arg13[%c4, %c0_43], %236 {strides = array<i32>} : memref<16x32xf32, #tpu.memory_space<vmem>>, vector<2x16xf32>,
    %238 = vector.broadcast %166 : vector<2x1xf32> to vector<2x16xf32>
    %239 = arith.mulf %227, %238 : vector<2x16xf32>
    %c10 = arith.constant 10 : index
    %c16_44 = arith.constant 16 : index
    %240 = vector.load %arg13[%c10, %c16_44] : memref<16x32xf32, #tpu.memory_space<vmem>>, vector<2x16xf32>
    tpu.vector_store %arg13[%c10, %c16_44], %239 {strides = array<i32>} : memref<16x32xf32, #tpu.memory_space<vmem>>, vector<2x16xf32>,
    %241 = vector.extract_strided_slice %0 {offsets = [6, 0], sizes = [2, 1], strides = [1, 1]} : vector<16x1xf32> to vector<2x1xf32>
    %242 = vector.extract_strided_slice %0 {offsets = [8, 0], sizes = [2, 1], strides = [1, 1]} : vector<16x1xf32> to vector<2x1xf32>
    %243 = vector.extract_strided_slice %8 {offsets = [6, 0], sizes = [2, 64], strides = [1, 1]} : vector<16x128xf32> to vector<2x64xf32>
    %244 = arith.truncf %213 : vector<2x16xf32> to vector<2x16xbf16>
    %cst_45 = arith.constant dense<0.000000e+00> : vector<2x64xf32>
    %245 = tpu.matmul %244, %1, %cst_45 {dimension_numbers = #tpu.dot_dimension_numbers<[1], [0], [0], [1], [0, 0, 1, 1], [], []>} : vector<2x16xbf16>, vector<16x64xbf16>, vector<2x64xf32> -> vector<2x64xf32>
    %246 = arith.addf %243, %245 : vector<2x64xf32>
    %247 = vector.extract_strided_slice %8 {offsets = [8, 64], sizes = [2, 64], strides = [1, 1]} : vector<16x128xf32> to vector<2x64xf32>
    %248 = arith.truncf %227 : vector<2x16xf32> to vector<2x16xbf16>
    %cst_46 = arith.constant dense<0.000000e+00> : vector<2x64xf32>
    %249 = tpu.matmul %248, %2, %cst_46 {dimension_numbers = #tpu.dot_dimension_numbers<[1], [0], [0], [1], [0, 0, 1, 1], [], []>} : vector<2x16xbf16>, vector<16x64xbf16>, vector<2x64xf32> -> vector<2x64xf32>
    %250 = arith.addf %247, %249 : vector<2x64xf32>
    %251 = vector.extract_strided_slice %246 {offsets = [0, 0], sizes = [2, 48], strides = [1, 1]} : vector<2x64xf32> to vector<2x48xf32>
    %252 = arith.negf %251 : vector<2x48xf32>
    %253 = math.exp %252 : vector<2x48xf32>
    %cst_47 = arith.constant 1.000000e+00 : f32
    %254 = vector.broadcast %cst_47 : f32 to vector<2x48xf32>
    %255 = arith.addf %254, %253 : vector<2x48xf32>
    %256 = arith.divf %254, %255 : vector<2x48xf32>
    %257 = vector.extract_strided_slice %256 {offsets = [0, 0], sizes = [2, 16], strides = [1, 1]} : vector<2x48xf32> to vector<2x16xf32>
    %258 = vector.extract_strided_slice %256 {offsets = [0, 16], sizes = [2, 16], strides = [1, 1]} : vector<2x48xf32> to vector<2x16xf32>
    %259 = vector.extract_strided_slice %256 {offsets = [0, 32], sizes = [2, 16], strides = [1, 1]} : vector<2x48xf32> to vector<2x16xf32>
    %260 = vector.extract_strided_slice %246 {offsets = [0, 48], sizes = [2, 16], strides = [1, 1]} : vector<2x64xf32> to vector<2x16xf32>
    %261 = math.tanh %260 : vector<2x16xf32>
    %262 = arith.mulf %258, %220 : vector<2x16xf32>
    %263 = arith.mulf %257, %261 : vector<2x16xf32>
    %264 = arith.addf %262, %263 : vector<2x16xf32>
    %265 = math.tanh %264 : vector<2x16xf32>
    %266 = arith.mulf %259, %265 : vector<2x16xf32>
    %267 = vector.extract_strided_slice %250 {offsets = [0, 0], sizes = [2, 48], strides = [1, 1]} : vector<2x64xf32> to vector<2x48xf32>
    %268 = arith.negf %267 : vector<2x48xf32>
    %269 = math.exp %268 : vector<2x48xf32>
    %cst_48 = arith.constant 1.000000e+00 : f32
    %270 = vector.broadcast %cst_48 : f32 to vector<2x48xf32>
    %271 = arith.addf %270, %269 : vector<2x48xf32>
    %272 = arith.divf %270, %271 : vector<2x48xf32>
    %273 = vector.extract_strided_slice %272 {offsets = [0, 0], sizes = [2, 16], strides = [1, 1]} : vector<2x48xf32> to vector<2x16xf32>
    %274 = vector.extract_strided_slice %272 {offsets = [0, 16], sizes = [2, 16], strides = [1, 1]} : vector<2x48xf32> to vector<2x16xf32>
    %275 = vector.extract_strided_slice %272 {offsets = [0, 32], sizes = [2, 16], strides = [1, 1]} : vector<2x48xf32> to vector<2x16xf32>
    %276 = vector.extract_strided_slice %250 {offsets = [0, 48], sizes = [2, 16], strides = [1, 1]} : vector<2x64xf32> to vector<2x16xf32>
    %277 = math.tanh %276 : vector<2x16xf32>
    %278 = arith.mulf %274, %234 : vector<2x16xf32>
    %279 = arith.mulf %273, %277 : vector<2x16xf32>
    %280 = arith.addf %278, %279 : vector<2x16xf32>
    %281 = math.tanh %280 : vector<2x16xf32>
    %282 = arith.mulf %275, %281 : vector<2x16xf32>
    %283 = vector.broadcast %241 : vector<2x1xf32> to vector<2x16xf32>
    %284 = arith.mulf %283, %266 : vector<2x16xf32>
    %cst_49 = arith.constant 1.000000e+00 : f32
    %285 = vector.broadcast %cst_49 : f32 to vector<2x1xf32>
    %286 = arith.subf %285, %241 : vector<2x1xf32>
    %287 = vector.broadcast %286 : vector<2x1xf32> to vector<2x16xf32>
    %288 = arith.mulf %287, %213 : vector<2x16xf32>
    %289 = arith.addf %284, %288 : vector<2x16xf32>
    %290 = vector.broadcast %241 : vector<2x1xf32> to vector<2x16xf32>
    %291 = arith.mulf %290, %264 : vector<2x16xf32>
    %cst_50 = arith.constant 1.000000e+00 : f32
    %292 = vector.broadcast %cst_50 : f32 to vector<2x1xf32>
    %293 = arith.subf %292, %241 : vector<2x1xf32>
    %294 = vector.broadcast %293 : vector<2x1xf32> to vector<2x16xf32>
    %295 = arith.mulf %294, %220 : vector<2x16xf32>
    %296 = arith.addf %291, %295 : vector<2x16xf32>
    %297 = vector.broadcast %242 : vector<2x1xf32> to vector<2x16xf32>
    %298 = arith.mulf %297, %282 : vector<2x16xf32>
    %cst_51 = arith.constant 1.000000e+00 : f32
    %299 = vector.broadcast %cst_51 : f32 to vector<2x1xf32>
    %300 = arith.subf %299, %242 : vector<2x1xf32>
    %301 = vector.broadcast %300 : vector<2x1xf32> to vector<2x16xf32>
    %302 = arith.mulf %301, %227 : vector<2x16xf32>
    %303 = arith.addf %298, %302 : vector<2x16xf32>
    %304 = vector.broadcast %242 : vector<2x1xf32> to vector<2x16xf32>
    %305 = arith.mulf %304, %280 : vector<2x16xf32>
    %cst_52 = arith.constant 1.000000e+00 : f32
    %306 = vector.broadcast %cst_52 : f32 to vector<2x1xf32>
    %307 = arith.subf %306, %242 : vector<2x1xf32>
    %308 = vector.broadcast %307 : vector<2x1xf32> to vector<2x16xf32>
    %309 = arith.mulf %308, %234 : vector<2x16xf32>
    %310 = arith.addf %305, %309 : vector<2x16xf32>
    %311 = vector.broadcast %241 : vector<2x1xf32> to vector<2x16xf32>
    %312 = arith.mulf %289, %311 : vector<2x16xf32>
    %c6 = arith.constant 6 : index
    %c0_53 = arith.constant 0 : index
    %313 = vector.load %arg13[%c6, %c0_53] : memref<16x32xf32, #tpu.memory_space<vmem>>, vector<2x16xf32>
    tpu.vector_store %arg13[%c6, %c0_53], %312 {strides = array<i32>} : memref<16x32xf32, #tpu.memory_space<vmem>>, vector<2x16xf32>,
    %314 = vector.broadcast %242 : vector<2x1xf32> to vector<2x16xf32>
    %315 = arith.mulf %303, %314 : vector<2x16xf32>
    %c8 = arith.constant 8 : index
    %c16_54 = arith.constant 16 : index
    %316 = vector.load %arg13[%c8, %c16_54] : memref<16x32xf32, #tpu.memory_space<vmem>>, vector<2x16xf32>
    tpu.vector_store %arg13[%c8, %c16_54], %315 {strides = array<i32>} : memref<16x32xf32, #tpu.memory_space<vmem>>, vector<2x16xf32>,
    %317 = vector.extract_strided_slice %0 {offsets = [8, 0], sizes = [2, 1], strides = [1, 1]} : vector<16x1xf32> to vector<2x1xf32>
    %318 = vector.extract_strided_slice %0 {offsets = [6, 0], sizes = [2, 1], strides = [1, 1]} : vector<16x1xf32> to vector<2x1xf32>
    %319 = vector.extract_strided_slice %8 {offsets = [8, 0], sizes = [2, 64], strides = [1, 1]} : vector<16x128xf32> to vector<2x64xf32>
    %320 = arith.truncf %289 : vector<2x16xf32> to vector<2x16xbf16>
    %cst_55 = arith.constant dense<0.000000e+00> : vector<2x64xf32>
    %321 = tpu.matmul %320, %1, %cst_55 {dimension_numbers = #tpu.dot_dimension_numbers<[1], [0], [0], [1], [0, 0, 1, 1], [], []>} : vector<2x16xbf16>, vector<16x64xbf16>, vector<2x64xf32> -> vector<2x64xf32>
    %322 = arith.addf %319, %321 : vector<2x64xf32>
    %323 = vector.extract_strided_slice %8 {offsets = [6, 64], sizes = [2, 64], strides = [1, 1]} : vector<16x128xf32> to vector<2x64xf32>
    %324 = arith.truncf %303 : vector<2x16xf32> to vector<2x16xbf16>
    %cst_56 = arith.constant dense<0.000000e+00> : vector<2x64xf32>
    %325 = tpu.matmul %324, %2, %cst_56 {dimension_numbers = #tpu.dot_dimension_numbers<[1], [0], [0], [1], [0, 0, 1, 1], [], []>} : vector<2x16xbf16>, vector<16x64xbf16>, vector<2x64xf32> -> vector<2x64xf32>
    %326 = arith.addf %323, %325 : vector<2x64xf32>
    %327 = vector.extract_strided_slice %322 {offsets = [0, 0], sizes = [2, 48], strides = [1, 1]} : vector<2x64xf32> to vector<2x48xf32>
    %328 = arith.negf %327 : vector<2x48xf32>
    %329 = math.exp %328 : vector<2x48xf32>
    %cst_57 = arith.constant 1.000000e+00 : f32
    %330 = vector.broadcast %cst_57 : f32 to vector<2x48xf32>
    %331 = arith.addf %330, %329 : vector<2x48xf32>
    %332 = arith.divf %330, %331 : vector<2x48xf32>
    %333 = vector.extract_strided_slice %332 {offsets = [0, 0], sizes = [2, 16], strides = [1, 1]} : vector<2x48xf32> to vector<2x16xf32>
    %334 = vector.extract_strided_slice %332 {offsets = [0, 16], sizes = [2, 16], strides = [1, 1]} : vector<2x48xf32> to vector<2x16xf32>
    %335 = vector.extract_strided_slice %332 {offsets = [0, 32], sizes = [2, 16], strides = [1, 1]} : vector<2x48xf32> to vector<2x16xf32>
    %336 = vector.extract_strided_slice %322 {offsets = [0, 48], sizes = [2, 16], strides = [1, 1]} : vector<2x64xf32> to vector<2x16xf32>
    %337 = math.tanh %336 : vector<2x16xf32>
    %338 = arith.mulf %334, %296 : vector<2x16xf32>
    %339 = arith.mulf %333, %337 : vector<2x16xf32>
    %340 = arith.addf %338, %339 : vector<2x16xf32>
    %341 = math.tanh %340 : vector<2x16xf32>
    %342 = arith.mulf %335, %341 : vector<2x16xf32>
    %343 = vector.extract_strided_slice %326 {offsets = [0, 0], sizes = [2, 48], strides = [1, 1]} : vector<2x64xf32> to vector<2x48xf32>
    %344 = arith.negf %343 : vector<2x48xf32>
    %345 = math.exp %344 : vector<2x48xf32>
    %cst_58 = arith.constant 1.000000e+00 : f32
    %346 = vector.broadcast %cst_58 : f32 to vector<2x48xf32>
    %347 = arith.addf %346, %345 : vector<2x48xf32>
    %348 = arith.divf %346, %347 : vector<2x48xf32>
    %349 = vector.extract_strided_slice %348 {offsets = [0, 0], sizes = [2, 16], strides = [1, 1]} : vector<2x48xf32> to vector<2x16xf32>
    %350 = vector.extract_strided_slice %348 {offsets = [0, 16], sizes = [2, 16], strides = [1, 1]} : vector<2x48xf32> to vector<2x16xf32>
    %351 = vector.extract_strided_slice %348 {offsets = [0, 32], sizes = [2, 16], strides = [1, 1]} : vector<2x48xf32> to vector<2x16xf32>
    %352 = vector.extract_strided_slice %326 {offsets = [0, 48], sizes = [2, 16], strides = [1, 1]} : vector<2x64xf32> to vector<2x16xf32>
    %353 = math.tanh %352 : vector<2x16xf32>
    %354 = arith.mulf %350, %310 : vector<2x16xf32>
    %355 = arith.mulf %349, %353 : vector<2x16xf32>
    %356 = arith.addf %354, %355 : vector<2x16xf32>
    %357 = math.tanh %356 : vector<2x16xf32>
    %358 = arith.mulf %351, %357 : vector<2x16xf32>
    %359 = vector.broadcast %317 : vector<2x1xf32> to vector<2x16xf32>
    %360 = arith.mulf %359, %342 : vector<2x16xf32>
    %cst_59 = arith.constant 1.000000e+00 : f32
    %361 = vector.broadcast %cst_59 : f32 to vector<2x1xf32>
    %362 = arith.subf %361, %317 : vector<2x1xf32>
    %363 = vector.broadcast %362 : vector<2x1xf32> to vector<2x16xf32>
    %364 = arith.mulf %363, %289 : vector<2x16xf32>
    %365 = arith.addf %360, %364 : vector<2x16xf32>
    %366 = vector.broadcast %317 : vector<2x1xf32> to vector<2x16xf32>
    %367 = arith.mulf %366, %340 : vector<2x16xf32>
    %cst_60 = arith.constant 1.000000e+00 : f32
    %368 = vector.broadcast %cst_60 : f32 to vector<2x1xf32>
    %369 = arith.subf %368, %317 : vector<2x1xf32>
    %370 = vector.broadcast %369 : vector<2x1xf32> to vector<2x16xf32>
    %371 = arith.mulf %370, %296 : vector<2x16xf32>
    %372 = arith.addf %367, %371 : vector<2x16xf32>
    %373 = vector.broadcast %318 : vector<2x1xf32> to vector<2x16xf32>
    %374 = arith.mulf %373, %358 : vector<2x16xf32>
    %cst_61 = arith.constant 1.000000e+00 : f32
    %375 = vector.broadcast %cst_61 : f32 to vector<2x1xf32>
    %376 = arith.subf %375, %318 : vector<2x1xf32>
    %377 = vector.broadcast %376 : vector<2x1xf32> to vector<2x16xf32>
    %378 = arith.mulf %377, %303 : vector<2x16xf32>
    %379 = arith.addf %374, %378 : vector<2x16xf32>
    %380 = vector.broadcast %318 : vector<2x1xf32> to vector<2x16xf32>
    %381 = arith.mulf %380, %356 : vector<2x16xf32>
    %cst_62 = arith.constant 1.000000e+00 : f32
    %382 = vector.broadcast %cst_62 : f32 to vector<2x1xf32>
    %383 = arith.subf %382, %318 : vector<2x1xf32>
    %384 = vector.broadcast %383 : vector<2x1xf32> to vector<2x16xf32>
    %385 = arith.mulf %384, %310 : vector<2x16xf32>
    %386 = arith.addf %381, %385 : vector<2x16xf32>
    %387 = vector.broadcast %317 : vector<2x1xf32> to vector<2x16xf32>
    %388 = arith.mulf %365, %387 : vector<2x16xf32>
    %c8_63 = arith.constant 8 : index
    %c0_64 = arith.constant 0 : index
    %389 = vector.load %arg13[%c8_63, %c0_64] : memref<16x32xf32, #tpu.memory_space<vmem>>, vector<2x16xf32>
    tpu.vector_store %arg13[%c8_63, %c0_64], %388 {strides = array<i32>} : memref<16x32xf32, #tpu.memory_space<vmem>>, vector<2x16xf32>,
    %390 = vector.broadcast %318 : vector<2x1xf32> to vector<2x16xf32>
    %391 = arith.mulf %379, %390 : vector<2x16xf32>
    %c6_65 = arith.constant 6 : index
    %c16_66 = arith.constant 16 : index
    %392 = vector.load %arg13[%c6_65, %c16_66] : memref<16x32xf32, #tpu.memory_space<vmem>>, vector<2x16xf32>
    tpu.vector_store %arg13[%c6_65, %c16_66], %391 {strides = array<i32>} : memref<16x32xf32, #tpu.memory_space<vmem>>, vector<2x16xf32>,
    %393 = vector.extract_strided_slice %0 {offsets = [10, 0], sizes = [2, 1], strides = [1, 1]} : vector<16x1xf32> to vector<2x1xf32>
    %394 = vector.extract_strided_slice %0 {offsets = [4, 0], sizes = [2, 1], strides = [1, 1]} : vector<16x1xf32> to vector<2x1xf32>
    %395 = vector.extract_strided_slice %8 {offsets = [10, 0], sizes = [2, 64], strides = [1, 1]} : vector<16x128xf32> to vector<2x64xf32>
    %396 = arith.truncf %365 : vector<2x16xf32> to vector<2x16xbf16>
    %cst_67 = arith.constant dense<0.000000e+00> : vector<2x64xf32>
    %397 = tpu.matmul %396, %1, %cst_67 {dimension_numbers = #tpu.dot_dimension_numbers<[1], [0], [0], [1], [0, 0, 1, 1], [], []>} : vector<2x16xbf16>, vector<16x64xbf16>, vector<2x64xf32> -> vector<2x64xf32>
    %398 = arith.addf %395, %397 : vector<2x64xf32>
    %399 = vector.extract_strided_slice %8 {offsets = [4, 64], sizes = [2, 64], strides = [1, 1]} : vector<16x128xf32> to vector<2x64xf32>
    %400 = arith.truncf %379 : vector<2x16xf32> to vector<2x16xbf16>
    %cst_68 = arith.constant dense<0.000000e+00> : vector<2x64xf32>
    %401 = tpu.matmul %400, %2, %cst_68 {dimension_numbers = #tpu.dot_dimension_numbers<[1], [0], [0], [1], [0, 0, 1, 1], [], []>} : vector<2x16xbf16>, vector<16x64xbf16>, vector<2x64xf32> -> vector<2x64xf32>
    %402 = arith.addf %399, %401 : vector<2x64xf32>
    %403 = vector.extract_strided_slice %398 {offsets = [0, 0], sizes = [2, 48], strides = [1, 1]} : vector<2x64xf32> to vector<2x48xf32>
    %404 = arith.negf %403 : vector<2x48xf32>
    %405 = math.exp %404 : vector<2x48xf32>
    %cst_69 = arith.constant 1.000000e+00 : f32
    %406 = vector.broadcast %cst_69 : f32 to vector<2x48xf32>
    %407 = arith.addf %406, %405 : vector<2x48xf32>
    %408 = arith.divf %406, %407 : vector<2x48xf32>
    %409 = vector.extract_strided_slice %408 {offsets = [0, 0], sizes = [2, 16], strides = [1, 1]} : vector<2x48xf32> to vector<2x16xf32>
    %410 = vector.extract_strided_slice %408 {offsets = [0, 16], sizes = [2, 16], strides = [1, 1]} : vector<2x48xf32> to vector<2x16xf32>
    %411 = vector.extract_strided_slice %408 {offsets = [0, 32], sizes = [2, 16], strides = [1, 1]} : vector<2x48xf32> to vector<2x16xf32>
    %412 = vector.extract_strided_slice %398 {offsets = [0, 48], sizes = [2, 16], strides = [1, 1]} : vector<2x64xf32> to vector<2x16xf32>
    %413 = math.tanh %412 : vector<2x16xf32>
    %414 = arith.mulf %410, %372 : vector<2x16xf32>
    %415 = arith.mulf %409, %413 : vector<2x16xf32>
    %416 = arith.addf %414, %415 : vector<2x16xf32>
    %417 = math.tanh %416 : vector<2x16xf32>
    %418 = arith.mulf %411, %417 : vector<2x16xf32>
    %419 = vector.extract_strided_slice %402 {offsets = [0, 0], sizes = [2, 48], strides = [1, 1]} : vector<2x64xf32> to vector<2x48xf32>
    %420 = arith.negf %419 : vector<2x48xf32>
    %421 = math.exp %420 : vector<2x48xf32>
    %cst_70 = arith.constant 1.000000e+00 : f32
    %422 = vector.broadcast %cst_70 : f32 to vector<2x48xf32>
    %423 = arith.addf %422, %421 : vector<2x48xf32>
    %424 = arith.divf %422, %423 : vector<2x48xf32>
    %425 = vector.extract_strided_slice %424 {offsets = [0, 0], sizes = [2, 16], strides = [1, 1]} : vector<2x48xf32> to vector<2x16xf32>
    %426 = vector.extract_strided_slice %424 {offsets = [0, 16], sizes = [2, 16], strides = [1, 1]} : vector<2x48xf32> to vector<2x16xf32>
    %427 = vector.extract_strided_slice %424 {offsets = [0, 32], sizes = [2, 16], strides = [1, 1]} : vector<2x48xf32> to vector<2x16xf32>
    %428 = vector.extract_strided_slice %402 {offsets = [0, 48], sizes = [2, 16], strides = [1, 1]} : vector<2x64xf32> to vector<2x16xf32>
    %429 = math.tanh %428 : vector<2x16xf32>
    %430 = arith.mulf %426, %386 : vector<2x16xf32>
    %431 = arith.mulf %425, %429 : vector<2x16xf32>
    %432 = arith.addf %430, %431 : vector<2x16xf32>
    %433 = math.tanh %432 : vector<2x16xf32>
    %434 = arith.mulf %427, %433 : vector<2x16xf32>
    %435 = vector.broadcast %393 : vector<2x1xf32> to vector<2x16xf32>
    %436 = arith.mulf %435, %418 : vector<2x16xf32>
    %cst_71 = arith.constant 1.000000e+00 : f32
    %437 = vector.broadcast %cst_71 : f32 to vector<2x1xf32>
    %438 = arith.subf %437, %393 : vector<2x1xf32>
    %439 = vector.broadcast %438 : vector<2x1xf32> to vector<2x16xf32>
    %440 = arith.mulf %439, %365 : vector<2x16xf32>
    %441 = arith.addf %436, %440 : vector<2x16xf32>
    %442 = vector.broadcast %393 : vector<2x1xf32> to vector<2x16xf32>
    %443 = arith.mulf %442, %416 : vector<2x16xf32>
    %cst_72 = arith.constant 1.000000e+00 : f32
    %444 = vector.broadcast %cst_72 : f32 to vector<2x1xf32>
    %445 = arith.subf %444, %393 : vector<2x1xf32>
    %446 = vector.broadcast %445 : vector<2x1xf32> to vector<2x16xf32>
    %447 = arith.mulf %446, %372 : vector<2x16xf32>
    %448 = arith.addf %443, %447 : vector<2x16xf32>
    %449 = vector.broadcast %394 : vector<2x1xf32> to vector<2x16xf32>
    %450 = arith.mulf %449, %434 : vector<2x16xf32>
    %cst_73 = arith.constant 1.000000e+00 : f32
    %451 = vector.broadcast %cst_73 : f32 to vector<2x1xf32>
    %452 = arith.subf %451, %394 : vector<2x1xf32>
    %453 = vector.broadcast %452 : vector<2x1xf32> to vector<2x16xf32>
    %454 = arith.mulf %453, %379 : vector<2x16xf32>
    %455 = arith.addf %450, %454 : vector<2x16xf32>
    %456 = vector.broadcast %394 : vector<2x1xf32> to vector<2x16xf32>
    %457 = arith.mulf %456, %432 : vector<2x16xf32>
    %cst_74 = arith.constant 1.000000e+00 : f32
    %458 = vector.broadcast %cst_74 : f32 to vector<2x1xf32>
    %459 = arith.subf %458, %394 : vector<2x1xf32>
    %460 = vector.broadcast %459 : vector<2x1xf32> to vector<2x16xf32>
    %461 = arith.mulf %460, %386 : vector<2x16xf32>
    %462 = arith.addf %457, %461 : vector<2x16xf32>
    %463 = vector.broadcast %393 : vector<2x1xf32> to vector<2x16xf32>
    %464 = arith.mulf %441, %463 : vector<2x16xf32>
    %c10_75 = arith.constant 10 : index
    %c0_76 = arith.constant 0 : index
    %465 = vector.load %arg13[%c10_75, %c0_76] : memref<16x32xf32, #tpu.memory_space<vmem>>, vector<2x16xf32>
    tpu.vector_store %arg13[%c10_75, %c0_76], %464 {strides = array<i32>} : memref<16x32xf32, #tpu.memory_space<vmem>>, vector<2x16xf32>,
    %466 = vector.broadcast %394 : vector<2x1xf32> to vector<2x16xf32>
    %467 = arith.mulf %455, %466 : vector<2x16xf32>
    %c4_77 = arith.constant 4 : index
    %c16_78 = arith.constant 16 : index
    %468 = vector.load %arg13[%c4_77, %c16_78] : memref<16x32xf32, #tpu.memory_space<vmem>>, vector<2x16xf32>
    tpu.vector_store %arg13[%c4_77, %c16_78], %467 {strides = array<i32>} : memref<16x32xf32, #tpu.memory_space<vmem>>, vector<2x16xf32>,
    %469 = vector.extract_strided_slice %0 {offsets = [12, 0], sizes = [2, 1], strides = [1, 1]} : vector<16x1xf32> to vector<2x1xf32>
    %470 = vector.extract_strided_slice %0 {offsets = [2, 0], sizes = [2, 1], strides = [1, 1]} : vector<16x1xf32> to vector<2x1xf32>
    %471 = vector.extract_strided_slice %8 {offsets = [12, 0], sizes = [2, 64], strides = [1, 1]} : vector<16x128xf32> to vector<2x64xf32>
    %472 = arith.truncf %441 : vector<2x16xf32> to vector<2x16xbf16>
    %cst_79 = arith.constant dense<0.000000e+00> : vector<2x64xf32>
    %473 = tpu.matmul %472, %1, %cst_79 {dimension_numbers = #tpu.dot_dimension_numbers<[1], [0], [0], [1], [0, 0, 1, 1], [], []>} : vector<2x16xbf16>, vector<16x64xbf16>, vector<2x64xf32> -> vector<2x64xf32>
    %474 = arith.addf %471, %473 : vector<2x64xf32>
    %475 = vector.extract_strided_slice %8 {offsets = [2, 64], sizes = [2, 64], strides = [1, 1]} : vector<16x128xf32> to vector<2x64xf32>
    %476 = arith.truncf %455 : vector<2x16xf32> to vector<2x16xbf16>
    %cst_80 = arith.constant dense<0.000000e+00> : vector<2x64xf32>
    %477 = tpu.matmul %476, %2, %cst_80 {dimension_numbers = #tpu.dot_dimension_numbers<[1], [0], [0], [1], [0, 0, 1, 1], [], []>} : vector<2x16xbf16>, vector<16x64xbf16>, vector<2x64xf32> -> vector<2x64xf32>
    %478 = arith.addf %475, %477 : vector<2x64xf32>
    %479 = vector.extract_strided_slice %474 {offsets = [0, 0], sizes = [2, 48], strides = [1, 1]} : vector<2x64xf32> to vector<2x48xf32>
    %480 = arith.negf %479 : vector<2x48xf32>
    %481 = math.exp %480 : vector<2x48xf32>
    %cst_81 = arith.constant 1.000000e+00 : f32
    %482 = vector.broadcast %cst_81 : f32 to vector<2x48xf32>
    %483 = arith.addf %482, %481 : vector<2x48xf32>
    %484 = arith.divf %482, %483 : vector<2x48xf32>
    %485 = vector.extract_strided_slice %484 {offsets = [0, 0], sizes = [2, 16], strides = [1, 1]} : vector<2x48xf32> to vector<2x16xf32>
    %486 = vector.extract_strided_slice %484 {offsets = [0, 16], sizes = [2, 16], strides = [1, 1]} : vector<2x48xf32> to vector<2x16xf32>
    %487 = vector.extract_strided_slice %484 {offsets = [0, 32], sizes = [2, 16], strides = [1, 1]} : vector<2x48xf32> to vector<2x16xf32>
    %488 = vector.extract_strided_slice %474 {offsets = [0, 48], sizes = [2, 16], strides = [1, 1]} : vector<2x64xf32> to vector<2x16xf32>
    %489 = math.tanh %488 : vector<2x16xf32>
    %490 = arith.mulf %486, %448 : vector<2x16xf32>
    %491 = arith.mulf %485, %489 : vector<2x16xf32>
    %492 = arith.addf %490, %491 : vector<2x16xf32>
    %493 = math.tanh %492 : vector<2x16xf32>
    %494 = arith.mulf %487, %493 : vector<2x16xf32>
    %495 = vector.extract_strided_slice %478 {offsets = [0, 0], sizes = [2, 48], strides = [1, 1]} : vector<2x64xf32> to vector<2x48xf32>
    %496 = arith.negf %495 : vector<2x48xf32>
    %497 = math.exp %496 : vector<2x48xf32>
    %cst_82 = arith.constant 1.000000e+00 : f32
    %498 = vector.broadcast %cst_82 : f32 to vector<2x48xf32>
    %499 = arith.addf %498, %497 : vector<2x48xf32>
    %500 = arith.divf %498, %499 : vector<2x48xf32>
    %501 = vector.extract_strided_slice %500 {offsets = [0, 0], sizes = [2, 16], strides = [1, 1]} : vector<2x48xf32> to vector<2x16xf32>
    %502 = vector.extract_strided_slice %500 {offsets = [0, 16], sizes = [2, 16], strides = [1, 1]} : vector<2x48xf32> to vector<2x16xf32>
    %503 = vector.extract_strided_slice %500 {offsets = [0, 32], sizes = [2, 16], strides = [1, 1]} : vector<2x48xf32> to vector<2x16xf32>
    %504 = vector.extract_strided_slice %478 {offsets = [0, 48], sizes = [2, 16], strides = [1, 1]} : vector<2x64xf32> to vector<2x16xf32>
    %505 = math.tanh %504 : vector<2x16xf32>
    %506 = arith.mulf %502, %462 : vector<2x16xf32>
    %507 = arith.mulf %501, %505 : vector<2x16xf32>
    %508 = arith.addf %506, %507 : vector<2x16xf32>
    %509 = math.tanh %508 : vector<2x16xf32>
    %510 = arith.mulf %503, %509 : vector<2x16xf32>
    %511 = vector.broadcast %469 : vector<2x1xf32> to vector<2x16xf32>
    %512 = arith.mulf %511, %494 : vector<2x16xf32>
    %cst_83 = arith.constant 1.000000e+00 : f32
    %513 = vector.broadcast %cst_83 : f32 to vector<2x1xf32>
    %514 = arith.subf %513, %469 : vector<2x1xf32>
    %515 = vector.broadcast %514 : vector<2x1xf32> to vector<2x16xf32>
    %516 = arith.mulf %515, %441 : vector<2x16xf32>
    %517 = arith.addf %512, %516 : vector<2x16xf32>
    %518 = vector.broadcast %469 : vector<2x1xf32> to vector<2x16xf32>
    %519 = arith.mulf %518, %492 : vector<2x16xf32>
    %cst_84 = arith.constant 1.000000e+00 : f32
    %520 = vector.broadcast %cst_84 : f32 to vector<2x1xf32>
    %521 = arith.subf %520, %469 : vector<2x1xf32>
    %522 = vector.broadcast %521 : vector<2x1xf32> to vector<2x16xf32>
    %523 = arith.mulf %522, %448 : vector<2x16xf32>
    %524 = arith.addf %519, %523 : vector<2x16xf32>
    %525 = vector.broadcast %470 : vector<2x1xf32> to vector<2x16xf32>
    %526 = arith.mulf %525, %510 : vector<2x16xf32>
    %cst_85 = arith.constant 1.000000e+00 : f32
    %527 = vector.broadcast %cst_85 : f32 to vector<2x1xf32>
    %528 = arith.subf %527, %470 : vector<2x1xf32>
    %529 = vector.broadcast %528 : vector<2x1xf32> to vector<2x16xf32>
    %530 = arith.mulf %529, %455 : vector<2x16xf32>
    %531 = arith.addf %526, %530 : vector<2x16xf32>
    %532 = vector.broadcast %470 : vector<2x1xf32> to vector<2x16xf32>
    %533 = arith.mulf %532, %508 : vector<2x16xf32>
    %cst_86 = arith.constant 1.000000e+00 : f32
    %534 = vector.broadcast %cst_86 : f32 to vector<2x1xf32>
    %535 = arith.subf %534, %470 : vector<2x1xf32>
    %536 = vector.broadcast %535 : vector<2x1xf32> to vector<2x16xf32>
    %537 = arith.mulf %536, %462 : vector<2x16xf32>
    %538 = arith.addf %533, %537 : vector<2x16xf32>
    %539 = vector.broadcast %469 : vector<2x1xf32> to vector<2x16xf32>
    %540 = arith.mulf %517, %539 : vector<2x16xf32>
    %c12_87 = arith.constant 12 : index
    %c0_88 = arith.constant 0 : index
    %541 = vector.load %arg13[%c12_87, %c0_88] : memref<16x32xf32, #tpu.memory_space<vmem>>, vector<2x16xf32>
    tpu.vector_store %arg13[%c12_87, %c0_88], %540 {strides = array<i32>} : memref<16x32xf32, #tpu.memory_space<vmem>>, vector<2x16xf32>,
    %542 = vector.broadcast %470 : vector<2x1xf32> to vector<2x16xf32>
    %543 = arith.mulf %531, %542 : vector<2x16xf32>
    %c2_89 = arith.constant 2 : index
    %c16_90 = arith.constant 16 : index
    %544 = vector.load %arg13[%c2_89, %c16_90] : memref<16x32xf32, #tpu.memory_space<vmem>>, vector<2x16xf32>
    tpu.vector_store %arg13[%c2_89, %c16_90], %543 {strides = array<i32>} : memref<16x32xf32, #tpu.memory_space<vmem>>, vector<2x16xf32>,
    %545 = vector.extract_strided_slice %0 {offsets = [14, 0], sizes = [2, 1], strides = [1, 1]} : vector<16x1xf32> to vector<2x1xf32>
    %546 = vector.extract_strided_slice %0 {offsets = [0, 0], sizes = [2, 1], strides = [1, 1]} : vector<16x1xf32> to vector<2x1xf32>
    %547 = vector.extract_strided_slice %8 {offsets = [14, 0], sizes = [2, 64], strides = [1, 1]} : vector<16x128xf32> to vector<2x64xf32>
    %548 = arith.truncf %517 : vector<2x16xf32> to vector<2x16xbf16>
    %cst_91 = arith.constant dense<0.000000e+00> : vector<2x64xf32>
    %549 = tpu.matmul %548, %1, %cst_91 {dimension_numbers = #tpu.dot_dimension_numbers<[1], [0], [0], [1], [0, 0, 1, 1], [], []>} : vector<2x16xbf16>, vector<16x64xbf16>, vector<2x64xf32> -> vector<2x64xf32>
    %550 = arith.addf %547, %549 : vector<2x64xf32>
    %551 = vector.extract_strided_slice %8 {offsets = [0, 64], sizes = [2, 64], strides = [1, 1]} : vector<16x128xf32> to vector<2x64xf32>
    %552 = arith.truncf %531 : vector<2x16xf32> to vector<2x16xbf16>
    %cst_92 = arith.constant dense<0.000000e+00> : vector<2x64xf32>
    %553 = tpu.matmul %552, %2, %cst_92 {dimension_numbers = #tpu.dot_dimension_numbers<[1], [0], [0], [1], [0, 0, 1, 1], [], []>} : vector<2x16xbf16>, vector<16x64xbf16>, vector<2x64xf32> -> vector<2x64xf32>
    %554 = arith.addf %551, %553 : vector<2x64xf32>
    %555 = vector.extract_strided_slice %550 {offsets = [0, 0], sizes = [2, 48], strides = [1, 1]} : vector<2x64xf32> to vector<2x48xf32>
    %556 = arith.negf %555 : vector<2x48xf32>
    %557 = math.exp %556 : vector<2x48xf32>
    %cst_93 = arith.constant 1.000000e+00 : f32
    %558 = vector.broadcast %cst_93 : f32 to vector<2x48xf32>
    %559 = arith.addf %558, %557 : vector<2x48xf32>
    %560 = arith.divf %558, %559 : vector<2x48xf32>
    %561 = vector.extract_strided_slice %560 {offsets = [0, 0], sizes = [2, 16], strides = [1, 1]} : vector<2x48xf32> to vector<2x16xf32>
    %562 = vector.extract_strided_slice %560 {offsets = [0, 16], sizes = [2, 16], strides = [1, 1]} : vector<2x48xf32> to vector<2x16xf32>
    %563 = vector.extract_strided_slice %560 {offsets = [0, 32], sizes = [2, 16], strides = [1, 1]} : vector<2x48xf32> to vector<2x16xf32>
    %564 = vector.extract_strided_slice %550 {offsets = [0, 48], sizes = [2, 16], strides = [1, 1]} : vector<2x64xf32> to vector<2x16xf32>
    %565 = math.tanh %564 : vector<2x16xf32>
    %566 = arith.mulf %562, %524 : vector<2x16xf32>
    %567 = arith.mulf %561, %565 : vector<2x16xf32>
    %568 = arith.addf %566, %567 : vector<2x16xf32>
    %569 = math.tanh %568 : vector<2x16xf32>
    %570 = arith.mulf %563, %569 : vector<2x16xf32>
    %571 = vector.extract_strided_slice %554 {offsets = [0, 0], sizes = [2, 48], strides = [1, 1]} : vector<2x64xf32> to vector<2x48xf32>
    %572 = arith.negf %571 : vector<2x48xf32>
    %573 = math.exp %572 : vector<2x48xf32>
    %cst_94 = arith.constant 1.000000e+00 : f32
    %574 = vector.broadcast %cst_94 : f32 to vector<2x48xf32>
    %575 = arith.addf %574, %573 : vector<2x48xf32>
    %576 = arith.divf %574, %575 : vector<2x48xf32>
    %577 = vector.extract_strided_slice %576 {offsets = [0, 0], sizes = [2, 16], strides = [1, 1]} : vector<2x48xf32> to vector<2x16xf32>
    %578 = vector.extract_strided_slice %576 {offsets = [0, 16], sizes = [2, 16], strides = [1, 1]} : vector<2x48xf32> to vector<2x16xf32>
    %579 = vector.extract_strided_slice %576 {offsets = [0, 32], sizes = [2, 16], strides = [1, 1]} : vector<2x48xf32> to vector<2x16xf32>
    %580 = vector.extract_strided_slice %554 {offsets = [0, 48], sizes = [2, 16], strides = [1, 1]} : vector<2x64xf32> to vector<2x16xf32>
    %581 = math.tanh %580 : vector<2x16xf32>
    %582 = arith.mulf %578, %538 : vector<2x16xf32>
    %583 = arith.mulf %577, %581 : vector<2x16xf32>
    %584 = arith.addf %582, %583 : vector<2x16xf32>
    %585 = math.tanh %584 : vector<2x16xf32>
    %586 = arith.mulf %579, %585 : vector<2x16xf32>
    %587 = vector.broadcast %545 : vector<2x1xf32> to vector<2x16xf32>
    %588 = arith.mulf %587, %570 : vector<2x16xf32>
    %cst_95 = arith.constant 1.000000e+00 : f32
    %589 = vector.broadcast %cst_95 : f32 to vector<2x1xf32>
    %590 = arith.subf %589, %545 : vector<2x1xf32>
    %591 = vector.broadcast %590 : vector<2x1xf32> to vector<2x16xf32>
    %592 = arith.mulf %591, %517 : vector<2x16xf32>
    %593 = arith.addf %588, %592 : vector<2x16xf32>
    %594 = vector.broadcast %546 : vector<2x1xf32> to vector<2x16xf32>
    %595 = arith.mulf %594, %586 : vector<2x16xf32>
    %cst_96 = arith.constant 1.000000e+00 : f32
    %596 = vector.broadcast %cst_96 : f32 to vector<2x1xf32>
    %597 = arith.subf %596, %546 : vector<2x1xf32>
    %598 = vector.broadcast %597 : vector<2x1xf32> to vector<2x16xf32>
    %599 = arith.mulf %598, %531 : vector<2x16xf32>
    %600 = arith.addf %595, %599 : vector<2x16xf32>
    %601 = vector.broadcast %545 : vector<2x1xf32> to vector<2x16xf32>
    %602 = arith.mulf %593, %601 : vector<2x16xf32>
    %c14_97 = arith.constant 14 : index
    %c0_98 = arith.constant 0 : index
    %603 = vector.load %arg13[%c14_97, %c0_98] : memref<16x32xf32, #tpu.memory_space<vmem>>, vector<2x16xf32>
    tpu.vector_store %arg13[%c14_97, %c0_98], %602 {strides = array<i32>} : memref<16x32xf32, #tpu.memory_space<vmem>>, vector<2x16xf32>,
    %604 = vector.broadcast %546 : vector<2x1xf32> to vector<2x16xf32>
    %605 = arith.mulf %600, %604 : vector<2x16xf32>
    %c0_99 = arith.constant 0 : index
    %c16_100 = arith.constant 16 : index
    %606 = vector.load %arg13[%c0_99, %c16_100] : memref<16x32xf32, #tpu.memory_space<vmem>>, vector<2x16xf32>
    tpu.vector_store %arg13[%c0_99, %c16_100], %605 {strides = array<i32>} : memref<16x32xf32, #tpu.memory_space<vmem>>, vector<2x16xf32>,
    %c0_101 = arith.constant 0 : index
    %c0_102 = arith.constant 0 : index
    %607 = vector.load %arg13[%c0_101, %c0_102] : memref<16x32xf32, #tpu.memory_space<vmem>>, vector<16x32xf32>
    %608 = arith.truncf %607 : vector<16x32xf32> to vector<16x32xbf16>
    %c0_103 = arith.constant 0 : index
    %c0_104 = arith.constant 0 : index
    %609 = vector.load %arg7[%c0_103, %c0_104] : memref<32x5xbf16, #tpu.memory_space<vmem>>, vector<32x5xbf16>
    %cst_105 = arith.constant dense<0.000000e+00> : vector<16x5xf32>
    %610 = tpu.matmul %608, %609, %cst_105 {dimension_numbers = #tpu.dot_dimension_numbers<[1], [0], [0], [1], [0, 0, 1, 1], [], []>} : vector<16x32xbf16>, vector<32x5xbf16>, vector<16x5xf32> -> vector<16x5xf32>
    %c0_106 = arith.constant 0 : index
    %c0_107 = arith.constant 0 : index
    %611 = vector.load %arg8[%c0_106, %c0_107] : memref<1x5xf32, #tpu.memory_space<vmem>>, vector<1x5xf32>
    %612 = vector.broadcast %611 : vector<1x5xf32> to vector<16x5xf32>
    %613 = arith.addf %610, %612 : vector<16x5xf32>
    %c0_108 = arith.constant 0 : index
    %c0_109 = arith.constant 0 : index
    %614 = vector.load %arg9[%c0_108, %c0_109] : memref<1x5xf32, #tpu.memory_space<vmem>>, vector<1x5xf32>
    %c0_110 = arith.constant 0 : index
    %c0_111 = arith.constant 0 : index
    %615 = vector.load %arg10[%c0_110, %c0_111] : memref<1x5xf32, #tpu.memory_space<vmem>>, vector<1x5xf32>
    %c0_112 = arith.constant 0 : index
    %c0_113 = arith.constant 0 : index
    %616 = vector.load %arg11[%c0_112, %c0_113] : memref<5x5xf32, #tpu.memory_space<vmem>>, vector<5x5xf32>
    %617 = tpu.iota {dimensions = array<i32: 1>} : vector<16x5xi32>
    %c0_114 = arith.constant 0 : index
    %c0_115 = arith.constant 0 : index
    %618 = vector.load %arg2[%c0_114, %c0_115] : memref<16x1xi32, #tpu.memory_space<vmem>>, vector<16x1xi32>
    %619 = vector.broadcast %618 : vector<16x1xi32> to vector<16x5xi32>
    %620 = arith.cmpi eq, %617, %619 : vector<16x5xi32>
    %621 = arith.extui %620 : vector<16x5xi1> to vector<16x5xi32>
    %622 = arith.sitofp %621 : vector<16x5xi32> to vector<16x5xf32>
    %623 = arith.mulf %622, %613 : vector<16x5xf32>
    %cst_116 = arith.constant dense<0.000000e+00> : vector<16xf32>
    %624 = vector.multi_reduction <add>, %623, %cst_116 [1] : vector<16x5xf32> to vector<16xf32>
    %625 = vector.shape_cast %624 : vector<16xf32> to vector<16x1xf32>
    %626 = vector.extract_strided_slice %622 {offsets = [0, 0], sizes = [14, 5], strides = [1, 1]} : vector<16x5xf32> to vector<14x5xf32>
    %627 = vector.extract_strided_slice %622 {offsets = [2, 0], sizes = [14, 5], strides = [1, 1]} : vector<16x5xf32> to vector<14x5xf32>
    %cst_117 = arith.constant dense<0.000000e+00> : vector<14x5xf32>
    %628 = tpu.matmul %627, %616, %cst_117 {dimension_numbers = #tpu.dot_dimension_numbers<[1], [0], [0], [1], [0, 0, 1, 1], [], []>, precision = #tpu.contract_precision<fp32>} : vector<14x5xf32>, vector<5x5xf32>, vector<14x5xf32> -> vector<14x5xf32>
    %629 = arith.mulf %628, %626 : vector<14x5xf32>
    %cst_118 = arith.constant dense<0.000000e+00> : vector<14xf32>
    %630 = vector.multi_reduction <add>, %629, %cst_118 [1] : vector<14x5xf32> to vector<14xf32>
    %631 = vector.shape_cast %630 : vector<14xf32> to vector<14x1xf32>
    %632 = vector.extract_strided_slice %0 {offsets = [2, 0], sizes = [14, 1], strides = [1, 1]} : vector<16x1xf32> to vector<14x1xf32>
    %633 = vector.extract_strided_slice %625 {offsets = [2, 0], sizes = [14, 1], strides = [1, 1]} : vector<16x1xf32> to vector<14x1xf32>
    %634 = arith.addf %631, %633 : vector<14x1xf32>
    %635 = arith.mulf %632, %634 : vector<14x1xf32>
    %636 = vector.extract_strided_slice %622 {offsets = [0, 0], sizes = [2, 5], strides = [1, 1]} : vector<16x5xf32> to vector<2x5xf32>
    %637 = vector.broadcast %614 : vector<1x5xf32> to vector<2x5xf32>
    %638 = arith.mulf %636, %637 : vector<2x5xf32>
    %cst_119 = arith.constant dense<0.000000e+00> : vector<2xf32>
    %639 = vector.multi_reduction <add>, %638, %cst_119 [1] : vector<2x5xf32> to vector<2xf32>
    %640 = vector.shape_cast %639 : vector<2xf32> to vector<2x1xf32>
    %641 = vector.extract_strided_slice %625 {offsets = [0, 0], sizes = [2, 1], strides = [1, 1]} : vector<16x1xf32> to vector<2x1xf32>
    %642 = arith.addf %640, %641 : vector<2x1xf32>
    %643 = vector.extract_strided_slice %635 {offsets = [0, 0], sizes = [2, 1], strides = [1, 1]} : vector<14x1xf32> to vector<2x1xf32>
    %644 = arith.addf %642, %643 : vector<2x1xf32>
    %645 = vector.extract_strided_slice %635 {offsets = [2, 0], sizes = [2, 1], strides = [1, 1]} : vector<14x1xf32> to vector<2x1xf32>
    %646 = arith.addf %644, %645 : vector<2x1xf32>
    %647 = vector.extract_strided_slice %635 {offsets = [4, 0], sizes = [2, 1], strides = [1, 1]} : vector<14x1xf32> to vector<2x1xf32>
    %648 = arith.addf %646, %647 : vector<2x1xf32>
    %649 = vector.extract_strided_slice %635 {offsets = [6, 0], sizes = [2, 1], strides = [1, 1]} : vector<14x1xf32> to vector<2x1xf32>
    %650 = arith.addf %648, %649 : vector<2x1xf32>
    %651 = vector.extract_strided_slice %635 {offsets = [8, 0], sizes = [2, 1], strides = [1, 1]} : vector<14x1xf32> to vector<2x1xf32>
    %652 = arith.addf %650, %651 : vector<2x1xf32>
    %653 = vector.extract_strided_slice %635 {offsets = [10, 0], sizes = [2, 1], strides = [1, 1]} : vector<14x1xf32> to vector<2x1xf32>
    %654 = arith.addf %652, %653 : vector<2x1xf32>
    %655 = vector.extract_strided_slice %635 {offsets = [12, 0], sizes = [2, 1], strides = [1, 1]} : vector<14x1xf32> to vector<2x1xf32>
    %656 = arith.addf %654, %655 : vector<2x1xf32>
    %cst_120 = arith.constant 0.000000e+00 : f32
    %657 = vector.broadcast %cst_120 : f32 to vector<2x5xf32>
    %658 = vector.extract_strided_slice %0 {offsets = [0, 0], sizes = [2, 1], strides = [1, 1]} : vector<16x1xf32> to vector<2x1xf32>
    %659 = vector.extract_strided_slice %0 {offsets = [2, 0], sizes = [2, 1], strides = [1, 1]} : vector<16x1xf32> to vector<2x1xf32>
    %cst_121 = arith.constant 1.000000e+00 : f32
    %660 = vector.broadcast %cst_121 : f32 to vector<2x1xf32>
    %661 = arith.subf %660, %659 : vector<2x1xf32>
    %662 = arith.mulf %658, %661 : vector<2x1xf32>
    %663 = vector.extract_strided_slice %622 {offsets = [0, 0], sizes = [2, 5], strides = [1, 1]} : vector<16x5xf32> to vector<2x5xf32>
    %664 = vector.broadcast %662 : vector<2x1xf32> to vector<2x5xf32>
    %665 = arith.mulf %664, %663 : vector<2x5xf32>
    %666 = arith.addf %657, %665 : vector<2x5xf32>
    %667 = vector.extract_strided_slice %0 {offsets = [2, 0], sizes = [2, 1], strides = [1, 1]} : vector<16x1xf32> to vector<2x1xf32>
    %668 = vector.extract_strided_slice %0 {offsets = [4, 0], sizes = [2, 1], strides = [1, 1]} : vector<16x1xf32> to vector<2x1xf32>
    %cst_122 = arith.constant 1.000000e+00 : f32
    %669 = vector.broadcast %cst_122 : f32 to vector<2x1xf32>
    %670 = arith.subf %669, %668 : vector<2x1xf32>
    %671 = arith.mulf %667, %670 : vector<2x1xf32>
    %672 = vector.extract_strided_slice %622 {offsets = [2, 0], sizes = [2, 5], strides = [1, 1]} : vector<16x5xf32> to vector<2x5xf32>
    %673 = vector.broadcast %671 : vector<2x1xf32> to vector<2x5xf32>
    %674 = arith.mulf %673, %672 : vector<2x5xf32>
    %675 = arith.addf %666, %674 : vector<2x5xf32>
    %676 = vector.extract_strided_slice %0 {offsets = [4, 0], sizes = [2, 1], strides = [1, 1]} : vector<16x1xf32> to vector<2x1xf32>
    %677 = vector.extract_strided_slice %0 {offsets = [6, 0], sizes = [2, 1], strides = [1, 1]} : vector<16x1xf32> to vector<2x1xf32>
    %cst_123 = arith.constant 1.000000e+00 : f32
    %678 = vector.broadcast %cst_123 : f32 to vector<2x1xf32>
    %679 = arith.subf %678, %677 : vector<2x1xf32>
    %680 = arith.mulf %676, %679 : vector<2x1xf32>
    %681 = vector.extract_strided_slice %622 {offsets = [4, 0], sizes = [2, 5], strides = [1, 1]} : vector<16x5xf32> to vector<2x5xf32>
    %682 = vector.broadcast %680 : vector<2x1xf32> to vector<2x5xf32>
    %683 = arith.mulf %682, %681 : vector<2x5xf32>
    %684 = arith.addf %675, %683 : vector<2x5xf32>
    %685 = vector.extract_strided_slice %0 {offsets = [6, 0], sizes = [2, 1], strides = [1, 1]} : vector<16x1xf32> to vector<2x1xf32>
    %686 = vector.extract_strided_slice %0 {offsets = [8, 0], sizes = [2, 1], strides = [1, 1]} : vector<16x1xf32> to vector<2x1xf32>
    %cst_124 = arith.constant 1.000000e+00 : f32
    %687 = vector.broadcast %cst_124 : f32 to vector<2x1xf32>
    %688 = arith.subf %687, %686 : vector<2x1xf32>
    %689 = arith.mulf %685, %688 : vector<2x1xf32>
    %690 = vector.extract_strided_slice %622 {offsets = [6, 0], sizes = [2, 5], strides = [1, 1]} : vector<16x5xf32> to vector<2x5xf32>
    %691 = vector.broadcast %689 : vector<2x1xf32> to vector<2x5xf32>
    %692 = arith.mulf %691, %690 : vector<2x5xf32>
    %693 = arith.addf %684, %692 : vector<2x5xf32>
    %694 = vector.extract_strided_slice %0 {offsets = [8, 0], sizes = [2, 1], strides = [1, 1]} : vector<16x1xf32> to vector<2x1xf32>
    %695 = vector.extract_strided_slice %0 {offsets = [10, 0], sizes = [2, 1], strides = [1, 1]} : vector<16x1xf32> to vector<2x1xf32>
    %cst_125 = arith.constant 1.000000e+00 : f32
    %696 = vector.broadcast %cst_125 : f32 to vector<2x1xf32>
    %697 = arith.subf %696, %695 : vector<2x1xf32>
    %698 = arith.mulf %694, %697 : vector<2x1xf32>
    %699 = vector.extract_strided_slice %622 {offsets = [8, 0], sizes = [2, 5], strides = [1, 1]} : vector<16x5xf32> to vector<2x5xf32>
    %700 = vector.broadcast %698 : vector<2x1xf32> to vector<2x5xf32>
    %701 = arith.mulf %700, %699 : vector<2x5xf32>
    %702 = arith.addf %693, %701 : vector<2x5xf32>
    %703 = vector.extract_strided_slice %0 {offsets = [10, 0], sizes = [2, 1], strides = [1, 1]} : vector<16x1xf32> to vector<2x1xf32>
    %704 = vector.extract_strided_slice %0 {offsets = [12, 0], sizes = [2, 1], strides = [1, 1]} : vector<16x1xf32> to vector<2x1xf32>
    %cst_126 = arith.constant 1.000000e+00 : f32
    %705 = vector.broadcast %cst_126 : f32 to vector<2x1xf32>
    %706 = arith.subf %705, %704 : vector<2x1xf32>
    %707 = arith.mulf %703, %706 : vector<2x1xf32>
    %708 = vector.extract_strided_slice %622 {offsets = [10, 0], sizes = [2, 5], strides = [1, 1]} : vector<16x5xf32> to vector<2x5xf32>
    %709 = vector.broadcast %707 : vector<2x1xf32> to vector<2x5xf32>
    %710 = arith.mulf %709, %708 : vector<2x5xf32>
    %711 = arith.addf %702, %710 : vector<2x5xf32>
    %712 = vector.extract_strided_slice %0 {offsets = [12, 0], sizes = [2, 1], strides = [1, 1]} : vector<16x1xf32> to vector<2x1xf32>
    %713 = vector.extract_strided_slice %0 {offsets = [14, 0], sizes = [2, 1], strides = [1, 1]} : vector<16x1xf32> to vector<2x1xf32>
    %cst_127 = arith.constant 1.000000e+00 : f32
    %714 = vector.broadcast %cst_127 : f32 to vector<2x1xf32>
    %715 = arith.subf %714, %713 : vector<2x1xf32>
    %716 = arith.mulf %712, %715 : vector<2x1xf32>
    %717 = vector.extract_strided_slice %622 {offsets = [12, 0], sizes = [2, 5], strides = [1, 1]} : vector<16x5xf32> to vector<2x5xf32>
    %718 = vector.broadcast %716 : vector<2x1xf32> to vector<2x5xf32>
    %719 = arith.mulf %718, %717 : vector<2x5xf32>
    %720 = arith.addf %711, %719 : vector<2x5xf32>
    %721 = vector.extract_strided_slice %0 {offsets = [14, 0], sizes = [2, 1], strides = [1, 1]} : vector<16x1xf32> to vector<2x1xf32>
    %722 = vector.extract_strided_slice %622 {offsets = [14, 0], sizes = [2, 5], strides = [1, 1]} : vector<16x5xf32> to vector<2x5xf32>
    %723 = vector.broadcast %721 : vector<2x1xf32> to vector<2x5xf32>
    %724 = arith.mulf %723, %722 : vector<2x5xf32>
    %725 = arith.addf %720, %724 : vector<2x5xf32>
    %726 = vector.broadcast %615 : vector<1x5xf32> to vector<2x5xf32>
    %727 = arith.mulf %725, %726 : vector<2x5xf32>
    %cst_128 = arith.constant dense<0.000000e+00> : vector<2xf32>
    %728 = vector.multi_reduction <add>, %727, %cst_128 [1] : vector<2x5xf32> to vector<2xf32>
    %729 = vector.shape_cast %728 : vector<2xf32> to vector<2x1xf32>
    %730 = arith.addf %656, %729 : vector<2x1xf32>
    %731 = vector.extract_strided_slice %613 {offsets = [0, 0], sizes = [2, 5], strides = [1, 1]} : vector<16x5xf32> to vector<2x5xf32>
    %732 = vector.broadcast %614 : vector<1x5xf32> to vector<2x5xf32>
    %733 = arith.addf %732, %731 : vector<2x5xf32>
    %734 = vector.extract_strided_slice %0 {offsets = [2, 0], sizes = [2, 1], strides = [1, 1]} : vector<16x1xf32> to vector<2x1xf32>
    %735 = vector.extract_strided_slice %613 {offsets = [2, 0], sizes = [2, 5], strides = [1, 1]} : vector<16x5xf32> to vector<2x5xf32>
    %736 = vector.shape_cast %733 : vector<2x5xf32> to vector<2x1x5xf32>
    %737 = vector.shape_cast %616 : vector<5x5xf32> to vector<1x5x5xf32>
    %738 = vector.broadcast %736 : vector<2x1x5xf32> to vector<2x5x5xf32>
    %739 = vector.broadcast %737 : vector<1x5x5xf32> to vector<2x5x5xf32>
    %740 = arith.addf %738, %739 : vector<2x5x5xf32>
    %cst_129 = arith.constant dense<0xFF800000> : vector<2x5xf32>
    %741 = vector.multi_reduction <maximumf>, %740, %cst_129 [2] : vector<2x5x5xf32> to vector<2x5xf32>
    %742 = vector.shape_cast %741 : vector<2x5xf32> to vector<2x5x1xf32>
    %743 = vector.broadcast %742 : vector<2x5x1xf32> to vector<2x5x5xf32>
    %744 = arith.subf %740, %743 : vector<2x5x5xf32>
    %745 = math.exp %744 : vector<2x5x5xf32>
    %cst_130 = arith.constant dense<0.000000e+00> : vector<2x5xf32>
    %746 = vector.multi_reduction <add>, %745, %cst_130 [2] : vector<2x5x5xf32> to vector<2x5xf32>
    %747 = math.log %746 : vector<2x5xf32>
    %748 = arith.addf %741, %747 : vector<2x5xf32>
    %cst_131 = arith.constant 0.000000e+00 : f32
    %749 = vector.broadcast %cst_131 : f32 to vector<2x1xf32>
    %750 = arith.cmpf ogt, %734, %749 : vector<2x1xf32>
    %751 = arith.addf %748, %735 : vector<2x5xf32>
    %752 = vector.shape_cast %750 : vector<2x1xi1> to vector<2x1xi1>
    %753 = vector.broadcast %752 : vector<2x1xi1> to vector<2x5xi1>
    %754 = arith.select %753, %751, %733 : vector<2x5xi1>, vector<2x5xf32>
    %755 = vector.extract_strided_slice %0 {offsets = [4, 0], sizes = [2, 1], strides = [1, 1]} : vector<16x1xf32> to vector<2x1xf32>
    %756 = vector.extract_strided_slice %613 {offsets = [4, 0], sizes = [2, 5], strides = [1, 1]} : vector<16x5xf32> to vector<2x5xf32>
    %757 = vector.shape_cast %754 : vector<2x5xf32> to vector<2x1x5xf32>
    %758 = vector.shape_cast %616 : vector<5x5xf32> to vector<1x5x5xf32>
    %759 = vector.broadcast %757 : vector<2x1x5xf32> to vector<2x5x5xf32>
    %760 = vector.broadcast %758 : vector<1x5x5xf32> to vector<2x5x5xf32>
    %761 = arith.addf %759, %760 : vector<2x5x5xf32>
    %cst_132 = arith.constant dense<0xFF800000> : vector<2x5xf32>
    %762 = vector.multi_reduction <maximumf>, %761, %cst_132 [2] : vector<2x5x5xf32> to vector<2x5xf32>
    %763 = vector.shape_cast %762 : vector<2x5xf32> to vector<2x5x1xf32>
    %764 = vector.broadcast %763 : vector<2x5x1xf32> to vector<2x5x5xf32>
    %765 = arith.subf %761, %764 : vector<2x5x5xf32>
    %766 = math.exp %765 : vector<2x5x5xf32>
    %cst_133 = arith.constant dense<0.000000e+00> : vector<2x5xf32>
    %767 = vector.multi_reduction <add>, %766, %cst_133 [2] : vector<2x5x5xf32> to vector<2x5xf32>
    %768 = math.log %767 : vector<2x5xf32>
    %769 = arith.addf %762, %768 : vector<2x5xf32>
    %cst_134 = arith.constant 0.000000e+00 : f32
    %770 = vector.broadcast %cst_134 : f32 to vector<2x1xf32>
    %771 = arith.cmpf ogt, %755, %770 : vector<2x1xf32>
    %772 = arith.addf %769, %756 : vector<2x5xf32>
    %773 = vector.shape_cast %771 : vector<2x1xi1> to vector<2x1xi1>
    %774 = vector.broadcast %773 : vector<2x1xi1> to vector<2x5xi1>
    %775 = arith.select %774, %772, %754 : vector<2x5xi1>, vector<2x5xf32>
    %776 = vector.extract_strided_slice %0 {offsets = [6, 0], sizes = [2, 1], strides = [1, 1]} : vector<16x1xf32> to vector<2x1xf32>
    %777 = vector.extract_strided_slice %613 {offsets = [6, 0], sizes = [2, 5], strides = [1, 1]} : vector<16x5xf32> to vector<2x5xf32>
    %778 = vector.shape_cast %775 : vector<2x5xf32> to vector<2x1x5xf32>
    %779 = vector.shape_cast %616 : vector<5x5xf32> to vector<1x5x5xf32>
    %780 = vector.broadcast %778 : vector<2x1x5xf32> to vector<2x5x5xf32>
    %781 = vector.broadcast %779 : vector<1x5x5xf32> to vector<2x5x5xf32>
    %782 = arith.addf %780, %781 : vector<2x5x5xf32>
    %cst_135 = arith.constant dense<0xFF800000> : vector<2x5xf32>
    %783 = vector.multi_reduction <maximumf>, %782, %cst_135 [2] : vector<2x5x5xf32> to vector<2x5xf32>
    %784 = vector.shape_cast %783 : vector<2x5xf32> to vector<2x5x1xf32>
    %785 = vector.broadcast %784 : vector<2x5x1xf32> to vector<2x5x5xf32>
    %786 = arith.subf %782, %785 : vector<2x5x5xf32>
    %787 = math.exp %786 : vector<2x5x5xf32>
    %cst_136 = arith.constant dense<0.000000e+00> : vector<2x5xf32>
    %788 = vector.multi_reduction <add>, %787, %cst_136 [2] : vector<2x5x5xf32> to vector<2x5xf32>
    %789 = math.log %788 : vector<2x5xf32>
    %790 = arith.addf %783, %789 : vector<2x5xf32>
    %cst_137 = arith.constant 0.000000e+00 : f32
    %791 = vector.broadcast %cst_137 : f32 to vector<2x1xf32>
    %792 = arith.cmpf ogt, %776, %791 : vector<2x1xf32>
    %793 = arith.addf %790, %777 : vector<2x5xf32>
    %794 = vector.shape_cast %792 : vector<2x1xi1> to vector<2x1xi1>
    %795 = vector.broadcast %794 : vector<2x1xi1> to vector<2x5xi1>
    %796 = arith.select %795, %793, %775 : vector<2x5xi1>, vector<2x5xf32>
    %797 = vector.extract_strided_slice %0 {offsets = [8, 0], sizes = [2, 1], strides = [1, 1]} : vector<16x1xf32> to vector<2x1xf32>
    %798 = vector.extract_strided_slice %613 {offsets = [8, 0], sizes = [2, 5], strides = [1, 1]} : vector<16x5xf32> to vector<2x5xf32>
    %799 = vector.shape_cast %796 : vector<2x5xf32> to vector<2x1x5xf32>
    %800 = vector.shape_cast %616 : vector<5x5xf32> to vector<1x5x5xf32>
    %801 = vector.broadcast %799 : vector<2x1x5xf32> to vector<2x5x5xf32>
    %802 = vector.broadcast %800 : vector<1x5x5xf32> to vector<2x5x5xf32>
    %803 = arith.addf %801, %802 : vector<2x5x5xf32>
    %cst_138 = arith.constant dense<0xFF800000> : vector<2x5xf32>
    %804 = vector.multi_reduction <maximumf>, %803, %cst_138 [2] : vector<2x5x5xf32> to vector<2x5xf32>
    %805 = vector.shape_cast %804 : vector<2x5xf32> to vector<2x5x1xf32>
    %806 = vector.broadcast %805 : vector<2x5x1xf32> to vector<2x5x5xf32>
    %807 = arith.subf %803, %806 : vector<2x5x5xf32>
    %808 = math.exp %807 : vector<2x5x5xf32>
    %cst_139 = arith.constant dense<0.000000e+00> : vector<2x5xf32>
    %809 = vector.multi_reduction <add>, %808, %cst_139 [2] : vector<2x5x5xf32> to vector<2x5xf32>
    %810 = math.log %809 : vector<2x5xf32>
    %811 = arith.addf %804, %810 : vector<2x5xf32>
    %cst_140 = arith.constant 0.000000e+00 : f32
    %812 = vector.broadcast %cst_140 : f32 to vector<2x1xf32>
    %813 = arith.cmpf ogt, %797, %812 : vector<2x1xf32>
    %814 = arith.addf %811, %798 : vector<2x5xf32>
    %815 = vector.shape_cast %813 : vector<2x1xi1> to vector<2x1xi1>
    %816 = vector.broadcast %815 : vector<2x1xi1> to vector<2x5xi1>
    %817 = arith.select %816, %814, %796 : vector<2x5xi1>, vector<2x5xf32>
    %818 = vector.extract_strided_slice %0 {offsets = [10, 0], sizes = [2, 1], strides = [1, 1]} : vector<16x1xf32> to vector<2x1xf32>
    %819 = vector.extract_strided_slice %613 {offsets = [10, 0], sizes = [2, 5], strides = [1, 1]} : vector<16x5xf32> to vector<2x5xf32>
    %820 = vector.shape_cast %817 : vector<2x5xf32> to vector<2x1x5xf32>
    %821 = vector.shape_cast %616 : vector<5x5xf32> to vector<1x5x5xf32>
    %822 = vector.broadcast %820 : vector<2x1x5xf32> to vector<2x5x5xf32>
    %823 = vector.broadcast %821 : vector<1x5x5xf32> to vector<2x5x5xf32>
    %824 = arith.addf %822, %823 : vector<2x5x5xf32>
    %cst_141 = arith.constant dense<0xFF800000> : vector<2x5xf32>
    %825 = vector.multi_reduction <maximumf>, %824, %cst_141 [2] : vector<2x5x5xf32> to vector<2x5xf32>
    %826 = vector.shape_cast %825 : vector<2x5xf32> to vector<2x5x1xf32>
    %827 = vector.broadcast %826 : vector<2x5x1xf32> to vector<2x5x5xf32>
    %828 = arith.subf %824, %827 : vector<2x5x5xf32>
    %829 = math.exp %828 : vector<2x5x5xf32>
    %cst_142 = arith.constant dense<0.000000e+00> : vector<2x5xf32>
    %830 = vector.multi_reduction <add>, %829, %cst_142 [2] : vector<2x5x5xf32> to vector<2x5xf32>
    %831 = math.log %830 : vector<2x5xf32>
    %832 = arith.addf %825, %831 : vector<2x5xf32>
    %cst_143 = arith.constant 0.000000e+00 : f32
    %833 = vector.broadcast %cst_143 : f32 to vector<2x1xf32>
    %834 = arith.cmpf ogt, %818, %833 : vector<2x1xf32>
    %835 = arith.addf %832, %819 : vector<2x5xf32>
    %836 = vector.shape_cast %834 : vector<2x1xi1> to vector<2x1xi1>
    %837 = vector.broadcast %836 : vector<2x1xi1> to vector<2x5xi1>
    %838 = arith.select %837, %835, %817 : vector<2x5xi1>, vector<2x5xf32>
    %839 = vector.extract_strided_slice %0 {offsets = [12, 0], sizes = [2, 1], strides = [1, 1]} : vector<16x1xf32> to vector<2x1xf32>
    %840 = vector.extract_strided_slice %613 {offsets = [12, 0], sizes = [2, 5], strides = [1, 1]} : vector<16x5xf32> to vector<2x5xf32>
    %841 = vector.shape_cast %838 : vector<2x5xf32> to vector<2x1x5xf32>
    %842 = vector.shape_cast %616 : vector<5x5xf32> to vector<1x5x5xf32>
    %843 = vector.broadcast %841 : vector<2x1x5xf32> to vector<2x5x5xf32>
    %844 = vector.broadcast %842 : vector<1x5x5xf32> to vector<2x5x5xf32>
    %845 = arith.addf %843, %844 : vector<2x5x5xf32>
    %cst_144 = arith.constant dense<0xFF800000> : vector<2x5xf32>
    %846 = vector.multi_reduction <maximumf>, %845, %cst_144 [2] : vector<2x5x5xf32> to vector<2x5xf32>
    %847 = vector.shape_cast %846 : vector<2x5xf32> to vector<2x5x1xf32>
    %848 = vector.broadcast %847 : vector<2x5x1xf32> to vector<2x5x5xf32>
    %849 = arith.subf %845, %848 : vector<2x5x5xf32>
    %850 = math.exp %849 : vector<2x5x5xf32>
    %cst_145 = arith.constant dense<0.000000e+00> : vector<2x5xf32>
    %851 = vector.multi_reduction <add>, %850, %cst_145 [2] : vector<2x5x5xf32> to vector<2x5xf32>
    %852 = math.log %851 : vector<2x5xf32>
    %853 = arith.addf %846, %852 : vector<2x5xf32>
    %cst_146 = arith.constant 0.000000e+00 : f32
    %854 = vector.broadcast %cst_146 : f32 to vector<2x1xf32>
    %855 = arith.cmpf ogt, %839, %854 : vector<2x1xf32>
    %856 = arith.addf %853, %840 : vector<2x5xf32>
    %857 = vector.shape_cast %855 : vector<2x1xi1> to vector<2x1xi1>
    %858 = vector.broadcast %857 : vector<2x1xi1> to vector<2x5xi1>
    %859 = arith.select %858, %856, %838 : vector<2x5xi1>, vector<2x5xf32>
    %860 = vector.extract_strided_slice %0 {offsets = [14, 0], sizes = [2, 1], strides = [1, 1]} : vector<16x1xf32> to vector<2x1xf32>
    %861 = vector.extract_strided_slice %613 {offsets = [14, 0], sizes = [2, 5], strides = [1, 1]} : vector<16x5xf32> to vector<2x5xf32>
    %862 = vector.shape_cast %859 : vector<2x5xf32> to vector<2x1x5xf32>
    %863 = vector.shape_cast %616 : vector<5x5xf32> to vector<1x5x5xf32>
    %864 = vector.broadcast %862 : vector<2x1x5xf32> to vector<2x5x5xf32>
    %865 = vector.broadcast %863 : vector<1x5x5xf32> to vector<2x5x5xf32>
    %866 = arith.addf %864, %865 : vector<2x5x5xf32>
    %cst_147 = arith.constant dense<0xFF800000> : vector<2x5xf32>
    %867 = vector.multi_reduction <maximumf>, %866, %cst_147 [2] : vector<2x5x5xf32> to vector<2x5xf32>
    %868 = vector.shape_cast %867 : vector<2x5xf32> to vector<2x5x1xf32>
    %869 = vector.broadcast %868 : vector<2x5x1xf32> to vector<2x5x5xf32>
    %870 = arith.subf %866, %869 : vector<2x5x5xf32>
    %871 = math.exp %870 : vector<2x5x5xf32>
    %cst_148 = arith.constant dense<0.000000e+00> : vector<2x5xf32>
    %872 = vector.multi_reduction <add>, %871, %cst_148 [2] : vector<2x5x5xf32> to vector<2x5xf32>
    %873 = math.log %872 : vector<2x5xf32>
    %874 = arith.addf %867, %873 : vector<2x5xf32>
    %cst_149 = arith.constant 0.000000e+00 : f32
    %875 = vector.broadcast %cst_149 : f32 to vector<2x1xf32>
    %876 = arith.cmpf ogt, %860, %875 : vector<2x1xf32>
    %877 = arith.addf %874, %861 : vector<2x5xf32>
    %878 = vector.shape_cast %876 : vector<2x1xi1> to vector<2x1xi1>
    %879 = vector.broadcast %878 : vector<2x1xi1> to vector<2x5xi1>
    %880 = arith.select %879, %877, %859 : vector<2x5xi1>, vector<2x5xf32>
    %881 = vector.broadcast %615 : vector<1x5xf32> to vector<2x5xf32>
    %882 = arith.addf %880, %881 : vector<2x5xf32>
    %cst_150 = arith.constant dense<0xFF800000> : vector<2xf32>
    %883 = vector.multi_reduction <maximumf>, %882, %cst_150 [1] : vector<2x5xf32> to vector<2xf32>
    %884 = vector.shape_cast %883 : vector<2xf32> to vector<2x1xf32>
    %885 = vector.broadcast %884 : vector<2x1xf32> to vector<2x5xf32>
    %886 = arith.subf %882, %885 : vector<2x5xf32>
    %887 = math.exp %886 : vector<2x5xf32>
    %cst_151 = arith.constant dense<0.000000e+00> : vector<2xf32>
    %888 = vector.multi_reduction <add>, %887, %cst_151 [1] : vector<2x5xf32> to vector<2xf32>
    %889 = vector.shape_cast %888 : vector<2xf32> to vector<2x1xf32>
    %890 = math.log %889 : vector<2x1xf32>
    %891 = arith.addf %884, %890 : vector<2x1xf32>
    %892 = arith.subf %730, %891 : vector<2x1xf32>
    %c0_152 = arith.constant 0 : index
    %c0_153 = arith.constant 0 : index
    %893 = vector.load %arg12[%c0_152, %c0_153] : memref<2x1xf32, #tpu.memory_space<vmem>>, vector<2x1xf32>
    tpu.vector_store %arg12[%c0_152, %c0_153], %892 {strides = array<i32>} : memref<2x1xf32, #tpu.memory_space<vmem>>, vector<2x1xf32>,
    return
  }
}

</mosaic_0001>

<bundles_post_ra>
// kernel: tpu_custom_call.1
= control target key start
LH: loop header
LB: loop body
LE: loop exit
PB: predicated region body
PF: predicated region fallthrough
CT: control target
= control target key end

     0   :  { %v3714_v0 = vmov 0.0   ;;  %vm3715_vm0 = vmmov 0   ;;  %vm70_vm1 = vcmask 130048   ;;  %v3716_v4 = vmov 0   ;;  %s3718_s14 = smov 80   ;;  %s3720_s17 = smov 32   ;;  %s4641_s3 = inlined_call_operand.vmem [shape: bf16[16,128], index: 3, kind: input, shape index: {}]   ;;  %s4642_s0 = inlined_call_operand.vmem [shape: bf16[16,16], index: 0, kind: input, shape index: {}]   ;;  %s4643_s4 = inlined_call_operand.vmem [shape: bf16[16,64], index: 4, kind: input, shape index: {}]   ;;  %s4644_s5 = inlined_call_operand.vmem [shape: bf16[16,64], index: 5, kind: input, shape index: {}]   ;;  %s4645_s6 = inlined_call_operand.vmem [shape: f32[1,128], index: 6, kind: input, shape index: {}]   ;;  %s4646_s1 = inlined_call_operand.vmem [shape: f32[16,1], index: 1, kind: input, shape index: {}]   ;;  %s4647_s7 = inlined_call_operand.vmem [shape: bf16[32,5], index: 7, kind: input, shape index: {}]   ;;  %s4648_s8 = inlined_call_operand.vmem [shape: f32[1,5], index: 8, kind: input, shape index: {}]   ;;  %s4649_s9 = inlined_call_operand.vmem [shape: f32[1,5], index: 9, kind: input, shape index: {}]   ;;  %s4650_s11 = inlined_call_operand.vmem [shape: f32[5,5], index: 11, kind: input, shape index: {}]   ;;  %s4651_s2 = inlined_call_operand.vmem [shape: s32[16,1], index: 2, kind: input, shape index: {}]   ;;  %s4652_s10 = inlined_call_operand.vmem [shape: f32[1,5], index: 10, kind: input, shape index: {}]   ;;  %s4653_s12 = inlined_call_operand.vmem [shape: f32[2,1], index: 12, kind: output, shape index: {}]  }
   0x1   :  { %3363 = vmatprep.subr.bf16.mxu0 %v3714_v0  ;;  %v3516_v1 = vld [vmem:[%s4641_s3] sm:$0xff]   ;;  %3365 = vmatprep.mubr.msk.bf16.mxu0 %vm3715_vm0, %v3714_v0  ;;  %v3845_v25 = vld [vmem:[%s4646_s1 + $0x8] sm:$0xff]  ;;  %s3721_s18 = smov 96   ;;  %s3722_s19 = smov 48   ;;  %vm302_vm2 = vcmask 123904   ;;  %vm519_vm3 = vcmask 125954  }
   0x2   :  { %3369 = vmatprep.subr.bf16.mxu1 %v3714_v0  ;;  %v3517_v2 = vld [vmem:[%s4642_s0] sm:$0xff]   ;;  %3371 = vmatprep.mubr.msk.bf16.mxu1 %vm3715_vm0, %v3714_v0  ;;  %s3717_s0 = smov 64   ;;  %v287_v27 = vsub.f32 1.0, %v3845_v25  ;;  %s3723_s20 = smov 112   ;;  %vm737_vm4 = vcmask 128004   ;;  %vm954_vm5 = vcmask 130054  }
   0x3   :  { %3364 = vmatpush3.bf16.msra.mxu0 %v3516_v1  ;;  %v3805_v3 = vld [vmem:[%s4643_s4] sm:$0xff]   ;;  %3515 = vset.pattern.permute.xlu0 %v3716_v4  ;;  %vm309_vm6 = vcmask 261254   ;;  %vm526_vm7 = vcmask 259204   ;;  %vm744_vm8 = vcmask 257154   ;;  %vm961_vm9 = vcmask 255104  }
   0x4   :  { %3375 = vmatprep.subr.bf16.mxu0 %v3714_v0  ;;  %v3812_v5 = vld [vmem:[%s4644_s5] sm:$0xff]   ;;  %3514 = vset.pattern.permute.xlu1 %v3716_v4  ;;  %vm1827_vm10 = vcmask 261120   ;;  %vm2561_vm11 = vcmask 36864   ;;  %vm2627_vm13 = vcmask 1043459   ;;  %vm2728_vm15 = vcmask 1045509  }
   0x5   :  { %3370 = vmatpush3.bf16.msra.mxu1 %v3805_v3  ;;  %v3264_v19 = vld [vmem:[%s4645_s6] ss:$0 sm:$0xff]  ;;  %s3719_s6 = smov 16  }
   0x6   :  { %3366 = vmatmul.mubr.msk.bf16.vlgmr.msra.gmra.mxu0 %vm70_vm1, %v3517_v2  ;;  %3381 = vmatprep.subr.bf16.mxu1 %v3714_v0  ;;  %v3860_v42 = vld [vmem:[%s4646_s1] sm:$0xff] }
   0x7   :  { %3376 = vmatpush3.bf16.msra.mxu0 %v3812_v5  ;;  %3377 = vmatprep.mubr.msk.bf16.mxu0 %vm3715_vm0, %v3714_v0 }
   0x8   :  { %3372 = vmatmul.mubr.bf16.vlgmr.msra.gmra.mxu1 %v3716_v4  ;;  %3387 = vmatprep.subr.bf16.mxu0 %v3714_v0 }
   0x9   :  { %3382 = vmatpush3.bf16.msra.mxu1 %v3805_v3  ;;  %3383 = vmatprep.mubr.msk.bf16.mxu1 %vm3715_vm0, %v3714_v0 }
   0xa   :  { %3393 = vmatprep.subr.bf16.mxu1 %v3714_v0 }
   0xe   :  { %3378 = vmatmul.mubr.bf16.vlgmr.msra.gmra.mxu0 %v3716_v4 }
   0xf   :  { %3388 = vmatpush3.bf16.msra.mxu0 %v3812_v5  ;;  %3389 = vmatprep.mubr.msk.bf16.mxu0 %vm3715_vm0, %v3714_v0 }
  0x10   :  { %3399 = vmatprep.subr.bf16.mxu0 %v3714_v0 }
  0xc6   :  { %v108_v6 = vpop.f32.mrf.mxu0 }
  0xc7   :  { %v3839_v23 = vadd.f32 %v3264_v19, %v108_v6 }
  0xc8   :  { %v3367_v7 = vpop.f32.mrf.mxu0  ;;  %v158_v8 = vpop.f32.mrf.mxu1 }
  0xc9   :  { %v164_v24 = vadd.f32 %v158_v8, %v3839_v23  ;;  %v271_v8 = vsub.f32 1.0, %v3860_v42 }
  0xca   :  { %v111_v9 = vpop.f32.mrf.mxu0  ;;  %v3373_v10 = vpop.f32.mrf.mxu1 }
  0xcb   :  { %v3836_v20 = vadd.f32 %v3264_v19, %v111_v9  ;;  %v3270_v31 = vmul.f32 -1.442695, %v164_v24 }
  0xcc   :  { %v3368_v11 = vpop.f32.mrf.mxu0  ;;  %v161_v12 = vpop.f32.mrf.mxu1 }
  0xce   :  { %v205_v13 = vpop.f32.mrf.mxu0  ;;  %v3374_v14 = vpop.f32.mrf.mxu1 }
  0xcf   :  { %v212_v15 = vrot.slane %v205_v13, 2 }
  0xd0   :  { %v3379_v16 = vpop.f32.mrf.mxu0 }
  0xd1   :  { %213 = vrot.lane.b32.xlu0 %v212_v15, %s3717_s0 }
  0xd2   :  { %v208_v17 = vpop.f32.mrf.mxu0 }
  0xd4   :  { %v3380_v18 = vpop.f32.mrf.mxu0 }
 0x143   :  { %v214_v21 = vpop.permute.xlu0 %213 }
 0x144   :  { %v216_v22 = vadd.f32 %v214_v21, %v3836_v20 }
 0x146   :  { %3522 = vtanh.f32 %v216_v22  ;;  %v3271_v29 = vmul.f32 -1.442695, %v216_v22 }
 0x147   :  { %3524 = vtanh.f32 %v164_v24 }
 0x148   :  { %3526 = vpow2.f32 %v3271_v29 }
 0x149   :  { %3528 = vpow2.f32 %v3270_v31 }
 0x153   :  { %v3523_v26 = vpop.eup %3522 }
 0x154   :  { %250 = vrot.lane.b32.xlu0 %v3523_v26, %s3718_s14  ;;  %v3525_v28 = vpop.eup %3524 }
 0x155   :  { %v3527_v30 = vpop.eup %3526 }
 0x156   :  { %v244_v32 = vadd.f32 1.0, %v3527_v30  ;;  %v3529_v33 = vpop.eup %3528 }
 0x157   :  { %v220_v35 = vadd.f32 1.0, %v3529_v33 }
 0x158   :  { %290 = vperm.xlu0 %3515, %v287_v27   ;;  %3530 = vrcp.f32 %v244_v32 }
 0x159   :  { %3532 = vrcp.f32 %v220_v35 }
 0x15c   :  { %226 = vrot.lane.b32.xlu0 %v3525_v28, %s3718_s14 }
 0x165   :  { %v3531_v34 = vpop.eup %3530 }
 0x166   :  { %v3533_v39 = vpop.eup %3532  ;;  %v248_v43 = vmul.f32 0.0, %v3531_v34 }
 0x167   :  { %v224_v47 = vmul.f32 0.0, %v3533_v39 }
 0x1c6   :  { %v251_v36 = vpop.permute.xlu0 %250 }
 0x1c7   :  { %v253_v37 = vmul.f32 %v3531_v34, %v251_v36 }
 0x1c9   :  { %255 = vrot.lane.b32.xlu1 %v253_v37, %s3719_s6 }
 0x1cd   :  { %283 = vperm.xlu1 %3514, %v3845_v25  }
 0x1d3   :  { %v3854_v38 = vpop.permute.xlu0 %290 }
 0x1d4   :  { %v293_v54 = vmul.f32 0.0, %v3854_v38 }
 0x1d7   :  { %v227_v40 = vpop.permute.xlu0 %226 }
 0x1d8   :  { %v229_v41 = vmul.f32 %v3533_v39, %v227_v40 }
 0x1da   :  { %231 = vrot.lane.b32.xlu0 %v229_v41, %s3719_s6 }
 0x1de   :  { %267 = vperm.xlu0 %3515, %v3860_v42  }
 0x23b   :  { %v256_v44 = vpop.permute.xlu1 %255 }
 0x23c   :  { %v258_v45 = vadd.f32 %v256_v44, %v248_v43 }
 0x23e   :  { %3534 = vtanh.f32 %v258_v45 }
 0x248   :  { %v3865_v51 = vpop.permute.xlu1 %283 }
 0x249   :  { %v295_v30 = vmul.f32 %v3865_v51, %v258_v45 }
 0x24b   :  { %v3535_v46 = vpop.eup %3534  ;;  %v3903_v31 = vadd.f32 %v295_v30, %v293_v54 }
 0x24c   :  { %v232_v48 = vpop.permute.xlu0 %231  ;;  %261 = vrot.lane.b32.xlu1 %v3535_v46, %s3719_s6 }
 0x24d   :  { %v234_v49 = vadd.f32 %v232_v48, %v224_v47  ;;  %v451_v32 = vrot.slane %v3903_v31, 2 }
 0x24f   :  { %3536 = vtanh.f32 %v234_v49 }
 0x259   :  { %v3885_v15 = vpop.permute.xlu0 %267 }
 0x25a   :  { %v279_v24 = vmul.f32 %v3885_v15, %v234_v49 }
 0x25c   :  { %v3537_v50 = vpop.eup %3536 }
 0x25d   :  { %237 = vrot.lane.b32.xlu0 %v3537_v50, %s3719_s6 }
 0x2be   :  { %v262_v52 = vpop.permute.xlu1 %261 }
 0x2bf   :  { %v264_v53 = vmul.f32 %v3531_v34, %v262_v52 }
 0x2c1   :  { %v286_v55 = vmul.f32 %v3865_v51, %v264_v53 }
 0x2c3   :  { %v3869_v56 = vadd.f32 %v293_v54, %v286_v55 }
 0x2c5   :  { %v362_v57 = vpack.c.bf16 %v3869_v56, %v3869_v56  ;;  %v494_v16 = vrot.slane %v3869_v56, 2 }
 0x2c7   :  { %v364_v58 = vrot.slane %v362_v57, 3 }
 0x2c9   :  { %365 = vrot.lane.b32.xlu1 %v364_v58, %s3720_s17 }
 0x2cf   :  { %v238_v17 = vpop.permute.xlu0 %237 }
 0x2d0   :  { %v240_v18 = vmul.f32 %v3533_v39, %v238_v17 }
 0x2d2   :  { %v270_v21 = vmul.f32 %v3885_v15, %v240_v18 }
 0x33b   :  { %v366_v59 = vpop.permute.xlu1 %365 }
 0x33c   :  { %3390 = vmatmul.mubr.msk.bf16.vlgmr.msra.gmra.mxu0 %vm70_vm1, %v366_v59 }
 0x33d   :  { %3400 = vmatpush3.bf16.msra.mxu0 %v3812_v5  ;;  %3401 = vmatprep.mubr.msk.bf16.mxu0 %vm3715_vm0, %v3714_v0 }
 0x33e   :  { %3411 = vmatprep.subr.bf16.mxu0 %v3714_v0 }
 0x3fc   :  { %v404_v60 = vpop.f32.mrf.mxu0 }
 0x3fd   :  { %v411_v61 = vrot.slane %v404_v60, 4 }
 0x3fe   :  { %v3391_v62 = vpop.f32.mrf.mxu0 }
 0x3ff   :  { %412 = vrot.lane.b32.xlu1 %v411_v61, %s3717_s0 }
 0x400   :  { %v407_v63 = vpop.f32.mrf.mxu0 }
 0x402   :  { %v3392_v1 = vpop.f32.mrf.mxu0 }
 0x471   :  { %v413_v2 = vpop.permute.xlu1 %412 }
 0x472   :  { %v415_v6 = vadd.f32 %v413_v2, %v3836_v20 }
 0x474   :  { %3538 = vtanh.f32 %v415_v6  ;;  %v3275_v9 = vmul.f32 -1.442695, %v415_v6 }
 0x476   :  { %3540 = vpow2.f32 %v3275_v9 }
 0x481   :  { %v3539_v7 = vpop.eup %3538 }
 0x482   :  { %455 = vrot.lane.b32.xlu1 %v3539_v7, %s3718_s14 }
 0x483   :  { %v3541_v10 = vpop.eup %3540 }
 0x484   :  { %v446_v11 = vadd.f32 1.0, %v3541_v10 }
 0x486   :  { %274 = vperm.xlu1 %3514, %v271_v8   ;;  %3542 = vrcp.f32 %v446_v11 }
 0x493   :  { %v3543_v12 = vpop.eup %3542 }
 0x494   :  { %v453_v33 = vmul.f32 %v3543_v12, %v451_v32 }
 0x4f4   :  { %v456_v13 = vpop.permute.xlu1 %455 }
 0x4f5   :  { %v458_v14 = vmul.f32 %v3543_v12, %v456_v13 }
 0x4f7   :  { %460 = vrot.lane.b32.xlu1 %v458_v14, %s3719_s6 }
 0x4fb   :  { %495 = vrot.lane.b32.xlu1 %v494_v16, %s3720_s17 }
 0x501   :  { %v3890_v19 = vpop.permute.xlu1 %274 }
 0x502   :  { %v277_v22 = vmul.f32 0.0, %v3890_v19 }
 0x504   :  { %v3895_v26 = vadd.f32 %v277_v22, %v270_v21  ;;  %v3897_v28 = vadd.f32 %v279_v24, %v277_v22 }
 0x506   :  { %v311_v29 = vpack.c.bf16 %v3895_v26, %v3895_v26  ;;  %v472_v58 = vrot.slane %v3895_v26, 6  ;;  %v424_v14 = vrot.slane %v3897_v28, 6 }
 0x508   :  { %313 = vrot.lane.b32.xlu0 %v311_v29, %s3721_s18 }
 0x569   :  { %v461_v34 = vpop.permute.xlu1 %460 }
 0x56a   :  { %v3908_v35 = vadd.f32 %v461_v34, %v453_v33 }
 0x56c   :  { %3544 = vtanh.f32 %v3908_v35 }
 0x56d   :  { %v496_v36 = vpop.permute.xlu1 %495 }
 0x56e   :  { %v498_v37 = vmul.f32 %v496_v36, %v3854_v38 }
 0x570   :  { %500 = vrot.lane.b32.xlu1 %v498_v37, %s3721_s18 }
 0x579   :  { %v3545_v39 = vpop.eup %3544 }
 0x57a   :  { %v314_v40 = vpop.permute.xlu0 %313  ;;  %466 = vrot.lane.b32.xlu0 %v3545_v39, %s3719_s6 }
 0x57b   :  { %3384 = vmatmul.mubr.msk.bf16.vlgmr.msra.gmra.mxu1 %vm70_vm1, %v314_v40 }
 0x57c   :  { %3394 = vmatpush3.bf16.msra.mxu1 %v3805_v3  ;;  %3395 = vmatprep.mubr.msk.bf16.mxu1 %vm3715_vm0, %v3714_v0 }
 0x57d   :  { %3405 = vmatprep.subr.bf16.mxu1 %v3714_v0 }
 0x5e2   :  { %v501_v45 = vpop.permute.xlu1 %500 }
 0x5ec   :  { %v467_v41 = vpop.permute.xlu0 %466 }
 0x5ed   :  { %v469_v43 = vmul.f32 %v3543_v12, %v467_v41 }
 0x5ef   :  { %v492_v44 = vmul.f32 %v469_v43, %v3865_v51 }
 0x5f1   :  { %v3920_v46 = vadd.f32 %v501_v45, %v492_v44 }
 0x5f3   :  { %v580_v47 = vpack.c.bf16 %v3920_v46, %v3920_v46 }
 0x5f5   :  { %v582_v48 = vrot.slane %v580_v47, 2 }
 0x5f7   :  { %583 = vrot.lane.b32.xlu0 %v582_v48, %s3720_s17 }
 0x63b   :  { %v352_v49 = vpop.f32.mrf.mxu1 }
 0x63c   :  { %v359_v50 = vrot.slane %v352_v49, 6 }
 0x63d   :  { %v3385_v52 = vpop.f32.mrf.mxu1 }
 0x63e   :  { %v361_v53 = vadd.f32 %v359_v50, %v3839_v23 }
 0x63f   :  { %v355_v54 = vpop.f32.mrf.mxu1 }
 0x640   :  { %3546 = vtanh.f32 %v361_v53  ;;  %v3274_v60 = vmul.f32 -1.442695, %v361_v53  ;;  %v504_v54 = vmul.f32 %v3908_v35, %v3865_v51 }
 0x641   :  { %v3386_v55 = vpop.f32.mrf.mxu1 }
 0x642   :  { %3548 = vpow2.f32 %v3274_v60 }
 0x64d   :  { %v3547_v57 = vpop.eup %3546 }
 0x64e   :  { %428 = vrot.lane.b32.xlu1 %v3547_v57, %s3718_s14 }
 0x64f   :  { %v3549_v61 = vpop.eup %3548 }
 0x650   :  { %v419_v62 = vadd.f32 1.0, %v3549_v61 }
 0x652   :  { %473 = vrot.lane.b32.xlu1 %v472_v58, %s3721_s18  ;;  %3550 = vrcp.f32 %v419_v62 }
 0x65f   :  { %v3551_v63 = vpop.eup %3550 }
 0x660   :  { %v426_v16 = vmul.f32 %v3551_v63, %v424_v14 }
 0x669   :  { %v584_v59 = vpop.permute.xlu0 %583 }
 0x66a   :  { %3402 = vmatmul.mubr.msk.bf16.vlgmr.msra.gmra.mxu0 %vm70_vm1, %v584_v59 }
 0x66b   :  { %3412 = vmatpush3.bf16.msra.mxu0 %v3812_v5  ;;  %3413 = vmatprep.mubr.msk.bf16.mxu0 %vm3715_vm0, %v3714_v0 }
 0x66c   :  { %3423 = vmatprep.subr.bf16.mxu0 %v3714_v0 }
 0x6c0   :  { %v429_v1 = vpop.permute.xlu1 %428 }
 0x6c1   :  { %v431_v2 = vmul.f32 %v3551_v63, %v429_v1 }
 0x6c3   :  { %433 = vrot.lane.b32.xlu0 %v431_v2, %s3719_s6 }
 0x6c4   :  { %v474_v9 = vpop.permute.xlu1 %473 }
 0x6c5   :  { %v476_v12 = vmul.f32 %v474_v9, %v3890_v19 }
 0x72a   :  { %v622_v6 = vpop.f32.mrf.mxu0 }
 0x72b   :  { %v629_v7 = vrot.slane %v622_v6, 6 }
 0x72c   :  { %v3403_v10 = vpop.f32.mrf.mxu0 }
 0x72d   :  { %630 = vrot.lane.b32.xlu0 %v629_v7, %s3717_s0 }
 0x72e   :  { %v625_v11 = vpop.f32.mrf.mxu0 }
 0x730   :  { %v3404_v13 = vpop.f32.mrf.mxu0 }
 0x731   :  { %478 = vrot.lane.b32.xlu0 %v476_v12, %s3720_s17 }
 0x735   :  { %v434_v17 = vpop.permute.xlu0 %433 }
 0x736   :  { %v3939_v18 = vadd.f32 %v434_v17, %v426_v16 }
 0x738   :  { %3552 = vtanh.f32 %v3939_v18 }
 0x745   :  { %v3553_v21 = vpop.eup %3552 }
 0x746   :  { %439 = vrot.lane.b32.xlu1 %v3553_v21, %s3719_s6 }
 0x74a   :  { %505 = vrot.lane.b32.xlu1 %v451_v32, %s3722_s19  ;;  %v712_v32 = vrot.slane %v3920_v46, 2 }
 0x79f   :  { %v631_v22 = vpop.permute.xlu0 %630 }
 0x7a0   :  { %v633_v24 = vadd.f32 %v631_v22, %v3836_v20 }
 0x7a2   :  { %3554 = vtanh.f32 %v633_v24  ;;  %v3279_v41 = vmul.f32 -1.442695, %v633_v24 }
 0x7a3   :  { %v479_v34 = vpop.permute.xlu0 %478 }
 0x7a4   :  { %3556 = vpow2.f32 %v3279_v41 }
 0x7af   :  { %v3555_v29 = vpop.eup %3554 }
 0x7b0   :  { %673 = vrot.lane.b32.xlu0 %v3555_v29, %s3718_s14 }
 0x7b1   :  { %v3557_v43 = vpop.eup %3556 }
 0x7b2   :  { %v664_v44 = vadd.f32 1.0, %v3557_v43 }
 0x7b4   :  { %3558 = vrcp.f32 %v664_v44 }
 0x7b8   :  { %v440_v28 = vpop.permute.xlu1 %439 }
 0x7b9   :  { %v442_v30 = vmul.f32 %v3551_v63, %v440_v28 }
 0x7bb   :  { %v470_v33 = vmul.f32 %v442_v30, %v3885_v15 }
 0x7bc   :  { %v506_v36 = vpop.permute.xlu1 %505 }
 0x7bd   :  { %v3949_v37 = vadd.f32 %v479_v34, %v470_v33  ;;  %v508_v39 = vmul.f32 %v506_v36, %v3854_v38 }
 0x7bf   :  { %510 = vrot.lane.b32.xlu0 %v508_v39, %s3718_s14  ;;  %v528_v31 = vpack.c.bf16 %v3949_v37, %v3949_v37  ;;  %v690_v2 = vrot.slane %v3949_v37, 6 }
 0x7c1   :  { %v530_v40 = vrot.slane %v528_v31, 1  ;;  %v3559_v45 = vpop.eup %3558 }
 0x7c3   :  { %713 = vrot.lane.b32.xlu0 %v712_v32, %s3720_s17  ;;  %531 = vrot.lane.b32.xlu1 %v530_v40, %s3721_s18  ;;  %v482_v40 = vmul.f32 %v3939_v18, %v3885_v15 }
 0x822   :  { %v674_v47 = vpop.permute.xlu0 %673 }
 0x823   :  { %v676_v48 = vmul.f32 %v3559_v45, %v674_v47 }
 0x825   :  { %678 = vrot.lane.b32.xlu1 %v676_v48, %s3719_s6 }
 0x831   :  { %v511_v49 = vpop.permute.xlu0 %510 }
 0x832   :  { %v513_v55 = vadd.f32 %v511_v49, %v504_v54 }
 0x834   :  { %v669_v57 = vrot.slane %v513_v55, 2 }
 0x835   :  { %v532_v50 = vpop.permute.xlu1 %531  ;;  %v714_v52 = vpop.permute.xlu0 %713 }
 0x836   :  { %v716_v53 = vmul.f32 %v714_v52, %v3854_v38  ;;  %3396 = vmatmul.mubr.msk.bf16.vlgmr.msra.gmra.mxu1 %vm70_vm1, %v532_v50  ;;  %v671_v58 = vmul.f32 %v3559_v45, %v669_v57 }
 0x837   :  { %3406 = vmatpush3.bf16.msra.mxu1 %v3805_v3  ;;  %3407 = vmatprep.mubr.msk.bf16.mxu1 %vm3715_vm0, %v3714_v0 }
 0x838   :  { %718 = vrot.lane.b32.xlu0 %v716_v53, %s3721_s18  ;;  %3417 = vmatprep.subr.bf16.mxu1 %v3714_v0 }
 0x83c   :  { %483 = vrot.lane.b32.xlu0 %v424_v14, %s3723_s20 }
 0x897   :  { %v679_v59 = vpop.permute.xlu1 %678 }
 0x898   :  { %v3969_v60 = vadd.f32 %v679_v59, %v671_v58 }
 0x89a   :  { %3560 = vtanh.f32 %v3969_v60 }
 0x8a7   :  { %v3561_v61 = vpop.eup %3560 }
 0x8a8   :  { %684 = vrot.lane.b32.xlu1 %v3561_v61, %s3719_s6 }
 0x8aa   :  { %v719_v62 = vpop.permute.xlu0 %718 }
 0x8ae   :  { %v484_v63 = vpop.permute.xlu0 %483 }
 0x8af   :  { %v486_v1 = vmul.f32 %v484_v63, %v3890_v19 }
 0x8b1   :  { %488 = vrot.lane.b32.xlu0 %v486_v1, %s3719_s6 }
 0x8b5   :  { %691 = vrot.lane.b32.xlu0 %v690_v2, %s3721_s18 }
 0x8f6   :  { %v570_v35 = vpop.f32.mrf.mxu1 }
 0x8f7   :  { %v577_v10 = vrot.slane %v570_v35, 4 }
 0x8f8   :  { %v3397_v6 = vpop.f32.mrf.mxu1 }
 0x8f9   :  { %v579_v11 = vadd.f32 %v577_v10, %v3839_v23 }
 0x8fa   :  { %v573_v7 = vpop.f32.mrf.mxu1 }
 0x8fb   :  { %3562 = vtanh.f32 %v579_v11  ;;  %v3278_v30 = vmul.f32 -1.442695, %v579_v11 }
 0x8fc   :  { %v3398_v9 = vpop.f32.mrf.mxu1 }
 0x8fd   :  { %3564 = vpow2.f32 %v3278_v30 }
 0x908   :  { %v3563_v29 = vpop.eup %3562 }
 0x90a   :  { %v3565_v33 = vpop.eup %3564 }
 0x90b   :  { %v637_v34 = vadd.f32 1.0, %v3565_v33 }
 0x90d   :  { %3566 = vrcp.f32 %v637_v34 }
 0x91a   :  { %v685_v12 = vpop.permute.xlu1 %684  ;;  %v3567_v39 = vpop.eup %3566 }
 0x91b   :  { %v687_v13 = vmul.f32 %v3559_v45, %v685_v12 }
 0x91d   :  { %v710_v14 = vmul.f32 %v687_v13, %v3865_v51 }
 0x91f   :  { %v3979_v16 = vadd.f32 %v719_v62, %v710_v14 }
 0x921   :  { %v798_v17 = vpack.c.bf16 %v3979_v16, %v3979_v16  ;;  %v929_v35 = vrot.slane %v3979_v16, 2 }
 0x923   :  { %v489_v21 = vpop.permute.xlu0 %488  ;;  %v800_v22 = vrot.slane %v798_v17, 1 }
 0x924   :  { %v491_v41 = vadd.f32 %v489_v21, %v482_v40 }
 0x925   :  { %801 = vrot.lane.b32.xlu1 %v800_v22, %s3720_s17 }
 0x926   :  { %v642_v43 = vrot.slane %v491_v41, 6 }
 0x927   :  { %v692_v24 = vpop.permute.xlu0 %691 }
 0x928   :  { %v694_v28 = vmul.f32 %v692_v24, %v3890_v19  ;;  %v644_v44 = vmul.f32 %v3567_v39, %v642_v43  ;;  %v722_v24 = vmul.f32 %v3969_v60, %v3865_v51 }
 0x929   :  { %646 = vrot.lane.b32.xlu1 %v3563_v29, %s3718_s14 }
 0x92a   :  { %696 = vrot.lane.b32.xlu0 %v694_v28, %s3720_s17 }
 0x997   :  { %v802_v36 = vpop.permute.xlu1 %801 }
 0x998   :  { %3414 = vmatmul.mubr.msk.bf16.vlgmr.msra.gmra.mxu0 %vm70_vm1, %v802_v36 }
 0x999   :  { %3424 = vmatpush3.bf16.msra.mxu0 %v3812_v5  ;;  %3425 = vmatprep.mubr.msk.bf16.mxu0 %vm3715_vm0, %v3714_v0 }
 0x99a   :  { %3435 = vmatprep.subr.bf16.mxu0 %v3714_v0 }
 0x99b   :  { %v647_v31 = vpop.permute.xlu1 %646 }
 0x99c   :  { %v649_v32 = vmul.f32 %v3567_v39, %v647_v31  ;;  %v697_v58 = vpop.permute.xlu0 %696 }
 0x99e   :  { %651 = vrot.lane.b32.xlu1 %v649_v32, %s3719_s6 }
 0xa10   :  { %v652_v45 = vpop.permute.xlu1 %651 }
 0xa11   :  { %v3995_v47 = vadd.f32 %v652_v45, %v644_v44 }
 0xa13   :  { %3568 = vtanh.f32 %v3995_v47 }
 0xa20   :  { %v3569_v48 = vpop.eup %3568 }
 0xa21   :  { %657 = vrot.lane.b32.xlu1 %v3569_v48, %s3719_s6 }
 0xa58   :  { %v840_v49 = vpop.f32.mrf.mxu0 }
 0xa59   :  { %847 = vrot.lane.b32.xlu1 %v840_v49, %s3717_s0 }
 0xa5a   :  { %v3415_v50 = vpop.f32.mrf.mxu0 }
 0xa5c   :  { %v843_v52 = vpop.f32.mrf.mxu0 }
 0xa5d   :  { %723 = vrot.lane.b32.xlu1 %v669_v57, %s3722_s19 }
 0xa5e   :  { %v3416_v53 = vpop.f32.mrf.mxu0 }
 0xa93   :  { %v658_v18 = vpop.permute.xlu1 %657 }
 0xa94   :  { %v660_v54 = vmul.f32 %v3567_v39, %v658_v18 }
 0xa96   :  { %v688_v55 = vmul.f32 %v660_v54, %v3885_v15 }
 0xa98   :  { %v4002_v59 = vadd.f32 %v697_v58, %v688_v55 }
 0xa9a   :  { %v746_v61 = vpack.c.bf16 %v4002_v59, %v4002_v59  ;;  %v907_v60 = vrot.slane %v4002_v59, 6 }
 0xa9c   :  { %v748_v62 = vrot.slane %v746_v61, 2 }
 0xa9e   :  { %749 = vrot.lane.b32.xlu0 %v748_v62, %s3721_s18 }
 0xacb   :  { %v848_v63 = vpop.permute.xlu1 %847 }
 0xacc   :  { %v850_v1 = vadd.f32 %v848_v63, %v3836_v20 }
 0xace   :  { %3570 = vtanh.f32 %v850_v1  ;;  %v3283_v9 = vmul.f32 -1.442695, %v850_v1 }
 0xacf   :  { %v724_v2 = vpop.permute.xlu1 %723 }
 0xad0   :  { %v726_v57 = vmul.f32 %v724_v2, %v3854_v38  ;;  %3572 = vpow2.f32 %v3283_v9 }
 0xad2   :  { %728 = vrot.lane.b32.xlu1 %v726_v57, %s3718_s14 }
 0xad6   :  { %930 = vrot.lane.b32.xlu1 %v929_v35, %s3720_s17 }
 0xadb   :  { %v3571_v6 = vpop.eup %3570 }
 0xadc   :  { %890 = vrot.lane.b32.xlu0 %v3571_v6, %s3718_s14 }
 0xadd   :  { %v3573_v10 = vpop.eup %3572 }
 0xade   :  { %v881_v11 = vadd.f32 1.0, %v3573_v10 }
 0xae0   :  { %3574 = vrcp.f32 %v881_v11 }
 0xaed   :  { %v3575_v17 = vpop.eup %3574 }
 0xb10   :  { %v750_v7 = vpop.permute.xlu0 %749 }
 0xb11   :  { %3408 = vmatmul.mubr.msk.bf16.vlgmr.msra.gmra.mxu1 %vm70_vm1, %v750_v7  ;;  %v700_v7 = vmul.f32 %v3995_v47, %v3885_v15 }
 0xb12   :  { %3418 = vmatpush3.bf16.msra.mxu1 %v3805_v3  ;;  %3419 = vmatprep.mubr.msk.bf16.mxu1 %vm3715_vm0, %v3714_v0 }
 0xb13   :  { %3429 = vmatprep.subr.bf16.mxu1 %v3714_v0 }
 0xb44   :  { %v729_v12 = vpop.permute.xlu1 %728 }
 0xb45   :  { %v4024_v29 = vadd.f32 %v729_v12, %v722_v24 }
 0xb47   :  { %v886_v30 = vrot.slane %v4024_v29, 2 }
 0xb48   :  { %v931_v13 = vpop.permute.xlu1 %930 }
 0xb49   :  { %v933_v14 = vmul.f32 %v931_v13, %v3854_v38  ;;  %v888_v36 = vmul.f32 %v3575_v17, %v886_v30 }
 0xb4b   :  { %935 = vrot.lane.b32.xlu1 %v933_v14, %s3721_s18 }
 0xb4e   :  { %v891_v21 = vpop.permute.xlu0 %890 }
 0xb4f   :  { %v893_v22 = vmul.f32 %v3575_v17, %v891_v21  ;;  %701 = vrot.lane.b32.xlu1 %v642_v43, %s3723_s20 }
 0xb51   :  { %895 = vrot.lane.b32.xlu0 %v893_v22, %s3719_s6 }
 0xbbd   :  { %v936_v28 = vpop.permute.xlu1 %935 }
 0xbc1   :  { %v702_v33 = vpop.permute.xlu1 %701 }
 0xbc2   :  { %v704_v34 = vmul.f32 %v702_v33, %v3890_v19 }
 0xbc3   :  { %v896_v39 = vpop.permute.xlu0 %895 }
 0xbc4   :  { %v4030_v31 = vadd.f32 %v896_v39, %v888_v36  ;;  %706 = vrot.lane.b32.xlu1 %v704_v34, %s3719_s6 }
 0xbc6   :  { %3576 = vtanh.f32 %v4030_v31 }
 0xbc8   :  { %908 = vrot.lane.b32.xlu1 %v907_v60, %s3721_s18 }
 0xbd1   :  { %v788_v32 = vpop.f32.mrf.mxu1 }
 0xbd2   :  { %v795_v50 = vrot.slane %v788_v32, 2 }
 0xbd3   :  { %v3577_v40 = vpop.eup %3576  ;;  %v3409_v41 = vpop.f32.mrf.mxu1 }
 0xbd4   :  { %901 = vrot.lane.b32.xlu0 %v3577_v40, %s3719_s6  ;;  %v797_v52 = vadd.f32 %v795_v50, %v3839_v23 }
 0xbd5   :  { %v791_v43 = vpop.f32.mrf.mxu1 }
 0xbd6   :  { %3578 = vtanh.f32 %v797_v52  ;;  %v3282_v62 = vmul.f32 -1.442695, %v797_v52 }
 0xbd7   :  { %v3410_v44 = vpop.f32.mrf.mxu1 }
 0xbd8   :  { %3580 = vpow2.f32 %v3282_v62 }
 0xbe3   :  { %v3579_v61 = vpop.eup %3578 }
 0xbe5   :  { %v3581_v63 = vpop.eup %3580 }
 0xbe6   :  { %v854_v1 = vadd.f32 1.0, %v3581_v63 }
 0xbe8   :  { %3582 = vrcp.f32 %v854_v1 }
 0xbf5   :  { %v3583_v57 = vpop.eup %3582 }
 0xc36   :  { %v707_v45 = vpop.permute.xlu1 %706 }
 0xc37   :  { %v4055_v9 = vadd.f32 %v707_v45, %v700_v7 }
 0xc39   :  { %v859_v10 = vrot.slane %v4055_v9, 6 }
 0xc3a   :  { %v909_v48 = vpop.permute.xlu1 %908 }
 0xc3b   :  { %v911_v49 = vmul.f32 %v909_v48, %v3890_v19  ;;  %v861_v11 = vmul.f32 %v3583_v57, %v859_v10 }
 0xc3d   :  { %913 = vrot.lane.b32.xlu1 %v911_v49, %s3720_s17 }
 0xc46   :  { %v902_v53 = vpop.permute.xlu0 %901 }
 0xc47   :  { %v904_v18 = vmul.f32 %v3575_v17, %v902_v53 }
 0xc49   :  { %v927_v54 = vmul.f32 %v904_v18, %v3865_v51 }
 0xc4b   :  { %v4041_v55 = vadd.f32 %v936_v28, %v927_v54 }
 0xc4d   :  { %v1012_v58 = vpack.c.bf16 %v4041_v55, %v4041_v55 }
 0xc4f   :  { %1014 = vrot.lane.b32.xlu0 %v1012_v58, %s3720_s17 }
 0xc53   :  { %863 = vrot.lane.b32.xlu0 %v3579_v61, %s3718_s14  ;;  %v939_v61 = vmul.f32 %v4030_v31, %v3865_v51 }
 0xcaf   :  { %v914_v36 = vpop.permute.xlu1 %913 }
 0xcc1   :  { %v1015_v2 = vpop.permute.xlu0 %1014 }
 0xcc2   :  { %3426 = vmatmul.mubr.msk.bf16.vlgmr.msra.gmra.mxu0 %vm70_vm1, %v1015_v2 }
 0xcc3   :  { %3436 = vmatpush3.bf16.msra.mxu0 %v3812_v5  ;;  %3437 = vmatprep.mubr.msk.bf16.mxu0 %vm3715_vm0, %v3714_v0 }
 0xcc4   :  { %3447 = vmatprep.subr.bf16.mxu0 %v3714_v0 }
 0xcc5   :  { %v864_v35 = vpop.permute.xlu0 %863 }
 0xcc6   :  { %v866_v6 = vmul.f32 %v3583_v57, %v864_v35 }
 0xcc8   :  { %868 = vrot.lane.b32.xlu0 %v866_v6, %s3719_s6 }
 0xd3a   :  { %v869_v12 = vpop.permute.xlu0 %868 }
 0xd3b   :  { %v4060_v13 = vadd.f32 %v869_v12, %v861_v11 }
 0xd3d   :  { %3584 = vtanh.f32 %v4060_v13 }
 0xd4a   :  { %v3585_v14 = vpop.eup %3584 }
 0xd4b   :  { %874 = vrot.lane.b32.xlu0 %v3585_v14, %s3719_s6 }
 0xd82   :  { %v1053_v17 = vpop.f32.mrf.mxu0 }
 0xd83   :  { %v1060_v21 = vrot.slane %v1053_v17, 2 }
 0xd84   :  { %v3427_v22 = vpop.f32.mrf.mxu0 }
 0xd85   :  { %1061 = vrot.lane.b32.xlu1 %v1060_v21, %s3717_s0 }
 0xd86   :  { %v1056_v47 = vpop.f32.mrf.mxu0 }
 0xd88   :  { %v3428_v24 = vpop.f32.mrf.mxu0 }
 0xdbd   :  { %v875_v28 = vpop.permute.xlu0 %874 }
 0xdbe   :  { %v877_v33 = vmul.f32 %v3583_v57, %v875_v28 }
 0xdc0   :  { %v905_v34 = vmul.f32 %v877_v33, %v3885_v15 }
 0xdc2   :  { %v4066_v39 = vadd.f32 %v914_v36, %v905_v34 }
 0xdc4   :  { %v963_v60 = vpack.c.bf16 %v4066_v39, %v4066_v39 }
 0xdc6   :  { %v965_v32 = vrot.slane %v963_v60, 3 }
 0xdc8   :  { %966 = vrot.lane.b32.xlu0 %v965_v32, %s3721_s18  ;;  %v1121_v32 = vrot.slane %v4066_v39, 6 }
 0xdcc   :  { %940 = vrot.lane.b32.xlu0 %v886_v30, %s3722_s19  ;;  %v1143_v30 = vrot.slane %v4041_v55, 2 }
 0xdf7   :  { %v1062_v40 = vpop.permute.xlu1 %1061 }
 0xdf8   :  { %v1064_v41 = vadd.f32 %v1062_v40, %v3839_v23 }
 0xdfa   :  { %3586 = vtanh.f32 %v1064_v41  ;;  %v3287_v48 = vmul.f32 -1.442695, %v1064_v41 }
 0xdfc   :  { %3588 = vpow2.f32 %v3287_v48 }
 0xe07   :  { %v3587_v43 = vpop.eup %3586 }
 0xe08   :  { %1104 = vrot.lane.b32.xlu1 %v3587_v43, %s3718_s14 }
 0xe09   :  { %v3589_v49 = vpop.eup %3588 }
 0xe0a   :  { %v1095_v50 = vadd.f32 1.0, %v3589_v49 }
 0xe0c   :  { %3590 = vrcp.f32 %v1095_v50 }
 0xe3a   :  { %v967_v44 = vpop.permute.xlu0 %966 }
 0xe3b   :  { %3420 = vmatmul.mubr.msk.bf16.vlgmr.msra.gmra.mxu1 %vm70_vm1, %v967_v44  ;;  %v917_v44 = vmul.f32 %v4060_v13, %v3885_v15 }
 0xe3c   :  { %3430 = vmatpush3.bf16.msra.mxu1 %v3805_v3  ;;  %3431 = vmatprep.mubr.msk.bf16.mxu1 %vm3715_vm0, %v3714_v0  ;;  %v3591_v3 = vpop.eup %3590 }
 0xe3d   :  { %3441 = vmatprep.subr.bf16.mxu1 %v3714_v0 }
 0xe3e   :  { %v941_v45 = vpop.permute.xlu0 %940 }
 0xe3f   :  { %v943_v29 = vmul.f32 %v941_v45, %v3854_v38 }
 0xe41   :  { %945 = vrot.lane.b32.xlu0 %v943_v29, %s3718_s14 }
 0xe45   :  { %1144 = vrot.lane.b32.xlu0 %v1143_v30, %s3720_s17 }
 0xe7a   :  { %v1105_v52 = vpop.permute.xlu1 %1104 }
 0xe7b   :  { %v1107_v53 = vmul.f32 %v3591_v3, %v1105_v52 }
 0xe7d   :  { %1109 = vrot.lane.b32.xlu1 %v1107_v53, %s3719_s6 }
 0xeb3   :  { %v946_v18 = vpop.permute.xlu0 %945 }
 0xeb4   :  { %v4090_v62 = vadd.f32 %v946_v18, %v939_v61 }
 0xeb6   :  { %v1100_v63 = vrot.slane %v4090_v62, 2 }
 0xeb7   :  { %v1145_v54 = vpop.permute.xlu0 %1144 }
 0xeb8   :  { %v1147_v58 = vmul.f32 %v1145_v54, %v3890_v19  ;;  %v1102_v1 = vmul.f32 %v3591_v3, %v1100_v63 }
 0xeba   :  { %1149 = vrot.lane.b32.xlu0 %v1147_v58, %s3721_s18 }
 0xeef   :  { %v1110_v2 = vpop.permute.xlu1 %1109 }
 0xef0   :  { %v4093_v57 = vadd.f32 %v1110_v2, %v1102_v1 }
 0xef2   :  { %3592 = vtanh.f32 %v4093_v57 }
 0xefb   :  { %v1005_v35 = vpop.f32.mrf.mxu1 }
 0xefc   :  { %v1011_v6 = vadd.f32 %v1005_v35, %v3836_v20 }
 0xefd   :  { %v3421_v7 = vpop.f32.mrf.mxu1 }
 0xefe   :  { %3594 = vtanh.f32 %v1011_v6  ;;  %v3286_v17 = vmul.f32 -1.442695, %v1011_v6 }
 0xeff   :  { %v3593_v11 = vpop.eup %3592  ;;  %v1008_v12 = vpop.f32.mrf.mxu1 }
 0xf00   :  { %1115 = vrot.lane.b32.xlu1 %v3593_v11, %s3719_s6  ;;  %3596 = vpow2.f32 %v3286_v17  ;;  %v4138_v12 = vld [vmem:[%s4643_s4] sm:$0xff]  }
 0xf01   :  { %v3422_v31 = vpop.f32.mrf.mxu1 }
 0xf04   :  { %918 = vrot.lane.b32.xlu1 %v859_v10, %s3723_s20 }
 0xf0b   :  { %v3595_v14 = vpop.eup %3594 }
 0xf0c   :  { %1077 = vrot.lane.b32.xlu0 %v3595_v14, %s3718_s14 }
 0xf0d   :  { %v3597_v21 = vpop.eup %3596 }
 0xf0e   :  { %v1068_v22 = vadd.f32 1.0, %v3597_v21 }
 0xf10   :  { %3598 = vrcp.f32 %v1068_v22 }
 0xf1d   :  { %v3599_v40 = vpop.eup %3598 }
 0xf2c   :  { %v1150_v33 = vpop.permute.xlu0 %1149 }
 0xf72   :  { %v1116_v47 = vpop.permute.xlu1 %1115 }
 0xf73   :  { %v1118_v24 = vmul.f32 %v3591_v3, %v1116_v47 }
 0xf75   :  { %v1141_v28 = vmul.f32 %v1118_v24, %v3885_v15 }
 0xf76   :  { %v919_v34 = vpop.permute.xlu1 %918 }
 0xf77   :  { %v4103_v36 = vadd.f32 %v1150_v33, %v1141_v28  ;;  %v921_v60 = vmul.f32 %v919_v34, %v3890_v19 }
 0xf79   :  { %923 = vrot.lane.b32.xlu0 %v921_v60, %s3719_s6  ;;  %v1226_v9 = vpack.c.bf16 %v4103_v36, %v4103_v36  ;;  %v1358_v14 = vrot.slane %v4103_v36, 2 }
 0xf7b   :  { %v1228_v10 = vrot.slane %v1226_v9, 3 }
 0xf7d   :  { %1229 = vrot.lane.b32.xlu1 %v1228_v10, %s3720_s17  ;;  %1122 = vrot.lane.b32.xlu0 %v1121_v32, %s3721_s18 }
 0xf7e   :  { %v1078_v41 = vpop.permute.xlu0 %1077 }
 0xf7f   :  { %v1080_v43 = vmul.f32 %v3599_v40, %v1078_v41 }
 0xf81   :  { %1082 = vrot.lane.b32.xlu1 %v1080_v43, %s3719_s6 }
 0xfeb   :  { %v924_v45 = vpop.permute.xlu0 %923 }
 0xfec   :  { %v926_v29 = vadd.f32 %v924_v45, %v917_v44 }
 0xfee   :  { %v1073_v30 = vrot.slane %v926_v29, 6 }
 0xfef   :  { %v1123_v48 = vpop.permute.xlu0 %1122  ;;  %v1230_v49 = vpop.permute.xlu1 %1229 }
 0xff0   :  { %v1125_v50 = vmul.f32 %v1123_v48, %v3854_v38  ;;  %3438 = vmatmul.mubr.msk.bf16.vlgmr.msra.gmra.mxu0 %vm70_vm1, %v1230_v49  ;;  %v1075_v3 = vmul.f32 %v3599_v40, %v1073_v30 }
 0xff1   :  { %3448 = vmatpush3.bf16.msra.mxu0 %v3812_v5  ;;  %3449 = vmatprep.mubr.msk.bf16.mxu0 %vm3715_vm0, %v3714_v0 }
 0xff2   :  { %1127 = vrot.lane.b32.xlu0 %v1125_v50, %s3720_s17  ;;  %3459 = vmatprep.subr.bf16.mxu0 %v3714_v0 }
 0xff3   :  { %v1083_v13 = vpop.permute.xlu1 %1082 }
 0xff4   :  { %v4122_v52 = vadd.f32 %v1083_v13, %v1075_v3 }
 0xff6   :  { %3600 = vtanh.f32 %v4122_v52 }
0x1003   :  { %v3601_v53 = vpop.eup %3600 }
0x1004   :  { %1088 = vrot.lane.b32.xlu1 %v3601_v53, %s3719_s6 }
0x1064   :  { %v1128_v58 = vpop.permute.xlu0 %1127 }
0x1076   :  { %v1089_v18 = vpop.permute.xlu1 %1088 }
0x1077   :  { %v1091_v54 = vmul.f32 %v3599_v40, %v1089_v18 }
0x1079   :  { %v1119_v5 = vmul.f32 %v1091_v54, %v3865_v51 }
0x107b   :  { %v4127_v61 = vadd.f32 %v1128_v58, %v1119_v5 }
0x107d   :  { %v1175_v62 = vpack.c.bf16 %v4127_v61, %v4127_v61 }
0x107f   :  { %1177 = vrot.lane.b32.xlu1 %v1175_v62, %s3721_s18 }
0x1083   :  { %1154 = vrot.lane.b32.xlu1 %v1100_v63, %s3722_s19 }
0x10b0   :  { %v1268_v1 = vpop.f32.mrf.mxu0 }
0x10b1   :  { %v1275_v2 = vrot.slane %v1268_v1, 4 }
0x10b2   :  { %v3439_v35 = vpop.f32.mrf.mxu0 }
0x10b3   :  { %1276 = vrot.lane.b32.xlu0 %v1275_v2, %s3717_s0 }
0x10b4   :  { %v1271_v6 = vpop.f32.mrf.mxu0 }
0x10b6   :  { %v3440_v7 = vpop.f32.mrf.mxu0 }
0x10f1   :  { %v1178_v11 = vpop.permute.xlu1 %1177 }
0x10f2   :  { %3432 = vmatmul.mubr.msk.bf16.vlgmr.msra.gmra.mxu1 %vm70_vm1, %v1178_v11 }
0x10f3   :  { %3442 = vmatpush3.bf16.msra.mxu1 %v4138_v12  ;;  %3443 = vmatprep.mubr.msk.bf16.mxu1 %vm3715_vm0, %v3714_v0 }
0x10f4   :  { %3453 = vmatprep.subr.bf16.mxu1 %v3714_v0 }
0x10f5   :  { %v1155_v63 = vpop.permute.xlu1 %1154 }
0x10f6   :  { %v1157_v31 = vmul.f32 %v1155_v63, %v3890_v19 }
0x10f8   :  { %1159 = vrot.lane.b32.xlu1 %v1157_v31, %s3718_s14  ;;  %v1131_v31 = vmul.f32 %v4122_v52, %v3865_v51 }
0x10fc   :  { %1359 = vrot.lane.b32.xlu1 %v1358_v14, %s3720_s17 }
0x1125   :  { %v1277_v17 = vpop.permute.xlu0 %1276 }
0x1126   :  { %v1279_v21 = vadd.f32 %v1277_v17, %v3839_v23 }
0x1128   :  { %3602 = vtanh.f32 %v1279_v21  ;;  %v3291_v47 = vmul.f32 -1.442695, %v1279_v21 }
0x112a   :  { %3604 = vpow2.f32 %v3291_v47 }
0x1135   :  { %v3603_v22 = vpop.eup %3602 }
0x1136   :  { %1319 = vrot.lane.b32.xlu0 %v3603_v22, %s3718_s14 }
0x1137   :  { %v3605_v24 = vpop.eup %3604 }
0x1138   :  { %v1310_v28 = vadd.f32 1.0, %v3605_v24 }
0x113a   :  { %3606 = vrcp.f32 %v1310_v28 }
0x1147   :  { %v3607_v33 = vpop.eup %3606 }
0x116a   :  { %v1160_v44 = vpop.permute.xlu1 %1159 }
0x116e   :  { %v1360_v29 = vpop.permute.xlu1 %1359 }
0x116f   :  { %v1362_v48 = vmul.f32 %v1360_v29, %v3890_v19 }
0x11a8   :  { %v1320_v34 = vpop.permute.xlu0 %1319 }
0x11a9   :  { %v1322_v60 = vmul.f32 %v3607_v33, %v1320_v34 }
0x11ab   :  { %1324 = vrot.lane.b32.xlu0 %v1322_v60, %s3719_s6 }
0x11af   :  { %1132 = vrot.lane.b32.xlu0 %v1073_v30, %s3723_s20  ;;  %v1153_v30 = vmul.f32 %v4093_v57, %v3885_v15  ;;  %v1336_v57 = vrot.slane %v4127_v61, 6 }
0x11b1   :  { %v1162_v50 = vadd.f32 %v1160_v44, %v1153_v30 }
0x11b2   :  { %v1216_v9 = vpop.f32.mrf.mxu1 }
0x11b3   :  { %v1223_v10 = vrot.slane %v1216_v9, 6  ;;  %v1315_v3 = vrot.slane %v1162_v50, 2 }
0x11b4   :  { %v3433_v32 = vpop.f32.mrf.mxu1 }
0x11b5   :  { %v1225_v40 = vadd.f32 %v1223_v10, %v3836_v20  ;;  %v1317_v13 = vmul.f32 %v3607_v33, %v1315_v3 }
0x11b6   :  { %v1219_v41 = vpop.f32.mrf.mxu1 }
0x11b7   :  { %3608 = vtanh.f32 %v1225_v40  ;;  %v3290_v49 = vmul.f32 -1.442695, %v1225_v40  ;;  %v3711_v40 = vld [vmem:[%s4644_s5] sm:$0xff]  }
0x11b8   :  { %v3434_v43 = vpop.f32.mrf.mxu1 }
0x11b9   :  { %3610 = vpow2.f32 %v3290_v49 }
0x11c4   :  { %v3609_v45 = vpop.eup %3608 }
0x11c5   :  { %1292 = vrot.lane.b32.xlu1 %v3609_v45, %s3718_s14 }
0x11c6   :  { %v3611_v54 = vpop.eup %3610 }
0x11c7   :  { %v1283_v5 = vadd.f32 1.0, %v3611_v54 }
0x11c9   :  { %1364 = vrot.lane.b32.xlu1 %v1362_v48, %s3721_s18 }
0x121d   :  { %v1325_v53 = vpop.permute.xlu0 %1324 }
0x121e   :  { %v4158_v18 = vadd.f32 %v1325_v53, %v1317_v13 }
0x1220   :  { %3612 = vtanh.f32 %v4158_v18 }
0x1221   :  { %3614 = vrcp.f32 %v1283_v5  ;;  %v1133_v62 = vpop.permute.xlu0 %1132 }
0x1222   :  { %v1135_v1 = vmul.f32 %v1133_v62, %v3854_v38 }
0x122d   :  { %v3613_v58 = vpop.eup %3612 }
0x122e   :  { %1330 = vrot.lane.b32.xlu0 %v3613_v58, %s3719_s6  ;;  %v3615_v2 = vpop.eup %3614 }
0x1232   :  { %1137 = vrot.lane.b32.xlu0 %v1135_v1, %s3719_s6 }
0x1236   :  { %1337 = vrot.lane.b32.xlu0 %v1336_v57, %s3721_s18 }
0x1237   :  { %v1293_v35 = vpop.permute.xlu1 %1292 }
0x1238   :  { %v1295_v6 = vmul.f32 %v3615_v2, %v1293_v35 }
0x123a   :  { %1297 = vrot.lane.b32.xlu1 %v1295_v6, %s3719_s6 }
0x123b   :  { %v1365_v14 = vpop.permute.xlu1 %1364 }
0x12a0   :  { %v1331_v7 = vpop.permute.xlu0 %1330 }
0x12a1   :  { %v1333_v11 = vmul.f32 %v3607_v33, %v1331_v7 }
0x12a3   :  { %v1356_v63 = vmul.f32 %v1333_v11, %v3885_v15 }
0x12a4   :  { %v1138_v17 = vpop.permute.xlu0 %1137 }
0x12a5   :  { %v4170_v21 = vadd.f32 %v1365_v14, %v1356_v63  ;;  %v1140_v22 = vadd.f32 %v1138_v17, %v1131_v31 }
0x12a7   :  { %v1288_v47 = vrot.slane %v1140_v22, 6  ;;  %v1442_v24 = vpack.c.bf16 %v4170_v21, %v4170_v21  ;;  %v1574_v31 = vrot.slane %v4170_v21, 2 }
0x12a8   :  { %v1338_v34 = vpop.permute.xlu0 %1337 }
0x12a9   :  { %v1444_v28 = vrot.slane %v1442_v24, 2  ;;  %v1290_v60 = vmul.f32 %v3615_v2, %v1288_v47  ;;  %v1340_v9 = vmul.f32 %v1338_v34, %v3854_v38 }
0x12ab   :  { %1445 = vrot.lane.b32.xlu1 %v1444_v28, %s3720_s17 }
0x12ac   :  { %v1298_v33 = vpop.permute.xlu1 %1297 }
0x12ad   :  { %v4176_v10 = vadd.f32 %v1298_v33, %v1290_v60 }
0x12af   :  { %3616 = vtanh.f32 %v4176_v10  ;;  %1342 = vrot.lane.b32.xlu1 %v1340_v9, %s3720_s17 }
0x12bc   :  { %v3617_v52 = vpop.eup %3616 }
0x12bd   :  { %1303 = vrot.lane.b32.xlu0 %v3617_v52, %s3719_s6 }
0x131d   :  { %v1446_v32 = vpop.permute.xlu1 %1445 }
0x131e   :  { %3450 = vmatmul.mubr.msk.bf16.vlgmr.msra.gmra.mxu0 %vm70_vm1, %v1446_v32 }
0x131f   :  { %3460 = vmatpush3.bf16.msra.mxu0 %v3711_v40  ;;  %3461 = vmatprep.mubr.msk.bf16.mxu0 %vm3715_vm0, %v3714_v0 }
0x1321   :  { %v1343_v45 = vpop.permute.xlu1 %1342 }
0x132f   :  { %v1304_v41 = vpop.permute.xlu0 %1303 }
0x1330   :  { %v1306_v43 = vmul.f32 %v3615_v2, %v1304_v41 }
0x1332   :  { %v1334_v44 = vmul.f32 %v1306_v43, %v3865_v51 }
0x1334   :  { %v4188_v29 = vadd.f32 %v1343_v45, %v1334_v44  ;;  %v1368_v45 = vmul.f32 %v4158_v18, %v3885_v15 }
0x1336   :  { %v1390_v48 = vpack.c.bf16 %v4188_v29, %v4188_v29  ;;  %v1552_v43 = vrot.slane %v4188_v29, 6 }
0x1338   :  { %v1392_v30 = vrot.slane %v1390_v48, 1 }
0x133a   :  { %1393 = vrot.lane.b32.xlu0 %v1392_v30, %s3721_s18 }
0x133e   :  { %1369 = vrot.lane.b32.xlu0 %v1315_v3, %s3722_s19 }
0x1342   :  { %1347 = vrot.lane.b32.xlu0 %v1288_v47, %s3723_s20 }
0x13ac   :  { %v1394_v49 = vpop.permute.xlu0 %1393 }
0x13ad   :  { %3444 = vmatmul.mubr.msk.bf16.vlgmr.msra.gmra.mxu1 %vm70_vm1, %v1394_v49 }
0x13ae   :  { %3454 = vmatpush3.bf16.msra.mxu1 %v4138_v12  ;;  %3455 = vmatprep.mubr.msk.bf16.mxu1 %vm3715_vm0, %v3714_v0 }
0x13af   :  { %3465 = vmatprep.subr.bf16.mxu1 %v3714_v0 }
0x13b0   :  { %v1370_v1 = vpop.permute.xlu0 %1369 }
0x13b1   :  { %v1372_v12 = vmul.f32 %v1370_v1, %v3890_v19 }
0x13b4   :  { %v1348_v60 = vpop.permute.xlu0 %1347 }
0x13b5   :  { %v1350_v33 = vmul.f32 %v1348_v60, %v3854_v38 }
0x13de   :  { %v1484_v50 = vpop.f32.mrf.mxu0 }
0x13df   :  { %v1491_v13 = vrot.slane %v1484_v50, 6 }
0x13e0   :  { %v3451_v53 = vpop.f32.mrf.mxu0 }
0x13e1   :  { %1492 = vrot.lane.b32.xlu1 %v1491_v13, %s3717_s0 }
0x13e2   :  { %v1487_v54 = vpop.f32.mrf.mxu0 }
0x13e4   :  { %v3452_v5 = vpop.f32.mrf.mxu0 }
0x1453   :  { %v1493_v3 = vpop.permute.xlu1 %1492 }
0x1454   :  { %v1495_v58 = vadd.f32 %v1493_v3, %v3839_v23  ;;  %v1346_v3 = vmul.f32 %v4176_v10, %v3865_v51 }
0x1456   :  { %3618 = vtanh.f32 %v1495_v58  ;;  %v3295_v14 = vmul.f32 -1.442695, %v1495_v58 }
0x1463   :  { %v3619_v62 = vpop.eup %3618 }
0x1464   :  { %1535 = vrot.lane.b32.xlu1 %v3619_v62, %s3718_s14 }
0x1468   :  { %1374 = vrot.lane.b32.xlu1 %v1372_v12, %s3718_s14 }
0x146d   :  { %v1432_v57 = vpop.f32.mrf.mxu1 }
0x146e   :  { %v1439_v2 = vrot.slane %v1432_v57, 4 }
0x146f   :  { %v3445_v35 = vpop.f32.mrf.mxu1 }
0x1470   :  { %v1441_v6 = vadd.f32 %v1439_v2, %v3836_v20 }
0x1471   :  { %v1435_v7 = vpop.f32.mrf.mxu1 }
0x1472   :  { %3620 = vtanh.f32 %v1441_v6  ;;  %v3294_v47 = vmul.f32 -1.442695, %v1441_v6 }
0x1473   :  { %v3446_v11 = vpop.f32.mrf.mxu1  ;;  %3622 = vpow2.f32 %v3295_v14 }
0x147f   :  { %v3621_v63 = vpop.eup %3620 }
0x1480   :  { %1508 = vrot.lane.b32.xlu0 %v3621_v63, %s3718_s14  ;;  %v3623_v17 = vpop.eup %3622 }
0x1481   :  { %v1526_v22 = vadd.f32 1.0, %v3623_v17 }
0x1483   :  { %3624 = vrcp.f32 %v1526_v22 }
0x1484   :  { %1575 = vrot.lane.b32.xlu0 %v1574_v31, %s3720_s17  ;;  %3626 = vpow2.f32 %v3294_v47 }
0x1490   :  { %v3625_v24 = vpop.eup %3624 }
0x1491   :  { %v3627_v9 = vpop.eup %3626 }
0x1492   :  { %v1499_v52 = vadd.f32 1.0, %v3627_v9 }
0x1494   :  { %3628 = vrcp.f32 %v1499_v52 }
0x14a1   :  { %v3629_v32 = vpop.eup %3628 }
0x14d6   :  { %v1536_v28 = vpop.permute.xlu1 %1535 }
0x14d7   :  { %v1538_v34 = vmul.f32 %v3625_v24, %v1536_v28 }
0x14d9   :  { %1540 = vrot.lane.b32.xlu1 %v1538_v34, %s3719_s6 }
0x14da   :  { %v1375_v44 = vpop.permute.xlu1 %1374 }
0x14db   :  { %v1377_v48 = vadd.f32 %v1375_v44, %v1368_v45 }
0x14dd   :  { %1352 = vrot.lane.b32.xlu1 %v1350_v33, %s3719_s6  ;;  %v1531_v30 = vrot.slane %v1377_v48, 2 }
0x14df   :  { %v1533_v49 = vmul.f32 %v3625_v24, %v1531_v30 }
0x14f2   :  { %v1509_v40 = vpop.permute.xlu0 %1508 }
0x14f3   :  { %v1511_v41 = vmul.f32 %v3629_v32, %v1509_v40 }
0x14f5   :  { %1513 = vrot.lane.b32.xlu0 %v1511_v41, %s3719_s6 }
0x14f6   :  { %v1576_v54 = vpop.permute.xlu0 %1575 }
0x14f7   :  { %v1578_v58 = vmul.f32 %v1576_v54, %v3890_v19 }
0x14f9   :  { %1553 = vrot.lane.b32.xlu0 %v1552_v43, %s3721_s18 }
0x154b   :  { %v1541_v50 = vpop.permute.xlu1 %1540 }
0x154c   :  { %v4217_v13 = vadd.f32 %v1541_v50, %v1533_v49 }
0x154e   :  { %3630 = vtanh.f32 %v4217_v13 }
0x154f   :  { %v1353_v5 = vpop.permute.xlu1 %1352 }
0x1550   :  { %v1355_v62 = vadd.f32 %v1353_v5, %v1346_v3 }
0x1552   :  { %v1504_v18 = vrot.slane %v1355_v62, 6 }
0x1554   :  { %v1506_v1 = vmul.f32 %v3629_v32, %v1504_v18 }
0x155b   :  { %v3631_v53 = vpop.eup %3630 }
0x155c   :  { %1546 = vrot.lane.b32.xlu1 %v3631_v53, %s3719_s6 }
0x1560   :  { %1580 = vrot.lane.b32.xlu1 %v1578_v58, %s3721_s18 }
0x1567   :  { %v1514_v12 = vpop.permute.xlu0 %1513 }
0x1568   :  { %v4225_v57 = vadd.f32 %v1514_v12, %v1506_v1 }
0x156a   :  { %3632 = vtanh.f32 %v4225_v57 }
0x156b   :  { %v1554_v2 = vpop.permute.xlu0 %1553 }
0x156c   :  { %v1556_v35 = vmul.f32 %v1554_v2, %v3854_v38 }
0x156e   :  { %1558 = vrot.lane.b32.xlu1 %v1556_v35, %s3720_s17 }
0x1577   :  { %v3633_v10 = vpop.eup %3632 }
0x1578   :  { %1519 = vrot.lane.b32.xlu0 %v3633_v10, %s3719_s6 }
0x15ce   :  { %v1547_v6 = vpop.permute.xlu1 %1546 }
0x15cf   :  { %v1549_v7 = vmul.f32 %v3625_v24, %v1547_v6 }
0x15d1   :  { %v1572_v11 = vmul.f32 %v1549_v7, %v3885_v15 }
0x15d2   :  { %v1581_v63 = vpop.permute.xlu1 %1580 }
0x15d3   :  { %v4232_v31 = vadd.f32 %v1581_v63, %v1572_v11 }
0x15d5   :  { %v1658_v14 = vpack.c.bf16 %v4232_v31, %v4232_v31 }
0x15d7   :  { %v1660_v17 = vrot.slane %v1658_v14, 1 }
0x15d9   :  { %1661 = vrot.lane.b32.xlu0 %v1660_v17, %s3720_s17 }
0x15e0   :  { %v1559_v34 = vpop.permute.xlu1 %1558 }
0x15ea   :  { %v1520_v22 = vpop.permute.xlu0 %1519 }
0x15eb   :  { %v1522_v47 = vmul.f32 %v3629_v32, %v1520_v22 }
0x15ed   :  { %v1550_v28 = vmul.f32 %v1522_v47, %v3865_v51  ;;  %v1779_v47 = vrot.slane %v4232_v31, 2 }
0x15ef   :  { %v4238_v60 = vadd.f32 %v1559_v34, %v1550_v28  ;;  %v1562_v34 = vmul.f32 %v4225_v57, %v3865_v51  ;;  %v514_v57 = vmul.f32 %v3949_v37, %v3885_v15  ;;  %v1378_v37 = vmul.f32 %v4188_v29, %v3865_v51 }
0x15f1   :  { %v1606_v24 = vpack.c.bf16 %v4238_v60, %v4238_v60 }
0x15f3   :  { %v1608_v33 = vrot.slane %v1606_v24, 2 }
0x15f5   :  { %1609 = vrot.lane.b32.xlu1 %v1608_v33, %s3721_s18 }
0x15f9   :  { %1563 = vrot.lane.b32.xlu1 %v1504_v18, %s3723_s20 }
0x164b   :  { %v1662_v9 = vpop.permute.xlu0 %1661 }
0x164c   :  { %3462 = vmatmul.mubr.msk.bf16.vlgmr.msra.gmra.mxu0 %vm70_vm1, %v1662_v9 }
0x1667   :  { %v1610_v52 = vpop.permute.xlu1 %1609 }
0x1668   :  { %3456 = vmatmul.mubr.msk.bf16.vlgmr.msra.gmra.mxu1 %vm70_vm1, %v1610_v52 }
0x1669   :  { %3469 = vmatprep.mubr.msk.bf16.mxu1 %vm3715_vm0, %v3714_v0  ;;  %vm2828_vm0 = vcmask 1047559  }
0x166b   :  { %v1564_v5 = vpop.permute.xlu1 %1563 }
0x166c   :  { %v1566_v3 = vmul.f32 %v1564_v5, %v3854_v38 }
0x170c   :  { %v1700_v32 = vpop.f32.mrf.mxu0 }
0x170d   :  { %1707 = vrot.lane.b32.xlu0 %v1700_v32, %s3717_s0 }
0x170e   :  { %v3463_v40 = vpop.f32.mrf.mxu0 }
0x1710   :  { %v1703_v41 = vpop.f32.mrf.mxu0 }
0x1711   :  { %1585 = vrot.lane.b32.xlu0 %v1531_v30, %s3722_s19 }
0x1712   :  { %v3464_v43 = vpop.f32.mrf.mxu0 }
0x1728   :  { %v1648_v44 = vpop.f32.mrf.mxu1 }
0x1729   :  { %v1655_v45 = vrot.slane %v1648_v44, 2  ;;  %v297_v44 = vmul.f32 %v3895_v26, %v3885_v15  ;;  %v1163_v26 = vmul.f32 %v4127_v61, %v3865_v51 }
0x172a   :  { %v3457_v48 = vpop.f32.mrf.mxu1 }
0x172b   :  { %v1657_v49 = vadd.f32 %v1655_v45, %v3836_v20  ;;  %v732_v45 = vmul.f32 %v4002_v59, %v3885_v15  ;;  %v1594_v59 = vmul.f32 %v4238_v60, %v3865_v51 }
0x172c   :  { %v1651_v50 = vpop.f32.mrf.mxu1 }
0x172d   :  { %3634 = vtanh.f32 %v1657_v49  ;;  %v3298_v62 = vmul.f32 -1.442695, %v1657_v49 }
0x172e   :  { %v3458_v53 = vpop.f32.mrf.mxu1 }
0x173a   :  { %v3635_v54 = vpop.eup %3634 }
0x173b   :  { %1723 = vrot.lane.b32.xlu1 %v3635_v54, %s3718_s14 }
0x173f   :  { %1568 = vrot.lane.b32.xlu1 %v1566_v3, %s3719_s6 }
0x177f   :  { %v1708_v58 = vpop.permute.xlu0 %1707 }
0x1780   :  { %v1710_v30 = vadd.f32 %v1708_v58, %v3839_v23  ;;  %v1767_v23 = vrot.slane %v4238_v60, 6  ;;  %v304_v60 = vmul.f32 %v3869_v56, %v3865_v51  ;;  %v739_v58 = vmul.f32 %v3979_v16, %v3865_v51 }
0x1781   :  { %v1169_v56 = vmul.f32 %v4103_v36, %v3885_v15  ;;  %v1600_v16 = vmul.f32 %v4232_v31, %v3885_v15 }
0x1782   :  { %3636 = vtanh.f32 %v1710_v30  ;;  %v3299_v7 = vmul.f32 -1.442695, %v1710_v30 }
0x1783   :  { %3638 = vpow2.f32 %v3298_v62  ;;  %v1586_v1 = vpop.permute.xlu0 %1585 }
0x1784   :  { %v1588_v20 = vmul.f32 %v1586_v1, %v3890_v19 }
0x178f   :  { %v3637_v18 = vpop.eup %3636 }
0x1790   :  { %1750 = vrot.lane.b32.xlu0 %v3637_v18, %s3718_s14  ;;  %v3639_v12 = vpop.eup %3638 }
0x1791   :  { %v1714_v2 = vadd.f32 1.0, %v3639_v12 }
0x1793   :  { %3640 = vrcp.f32 %v1714_v2  ;;  %v3520_v2 = vld [vmem:[%s4647_s7 + $0x8] sm:$0xff]  }
0x1794   :  { %1590 = vrot.lane.b32.xlu0 %v1588_v20, %s3718_s14  ;;  %3642 = vpow2.f32 %v3299_v7  ;;  %3466 = vmatpush3.bf16.msra.mxu1 %v3520_v2 }
0x1795   :  { %3467 = vmatprep.subr.bf16.mxu1 %v3714_v0 }
0x17a0   :  { %v4258_v35 = vpop.eup %3640 }
0x17a1   :  { %v3643_v11 = vpop.eup %3642 }
0x17a2   :  { %v1741_v63 = vadd.f32 1.0, %v3643_v11 }
0x17a4   :  { %3644 = vrcp.f32 %v1741_v63 }
0x17ad   :  { %v1724_v10 = vpop.permute.xlu1 %1723 }
0x17ae   :  { %v1726_v6 = vmul.f32 %v4258_v35, %v1724_v10 }
0x17b0   :  { %1728 = vrot.lane.b32.xlu1 %v1726_v6, %s3719_s6 }
0x17b1   :  { %v4264_v14 = vpop.eup %3644  ;;  %v1569_v28 = vpop.permute.xlu1 %1568 }
0x17b2   :  { %v1571_v24 = vadd.f32 %v1569_v28, %v1562_v34 }
0x17b4   :  { %1768 = vrot.lane.b32.xlu1 %v1767_v23, %s3721_s18  ;;  %v1719_v33 = vrot.slane %v1571_v24, 6 }
0x17b6   :  { %v1721_v9 = vmul.f32 %v4258_v35, %v1719_v33 }
0x1802   :  { %v1751_v17 = vpop.permute.xlu0 %1750 }
0x1803   :  { %v1753_v22 = vmul.f32 %v4264_v14, %v1751_v17 }
0x1805   :  { %1755 = vrot.lane.b32.xlu0 %v1753_v22, %s3719_s6 }
0x1806   :  { %v1591_v48 = vpop.permute.xlu0 %1590 }
0x1809   :  { %1780 = vrot.lane.b32.xlu0 %v1779_v47, %s3720_s17 }
0x1822   :  { %v1729_v52 = vpop.permute.xlu1 %1728 }
0x1823   :  { %v1731_v32 = vadd.f32 %v1729_v52, %v1721_v9 }
0x1825   :  { %3646 = vtanh.f32 %v1731_v32 }
0x1826   :  { %v1769_v41 = vpop.permute.xlu1 %1768 }
0x1827   :  { %v1771_v43 = vmul.f32 %v1769_v41, %v3854_v38  ;;  %v949_v38 = vmul.f32 %v4066_v39, %v3885_v15  ;;  %v1584_v39 = vmul.f32 %v4217_v13, %v3885_v15  ;;  %v521_v13 = vmul.f32 %v3920_v46, %v3865_v51 }
0x1828   :  { %v1384_v46 = vmul.f32 %v4170_v21, %v3885_v15 }
0x1829   :  { %v1593_v49 = vadd.f32 %v1591_v48, %v1584_v39  ;;  %v4360_v48 = vld [vmem:[%s4649_s9] ss:$0 sm:$0xff] }
0x182b   :  { %v1746_v50 = vrot.slane %v1593_v49, 2 }
0x182d   :  { %v1748_v61 = vmul.f32 %v4264_v14, %v1746_v50 }
0x1832   :  { %v3647_v40 = vpop.eup %3646 }
0x1833   :  { %1734 = vrot.lane.b32.xlu1 %v3647_v40, %s3719_s6 }
0x1837   :  { %1773 = vrot.lane.b32.xlu1 %v1771_v43, %s3720_s17 }
0x183b   :  { %299 = vrot.lane.b32.xlu1 %v297_v44, %s3721_s18  ;;  %v3724_v44 = vmov 1966171168  }
0x183f   :  { %516 = vrot.lane.b32.xlu1 %v514_v57, %s3721_s18  ;;  %v2528_v57 = vunpack.c.l.s4 %v3724_v44 }
0x1843   :  { %734 = vrot.lane.b32.xlu1 %v732_v45, %s3721_s18  ;;  %v1875_v45 = vlaneseq }
0x1847   :  { %951 = vrot.lane.b32.xlu1 %v949_v38, %s3721_s18  ;;  %v2529_v38 = vunpack.c.0.s8 %v2528_v57 }
0x184b   :  { %1165 = vrot.lane.b32.xlu1 %v1163_v26, %s3721_s18  ;;  %v3300_v26 = vld [vmem:[%s4648_s8] ss:$0 sm:$0xff] }
0x184f   :  { %1380 = vrot.lane.b32.xlu1 %v1378_v37, %s3721_s18  ;;  %v4355_v37 = vshrl.u32 %v1875_v45, 7 }
0x1851   :  { %v4365_v49 = vsub.s32 %v2529_v38, %v4355_v37 }
0x1853   :  { %1596 = vrot.lane.b32.xlu1 %v1594_v59, %s3721_s18 }
0x1877   :  { %v1756_v53 = vpop.permute.xlu0 %1755 }
0x1878   :  { %v1758_v54 = vadd.f32 %v1756_v53, %v1748_v61 }
0x187a   :  { %3648 = vtanh.f32 %v1758_v54 }
0x187b   :  { %v1781_v29 = vpop.permute.xlu0 %1780 }
0x187c   :  { %v1783_v3 = vmul.f32 %v1781_v29, %v3890_v19  ;;  %v956_v19 = vmul.f32 %v4041_v55, %v3865_v51 }
0x1887   :  { %v3649_v5 = vpop.eup %3648 }
0x1888   :  { %1761 = vrot.lane.b32.xlu0 %v3649_v5, %s3719_s6 }
0x188c   :  { %1785 = vrot.lane.b32.xlu0 %v1783_v3, %s3721_s18 }
0x1890   :  { %306 = vrot.lane.b32.xlu0 %v304_v60, %s3722_s19  ;;  %v4377_v60 = vsub.s32 0, %v4355_v37 }
0x1894   :  { %523 = vrot.lane.b32.xlu0 %v521_v13, %s3722_s19 }
0x1898   :  { %741 = vrot.lane.b32.xlu0 %v739_v58, %s3722_s19  ;;  %v4382_v58 = vld [vmem:[%s4650_s11] sm:$0x1f] }
0x189c   :  { %958 = vrot.lane.b32.xlu0 %v956_v19, %s3722_s19 }
0x18a0   :  { %1171 = vrot.lane.b32.xlu0 %v1169_v56, %s3722_s19 }
0x18a4   :  { %1386 = vrot.lane.b32.xlu0 %v1384_v46, %s3722_s19 }
0x18a5   :  { %v1735_v30 = vpop.permute.xlu1 %1734 }
0x18a6   :  { %v1737_v62 = vmul.f32 %v4258_v35, %v1735_v30  ;;  %v3521_v35 = vld [vmem:[%s4647_s7] sm:$0xff]  }
0x18a7   :  { %3468 = vmatpush3.bf16.msra.mxu1 %v3521_v35 }
0x18a8   :  { %1602 = vrot.lane.b32.xlu0 %v1600_v16, %s3722_s19  ;;  %v1765_v55 = vmul.f32 %v1737_v62, %v3865_v51 }
0x18a9   :  { %v1774_v18 = vpop.permute.xlu1 %1773 }
0x18aa   :  { %v1776_v1 = vadd.f32 %v1774_v18, %v1765_v55 }
0x18ac   :  { %v1789_v36 = vmul.f32 %v1776_v1, %v3865_v51 }
0x18ad   :  { %v300_v20 = vpop.permute.xlu1 %299 }
0x18ae   :  { %303 = vst.msk [vmem:[#allocation2] sm:$0x3] %vm302_vm2, %v300_v20  ;;  %1791 = vrot.lane.b32.xlu1 %v1789_v36, %s3721_s18 }
0x18b1   :  { %v517_v21 = vpop.permute.xlu1 %516 }
0x18b2   :  { %520 = vst.msk [vmem:[#allocation2] sm:$0xc] %vm519_vm3, %v517_v21 }
0x18b5   :  { %v735_v31 = vpop.permute.xlu1 %734 }
0x18b6   :  { %738 = vst.msk [vmem:[#allocation2] sm:$0x30] %vm737_vm4, %v735_v31 }
0x18b9   :  { %v952_v12 = vpop.permute.xlu1 %951 }
0x18ba   :  { %955 = vst.msk [vmem:[#allocation2] sm:$0xc0] %vm954_vm5, %v952_v12 }
0x18bd   :  { %v1166_v6 = vpop.permute.xlu1 %1165 }
0x18c1   :  { %v1381_v17 = vpop.permute.xlu1 %1380 }
0x18c5   :  { %v1597_v34 = vpop.permute.xlu1 %1596 }
0x18fa   :  { %v1762_v10 = vpop.permute.xlu0 %1761 }
0x18fb   :  { %v1764_v23 = vmul.f32 %v4264_v14, %v1762_v10 }
0x18fd   :  { %v1777_v7 = vmul.f32 %v1764_v23, %v3885_v15  ;;  %v2590_v23 = vsub.s32 2, %v4355_v37 }
0x18fe   :  { %v1786_v11 = vpop.permute.xlu0 %1785 }
0x18ff   :  { %v1788_v63 = vadd.f32 %v1786_v11, %v1777_v7 }
0x1901   :  { %v1795_v22 = vmul.f32 %v1788_v63, %v3885_v15 }
0x1902   :  { %v307_v47 = vpop.permute.xlu0 %306 }
0x1903   :  { %310 = vst.msk [vmem:[#allocation2 + $0x8] sm:$0xc0] %vm309_vm6, %v307_v47  ;;  %1797 = vrot.lane.b32.xlu0 %v1795_v22, %s3722_s19 }
0x1906   :  { %v524_v28 = vpop.permute.xlu0 %523 }
0x1907   :  { %527 = vst.msk [vmem:[#allocation2 + $0x8] sm:$0x30] %vm526_vm7, %v524_v28 }
0x1908   :  { %1599 = vst.msk [vmem:[#allocation2 + $0x8] sm:$0x30] %vm737_vm4, %v1597_v34  ;;  %vm1910_vm4 = vcmask 1044480  }
0x190a   :  { %v742_v14 = vpop.permute.xlu0 %741 }
0x190b   :  { %745 = vst.msk [vmem:[#allocation2 + $0x8] sm:$0xc] %vm744_vm8, %v742_v14 }
0x190c   :  { %1383 = vst.msk [vmem:[#allocation2 + $0x8] sm:$0xc] %vm519_vm3, %v1381_v17 }
0x190e   :  { %v959_v24 = vpop.permute.xlu0 %958 }
0x190f   :  { %962 = vst.msk [vmem:[#allocation2 + $0x8] sm:$0x3] %vm961_vm9, %v959_v24 }
0x1910   :  { %1168 = vst.msk [vmem:[#allocation2 + $0x8] sm:$0x3] %vm302_vm2, %v1166_v6  ;;  %v2597_v6 = vsub.s32 3, %v4355_v37  ;;  %vm2937_vm2 = vcmask 1041409  }
0x1912   :  { %v1172_v15 = vpop.permute.xlu0 %1171 }
0x1913   :  { %1174 = vst.msk [vmem:[#allocation2] sm:$0xc0] %vm309_vm6, %v1172_v15  ;;  %vm1893_vm6 = vcmask 39936  }
0x1916   :  { %v1387_v33 = vpop.permute.xlu0 %1386 }
0x1917   :  { %1389 = vst.msk [vmem:[#allocation2] sm:$0x30] %vm526_vm7, %v1387_v33 }
0x191a   :  { %v1603_v9 = vpop.permute.xlu0 %1602 }
0x191b   :  { %1605 = vst.msk [vmem:[#allocation2] sm:$0xc] %vm744_vm8, %v1603_v9  ;;  %v4404_v9 = vld [vmem:[%s4646_s1] sm:$0xff]  ;;  %vm1902_vm8 = vcmask 1045504  }
0x191c   :  { %vm2586_vm12 = vcmp.gt.f32.partialorder %v4404_v9, 0.0 }
0x1920   :  { %v1792_v52 = vpop.permute.xlu1 %1791 }
0x1921   :  { %1794 = vst.msk [vmem:[#allocation2 + $0x8] sm:$0xc0] %vm954_vm5, %v1792_v52 }
0x1928   :  { %v1802_v41 = vld [vmem:[#allocation2 + $0x8] sm:$0xff] }
0x1975   :  { %v1798_v32 = vpop.permute.xlu0 %1797 }
0x1976   :  { %1800 = vst.msk [vmem:[#allocation2] sm:$0x3] %vm961_vm9, %v1798_v32  ;;  %vm2438_vm9 = vcmask 33792  }
0x197d   :  { %v1801_v40 = vld [vmem:[#allocation2] sm:$0xff] }
0x197e   :  { %v1803_v43 = vpack.c.bf16 %v1802_v41, %v1801_v40  ;;  %v2606_v40 = vsel %vm2586_vm12, 1, %v3716_v4  ;;  %v4409_v41 = vand.u32 127, %v1875_v45  ;;  %vm2423_vm12 = vcmask 1041408  }
0x1980   :  { %3470 = vmatmul.mubr.msk.bf16.vlgmr.msra.gmra.mxu1 %vm1827_vm10, %v1803_v43  ;;  %v4413_v43 = vsub.s32 %v4409_v41, %v4355_v37  ;;  %vm3241_vm10 = vcmask 39942  }
0x1a40   :  { %v1865_v59 = vpop.f32.mrf.mxu1 }
0x1a41   :  { %v4362_v39 = vadd.f32 %v3300_v26, %v1865_v59 }
0x1a42   :  { %v3471_v50 = vpop.f32.mrf.mxu1 }
0x1a43   :  { %v4369_v61 = vadd.f32 %v4360_v48, %v4362_v39  ;;  %v2598_v7 = vrot.slane %v4362_v39, %v2597_v6  ;;  %v2591_v11 = vrot.slane %v4362_v39, %v2590_v23 }
0x1a44   :  { %v1868_v53 = vpop.f32.mrf.mxu1 }
0x1a45   :  { %v4371_v54 = vadd.f32 %v3300_v26, %v1868_v53  ;;  %v2533_v5 = vrot.slane %v4369_v61, %v4365_v49  ;;  %v2630_v59 = vrot.slane %v4369_v61, 6 }
0x1a46   :  { %v3472_v29 = vpop.f32.mrf.mxu1 }
0x1a47   :  { %v2541_v3 = vrot.slane %v2533_v5, %v4365_v49  ;;  %v2534_v13 = vcombine.high %v2533_v5, %v2533_v5 }
0x1a49   :  { %v2552_v19 = vrot.slane %v2541_v3, %v4377_v60  ;;  %v2548_v56 = vrot.slane %v2534_v13, %v4365_v49 }
0x1a4b   :  { %v2559_v46 = vadd.f32 %v2552_v19, %v4382_v58  ;;  %v2556_v30 = vrot.slane %v2548_v56, %v4377_v60 }
0x1a4d   :  { %v2562_v16 = vsel %vm2561_vm11, %v2559_v46, -inf  ;;  %v2560_v62 = vadd.f32 %v2556_v30, %v4382_v58 }
0x1a4e   :  { %2563 = vmax.xlane.f32.xlu1 %v2562_v16 }
0x1a4f   :  { %v2565_v55 = vsel %vm2561_vm11, %v2560_v62, -inf }
0x1a50   :  { %2566 = vmax.xlane.f32.xlu0 %v2565_v55 }
0x1ad7   :  { %v2564_v18 = vpop.xlane.xlu1 %2563 }
0x1ad8   :  { %v2568_v1 = vsub.f32 %v2559_v46, %v2564_v18 }
0x1ad9   :  { %v2567_v36 = vpop.xlane.xlu0 %2566 }
0x1ada   :  { %v2570_v20 = vmul.f32 1.442695, %v2568_v1  ;;  %v2569_v21 = vsub.f32 %v2560_v62, %v2567_v36 }
0x1adc   :  { %3650 = vpow2.f32 %v2570_v20  ;;  %v2572_v31 = vmul.f32 1.442695, %v2569_v21 }
0x1ade   :  { %3652 = vpow2.f32 %v2572_v31 }
0x1ae9   :  { %v3651_v12 = vpop.eup %3650 }
0x1aea   :  { %v2574_v2 = vsel %vm2561_vm11, %v3651_v12, 0.0 }
0x1aeb   :  { %v3653_v35 = vpop.eup %3652  ;;  %2575 = vadd.xlane.f32.xlu0 %v2574_v2 }
0x1aec   :  { %v2577_v10 = vsel %vm2561_vm11, %v3653_v35, 0.0 }
0x1aed   :  { %2578 = vadd.xlane.f32.xlu1 %v2577_v10 }
0x1afe   :  { %2600 = vbcast.lane.b32.xlu1 %v2598_v7, 256 }
0x1b01   :  { %2593 = vbcast.lane.b32.xlu0 %v2591_v11, 256 }
0x1b74   :  { %v2576_v63 = vpop.xlane.xlu0 %2575 }
0x1b75   :  { %3654 = vlog2.f32 %v2576_v63  ;;  %v2703_v63 = vsub.s32 5, %v4355_v37 }
0x1b76   :  { %v2579_v17 = vpop.xlane.xlu1 %2578 }
0x1b77   :  { %3656 = vlog2.f32 %v2579_v17  ;;  %v2704_v17 = vrot.slane %v4362_v39, %v2703_v63 }
0x1b78   :  { %v2594_v24 = vpop.permute.xlu0 %2593 }
0x1b7a   :  { %v2601_v52 = vpop.permute.xlu1 %2600 }
0x1b82   :  { %v3655_v22 = vpop.eup %3654 }
0x1b83   :  { %v2581_v47 = vmul.f32 0.6931472, %v3655_v22 }
0x1b84   :  { %v3657_v28 = vpop.eup %3656 }
0x1b85   :  { %v2583_v34 = vmul.f32 0.6931472, %v3657_v28  ;;  %v2584_v14 = vadd.f32 %v2581_v47, %v2564_v18  ;;  %v2696_v18 = vsub.s32 4, %v4355_v37 }
0x1b87   :  { %v2604_v15 = vadd.f32 %v2594_v24, %v2584_v14  ;;  %v2585_v33 = vadd.f32 %v2583_v34, %v2567_v36  ;;  %v2697_v1 = vrot.slane %v4362_v39, %v2696_v18 }
0x1b89   :  { %v2605_v32 = vadd.f32 %v2601_v52, %v2585_v33  ;;  %2614 = vperm.xlu1 %3514, %v2604_v15  }
0x1b8b   :  { %2617 = vperm.xlu0 %3515, %v2605_v32  }
0x1b8d   :  { %2608 = vperm.xlu1 %3514, %v2606_v40  }
0x1c04   :  { %v2615_v44 = vpop.permute.xlu1 %2614 }
0x1c05   :  { %v2622_v38 = vrot.slane %v2615_v44, %v4413_v43 }
0x1c06   :  { %v2618_v57 = vpop.permute.xlu0 %2617 }
0x1c07   :  { %v2626_v26 = vrot.slane %v2618_v57, %v4413_v43 }
0x1c08   :  { %v4418_v50 = vpop.permute.xlu1 %2608 }
0x1c09   :  { %vm2610_vm14 = vcmp.eq.s32.totalorder %v4418_v50, 1  ;;  %v2628_v45 = vsel %vm2627_vm13, %v2626_v26, %v2622_v38 }
0x1c0a   :  { %v2632_v53 = vsel %vm2610_vm14, %v2628_v45, %v2630_v59 }
0x1c0b   :  { %v2640_v5 = vrot.slane %v2632_v53, %v4365_v49  ;;  %v2731_v45 = vrot.slane %v2632_v53, 6 }
0x1c0d   :  { %v2641_v29 = vcombine.high %v2640_v5, %v2640_v5  ;;  %v2648_v3 = vrot.slane %v2640_v5, %v4365_v49 }
0x1c0f   :  { %v2655_v13 = vrot.slane %v2641_v29, %v4365_v49  ;;  %v2656_v19 = vcombine.high %v2648_v3, %v2648_v3 }
0x1c11   :  { %v2661_v56 = vrot.slane %v2656_v19, %v4377_v60  ;;  %v2657_v61 = vcombine.high %v2655_v13, %v2655_v13 }
0x1c13   :  { %v2668_v46 = vadd.f32 %v2661_v56, %v4382_v58  ;;  %v2665_v30 = vrot.slane %v2657_v61, %v4377_v60 }
0x1c15   :  { %v2670_v16 = vsel %vm2561_vm11, %v2668_v46, -inf  ;;  %v2669_v62 = vadd.f32 %v2665_v30, %v4382_v58 }
0x1c16   :  { %2671 = vmax.xlane.f32.xlu0 %v2670_v16 }
0x1c17   :  { %v2673_v55 = vsel %vm2561_vm11, %v2669_v62, -inf }
0x1c18   :  { %2674 = vmax.xlane.f32.xlu1 %v2673_v55 }
0x1c29   :  { %2699 = vbcast.lane.b32.xlu1 %v2697_v1, 256  ;;  %v2796_v1 = vsub.s32 6, %v4355_v37 }
0x1c9f   :  { %v2672_v36 = vpop.xlane.xlu0 %2671 }
0x1ca0   :  { %v2676_v20 = vsub.f32 %v2668_v46, %v2672_v36 }
0x1ca1   :  { %v2675_v21 = vpop.xlane.xlu1 %2674 }
0x1ca2   :  { %v2678_v31 = vmul.f32 1.442695, %v2676_v20  ;;  %v2677_v12 = vsub.f32 %v2669_v62, %v2675_v21 }
0x1ca4   :  { %3658 = vpow2.f32 %v2678_v31  ;;  %v2680_v2 = vmul.f32 1.442695, %v2677_v12 }
0x1ca5   :  { %v2700_v15 = vpop.permute.xlu1 %2699 }
0x1ca6   :  { %3660 = vpow2.f32 %v2680_v2 }
0x1cb1   :  { %v3659_v35 = vpop.eup %3658 }
0x1cb2   :  { %v2682_v10 = vsel %vm2561_vm11, %v3659_v35, 0.0 }
0x1cb3   :  { %v3661_v7 = vpop.eup %3660  ;;  %2683 = vadd.xlane.f32.xlu0 %v2682_v10 }
0x1cb4   :  { %v2685_v11 = vsel %vm2561_vm11, %v3661_v7, 0.0 }
0x1cb7   :  { %2686 = vadd.xlane.f32.xlu0 %v2685_v11 }
0x1ccd   :  { %2706 = vbcast.lane.b32.xlu0 %v2704_v17, 256 }
0x1d3c   :  { %v2684_v22 = vpop.xlane.xlu0 %2683 }
0x1d3d   :  { %3662 = vlog2.f32 %v2684_v22  ;;  %v2803_v22 = vsub.s32 7, %v4355_v37 }
0x1d40   :  { %v2687_v47 = vpop.xlane.xlu0 %2686 }
0x1d41   :  { %3664 = vlog2.f32 %v2687_v47  ;;  %v2804_v47 = vrot.slane %v4362_v39, %v2803_v22 }
0x1d44   :  { %v2707_v40 = vpop.permute.xlu0 %2706 }
0x1d4a   :  { %v3663_v28 = vpop.eup %3662 }
0x1d4b   :  { %v2689_v34 = vmul.f32 0.6931472, %v3663_v28 }
0x1d4d   :  { %v2692_v14 = vadd.f32 %v2689_v34, %v2672_v36  ;;  %v2797_v36 = vrot.slane %v4362_v39, %v2796_v1 }
0x1d4e   :  { %v3665_v24 = vpop.eup %3664 }
0x1d4f   :  { %v2691_v33 = vmul.f32 0.6931472, %v3665_v24  ;;  %v2710_v52 = vadd.f32 %v2700_v15, %v2692_v14 }
0x1d51   :  { %v2693_v32 = vadd.f32 %v2691_v33, %v2675_v21  ;;  %2715 = vperm.xlu1 %3514, %v2710_v52  }
0x1d53   :  { %v2711_v44 = vadd.f32 %v2707_v40, %v2693_v32 }
0x1d55   :  { %2718 = vperm.xlu1 %3514, %v2711_v44  }
0x1dcc   :  { %v2716_v57 = vpop.permute.xlu1 %2715 }
0x1dcd   :  { %v2723_v26 = vrot.slane %v2716_v57, %v4413_v43 }
0x1dd0   :  { %v2719_v38 = vpop.permute.xlu1 %2718 }
0x1dd1   :  { %v2727_v59 = vrot.slane %v2719_v38, %v4413_v43 }
0x1dd3   :  { %v2729_v5 = vsel %vm2728_vm15, %v2727_v59, %v2723_v26 }
0x1dd4   :  { %v2733_v29 = vsel %vm2610_vm14, %v2729_v5, %v2731_v45 }
0x1dd5   :  { %v2735_v3 = vcombine.high %v2733_v29, %v2733_v29 }
0x1dd7   :  { %v2742_v13 = vrot.slane %v2735_v3, %v4365_v49  ;;  %v2831_v3 = vrot.slane %v2733_v29, 6 }
0x1dd9   :  { %v2750_v19 = vrot.slane %v2742_v13, %v4365_v49  ;;  %v2743_v56 = vcombine.high %v2742_v13, %v2742_v13 }
0x1ddb   :  { %v2761_v61 = vrot.slane %v2750_v19, %v4377_v60  ;;  %v2757_v46 = vrot.slane %v2743_v56, %v4365_v49 }
0x1ddd   :  { %v2768_v30 = vadd.f32 %v2761_v61, %v4382_v58  ;;  %v2765_v16 = vrot.slane %v2757_v46, %v4377_v60 }
0x1ddf   :  { %v2770_v53 = vsel %vm2561_vm11, %v2768_v30, -inf  ;;  %v2769_v62 = vadd.f32 %v2765_v16, %v4382_v58 }
0x1de0   :  { %2771 = vmax.xlane.f32.xlu0 %v2770_v53 }
0x1de1   :  { %v2773_v55 = vsel %vm2561_vm11, %v2769_v62, -inf }
0x1de2   :  { %2774 = vmax.xlane.f32.xlu1 %v2773_v55 }
0x1df3   :  { %2799 = vbcast.lane.b32.xlu1 %v2797_v36, 256 }
0x1e69   :  { %v2772_v20 = vpop.xlane.xlu0 %2771 }
0x1e6a   :  { %v2776_v21 = vsub.f32 %v2768_v30, %v2772_v20 }
0x1e6b   :  { %v2775_v31 = vpop.xlane.xlu1 %2774 }
0x1e6c   :  { %v2778_v12 = vmul.f32 1.442695, %v2776_v21  ;;  %v2777_v2 = vsub.f32 %v2769_v62, %v2775_v31 }
0x1e6e   :  { %3666 = vpow2.f32 %v2778_v12  ;;  %v2780_v35 = vmul.f32 1.442695, %v2777_v2 }
0x1e6f   :  { %v2800_v52 = vpop.permute.xlu1 %2799 }
0x1e70   :  { %3668 = vpow2.f32 %v2780_v35 }
0x1e7b   :  { %v3667_v10 = vpop.eup %3666 }
0x1e7c   :  { %v2782_v7 = vsel %vm2561_vm11, %v3667_v10, 0.0 }
0x1e7d   :  { %v3669_v11 = vpop.eup %3668  ;;  %2783 = vadd.xlane.f32.xlu0 %v2782_v7 }
0x1e7e   :  { %v2785_v17 = vsel %vm2561_vm11, %v3669_v11, 0.0 }
0x1e81   :  { %2786 = vadd.xlane.f32.xlu0 %v2785_v17 }
0x1e97   :  { %2806 = vbcast.lane.b32.xlu0 %v2804_v47, 256 }
0x1f06   :  { %v2784_v28 = vpop.xlane.xlu0 %2783 }
0x1f07   :  { %3670 = vlog2.f32 %v2784_v28 }
0x1f0a   :  { %v2787_v34 = vpop.xlane.xlu0 %2786 }
0x1f0b   :  { %3672 = vlog2.f32 %v2787_v34 }
0x1f0e   :  { %v2807_v57 = vpop.permute.xlu0 %2806 }
0x1f14   :  { %v3671_v14 = vpop.eup %3670 }
0x1f15   :  { %v2789_v24 = vmul.f32 0.6931472, %v3671_v14  ;;  %v2907_v14 = vsub.s32 1, %v4355_v37 }
0x1f17   :  { %v2792_v15 = vadd.f32 %v2789_v24, %v2772_v20  ;;  %v2908_v24 = vrot.slane %v4371_v54, %v2907_v14 }
0x1f18   :  { %v3673_v33 = vpop.eup %3672 }
0x1f19   :  { %v2791_v32 = vmul.f32 0.6931472, %v3673_v33  ;;  %v2810_v40 = vadd.f32 %v2800_v52, %v2792_v15  ;;  %v4494_v15 = vld [vmem:[%s4646_s1 + $0x8] sm:$0xff] }
0x1f1a   :  { %vm2896_vm1 = vcmp.gt.f32.partialorder %v4494_v15, 0.0 }
0x1f1b   :  { %v2793_v44 = vadd.f32 %v2791_v32, %v2775_v31  ;;  %2815 = vperm.xlu1 %3514, %v2810_v40   ;;  %v2901_v31 = vrot.slane %v4371_v54, %v4377_v60  ;;  %v2916_v33 = vsel %vm2896_vm1, 1, %v3716_v4 }
0x1f1d   :  { %v2811_v38 = vadd.f32 %v2807_v57, %v2793_v44 }
0x1f1f   :  { %2818 = vperm.xlu1 %3514, %v2811_v38  }
0x1f96   :  { %v2816_v26 = vpop.permute.xlu1 %2815 }
0x1f97   :  { %v2823_v45 = vrot.slane %v2816_v26, %v4413_v43 }
0x1f9a   :  { %v2819_v59 = vpop.permute.xlu1 %2818 }
0x1f9b   :  { %v2827_v5 = vrot.slane %v2819_v59, %v4413_v43 }
0x1f9d   :  { %v2829_v13 = vsel %vm2828_vm0, %v2827_v5, %v2823_v45 }
0x1f9e   :  { %v4472_v19 = vsel %vm2610_vm14, %v2829_v13, %v2831_v3 }
0x1f9f   :  { %v2835_v56 = vcombine.high %v4472_v19, %v4472_v19 }
0x1fa1   :  { %v2842_v61 = vrot.slane %v2835_v56, %v4365_v49 }
0x1fa3   :  { %v2850_v46 = vrot.slane %v2842_v61, %v4365_v49  ;;  %v2843_v30 = vcombine.high %v2842_v61, %v2842_v61 }
0x1fa5   :  { %v2858_v16 = vcombine.high %v2850_v46, %v2850_v46  ;;  %v2857_v53 = vrot.slane %v2843_v30, %v4365_v49 }
0x1fa7   :  { %v2863_v62 = vrot.slane %v2858_v16, %v4377_v60  ;;  %v2859_v29 = vcombine.high %v2857_v53, %v2857_v53  ;;  %v2940_v16 = vrot.slane %v4472_v19, 6 }
0x1fa9   :  { %v2870_v55 = vadd.f32 %v2863_v62, %v4382_v58  ;;  %v2867_v50 = vrot.slane %v2859_v29, %v4377_v60 }
0x1fab   :  { %v2872_v36 = vsel %vm2561_vm11, %v2870_v55, -inf  ;;  %v2871_v20 = vadd.f32 %v2867_v50, %v4382_v58 }
0x1fac   :  { %2873 = vmax.xlane.f32.xlu0 %v2872_v36 }
0x1fad   :  { %v2875_v21 = vsel %vm2561_vm11, %v2871_v20, -inf }
0x1fae   :  { %2876 = vmax.xlane.f32.xlu1 %v2875_v21 }
0x1fbf   :  { %2903 = vbcast.lane.b32.xlu1 %v2901_v31, 256 }
0x2035   :  { %v2874_v12 = vpop.xlane.xlu0 %2873 }
0x2036   :  { %v2878_v2 = vsub.f32 %v2870_v55, %v2874_v12 }
0x2037   :  { %v2877_v35 = vpop.xlane.xlu1 %2876 }
0x2038   :  { %v2880_v10 = vmul.f32 1.442695, %v2878_v2  ;;  %v2879_v7 = vsub.f32 %v2871_v20, %v2877_v35 }
0x203a   :  { %3674 = vpow2.f32 %v2880_v10  ;;  %v2882_v11 = vmul.f32 1.442695, %v2879_v7 }
0x203b   :  { %v2904_v26 = vpop.permute.xlu1 %2903 }
0x203c   :  { %3676 = vpow2.f32 %v2882_v11 }
0x2047   :  { %v3675_v17 = vpop.eup %3674 }
0x2048   :  { %v2884_v47 = vsel %vm2561_vm11, %v3675_v17, 0.0 }
0x2049   :  { %v3677_v28 = vpop.eup %3676  ;;  %2885 = vadd.xlane.f32.xlu0 %v2884_v47 }
0x204a   :  { %v2887_v34 = vsel %vm2561_vm11, %v3677_v28, 0.0 }
0x204d   :  { %2888 = vadd.xlane.f32.xlu0 %v2887_v34 }
0x2063   :  { %2910 = vbcast.lane.b32.xlu0 %v2908_v24, 256 }
0x2067   :  { %2918 = vperm.xlu0 %3515, %v2916_v33   ;;  %v3012_v33 = vrot.slane %v4371_v54, %v2597_v6 }
0x20d2   :  { %v2886_v52 = vpop.xlane.xlu0 %2885 }
0x20d3   :  { %3678 = vlog2.f32 %v2886_v52  ;;  %v3005_v52 = vrot.slane %v4371_v54, %v2590_v23 }
0x20d6   :  { %v2889_v32 = vpop.xlane.xlu0 %2888 }
0x20d7   :  { %3680 = vlog2.f32 %v2889_v32 }
0x20da   :  { %v2911_v3 = vpop.permute.xlu0 %2910 }
0x20e0   :  { %v3679_v40 = vpop.eup %3678 }
0x20e1   :  { %v2891_v44 = vmul.f32 0.6931472, %v3679_v40 }
0x20e2   :  { %v4498_v61 = vpop.permute.xlu0 %2918 }
0x20e3   :  { %v2894_v57 = vadd.f32 %v2891_v44, %v2874_v12  ;;  %vm2920_vm3 = vcmp.eq.s32.totalorder %v4498_v61, 1 }
0x20e4   :  { %v3681_v38 = vpop.eup %3680 }
0x20e5   :  { %v2893_v59 = vmul.f32 0.6931472, %v3681_v38  ;;  %v2914_v45 = vadd.f32 %v2904_v26, %v2894_v57 }
0x20e7   :  { %v2895_v5 = vadd.f32 %v2893_v59, %v2877_v35  ;;  %2924 = vperm.xlu1 %3514, %v2914_v45  }
0x20e9   :  { %v2915_v13 = vadd.f32 %v2911_v3, %v2895_v5 }
0x20eb   :  { %2927 = vperm.xlu1 %3514, %v2915_v13  }
0x2162   :  { %v2925_v56 = vpop.permute.xlu1 %2924 }
0x2163   :  { %v2932_v46 = vrot.slane %v2925_v56, %v4413_v43 }
0x2166   :  { %v2928_v4 = vpop.permute.xlu1 %2927 }
0x2167   :  { %v2936_v30 = vrot.slane %v2928_v4, %v4413_v43 }
0x2169   :  { %v2938_v53 = vsel %vm2937_vm2, %v2936_v30, %v2932_v46 }
0x216a   :  { %v2942_v62 = vsel %vm2920_vm3, %v2938_v53, %v2940_v16 }
0x216b   :  { %v2950_v29 = vrot.slane %v2942_v62, %v4365_v49  ;;  %v3038_v30 = vrot.slane %v2942_v62, 6 }
0x216d   :  { %v2958_v55 = vrot.slane %v2950_v29, %v4365_v49  ;;  %v2951_v50 = vcombine.high %v2950_v29, %v2950_v29 }
0x216f   :  { %v2969_v36 = vrot.slane %v2958_v55, %v4377_v60  ;;  %v2965_v20 = vrot.slane %v2951_v50, %v4365_v49 }
0x2171   :  { %v2976_v21 = vadd.f32 %v2969_v36, %v4382_v58  ;;  %v2973_v31 = vrot.slane %v2965_v20, %v4377_v60 }
0x2173   :  { %v2978_v19 = vsel %vm2561_vm11, %v2976_v21, -inf  ;;  %v2977_v12 = vadd.f32 %v2973_v31, %v4382_v58 }
0x2174   :  { %2979 = vmax.xlane.f32.xlu1 %v2978_v19 }
0x2175   :  { %v2981_v2 = vsel %vm2561_vm11, %v2977_v12, -inf }
0x2176   :  { %2982 = vmax.xlane.f32.xlu0 %v2981_v2 }
0x21fd   :  { %v2980_v35 = vpop.xlane.xlu1 %2979 }
0x21fe   :  { %v2984_v10 = vsub.f32 %v2976_v21, %v2980_v35 }
0x21ff   :  { %v2983_v7 = vpop.xlane.xlu0 %2982 }
0x2200   :  { %v2986_v11 = vmul.f32 1.442695, %v2984_v10  ;;  %v2985_v17 = vsub.f32 %v2977_v12, %v2983_v7 }
0x2202   :  { %3682 = vpow2.f32 %v2986_v11  ;;  %v2988_v47 = vmul.f32 1.442695, %v2985_v17 }
0x2204   :  { %3684 = vpow2.f32 %v2988_v47 }
0x220f   :  { %v3683_v28 = vpop.eup %3682 }
0x2210   :  { %v2990_v34 = vsel %vm2561_vm11, %v3683_v28, 0.0 }
0x2211   :  { %v3685_v14 = vpop.eup %3684  ;;  %2991 = vadd.xlane.f32.xlu0 %v2990_v34 }
0x2212   :  { %v2993_v24 = vsel %vm2561_vm11, %v3685_v14, 0.0 }
0x2213   :  { %2994 = vadd.xlane.f32.xlu1 %v2993_v24 }
0x2224   :  { %3014 = vbcast.lane.b32.xlu1 %v3012_v33, 256 }
0x2227   :  { %3007 = vbcast.lane.b32.xlu0 %v3005_v52, 256  ;;  %v3112_v52 = vrot.slane %v4371_v54, %v2703_v63 }
0x229a   :  { %v2992_v32 = vpop.xlane.xlu0 %2991 }
0x229b   :  { %3686 = vlog2.f32 %v2992_v32  ;;  %v3105_v32 = vrot.slane %v4371_v54, %v2696_v18 }
0x229c   :  { %v2995_v40 = vpop.xlane.xlu1 %2994 }
0x229d   :  { %3688 = vlog2.f32 %v2995_v40 }
0x229e   :  { %v3008_v45 = vpop.permute.xlu0 %3007 }
0x22a0   :  { %v3015_v13 = vpop.permute.xlu1 %3014 }
0x22a8   :  { %v3687_v44 = vpop.eup %3686 }
0x22a9   :  { %v2997_v57 = vmul.f32 0.6931472, %v3687_v44 }
0x22aa   :  { %v3689_v38 = vpop.eup %3688 }
0x22ab   :  { %v2999_v26 = vmul.f32 0.6931472, %v3689_v38  ;;  %v3000_v59 = vadd.f32 %v2997_v57, %v2980_v35 }
0x22ad   :  { %v3018_v5 = vadd.f32 %v3008_v45, %v3000_v59  ;;  %v3001_v3 = vadd.f32 %v2999_v26, %v2983_v7 }
0x22af   :  { %v3019_v6 = vadd.f32 %v3015_v13, %v3001_v3  ;;  %3023 = vperm.xlu1 %3514, %v3018_v5  }
0x22b1   :  { %3026 = vperm.xlu0 %3515, %v3019_v6  }
0x232a   :  { %v3024_v56 = vpop.permute.xlu1 %3023 }
0x232b   :  { %v3031_v23 = vrot.slane %v3024_v56, %v4413_v43 }
0x232c   :  { %v3027_v4 = vpop.permute.xlu0 %3026 }
0x232d   :  { %v3035_v46 = vrot.slane %v3027_v4, %v4413_v43 }
0x232f   :  { %v3036_v16 = vsel %vm2627_vm13, %v3035_v46, %v3031_v23  ;;  %vm3258_vm13 = vcmask 1024  }
0x2330   :  { %v3040_v53 = vsel %vm2920_vm3, %v3036_v16, %v3038_v30 }
0x2331   :  { %v3048_v29 = vrot.slane %v3040_v53, %v4365_v49  ;;  %v3138_v46 = vrot.slane %v3040_v53, 6 }
0x2333   :  { %v3056_v55 = vrot.slane %v3048_v29, %v4365_v49  ;;  %v3049_v50 = vcombine.high %v3048_v29, %v3048_v29 }
0x2335   :  { %v3064_v36 = vcombine.high %v3056_v55, %v3056_v55  ;;  %v3063_v20 = vrot.slane %v3049_v50, %v4365_v49 }
0x2337   :  { %v3069_v21 = vrot.slane %v3064_v36, %v4377_v60  ;;  %v3065_v31 = vcombine.high %v3063_v20, %v3063_v20 }
0x2339   :  { %v3076_v19 = vadd.f32 %v3069_v21, %v4382_v58  ;;  %v3073_v62 = vrot.slane %v3065_v31, %v4377_v60 }
0x233b   :  { %v3078_v12 = vsel %vm2561_vm11, %v3076_v19, -inf  ;;  %v3077_v2 = vadd.f32 %v3073_v62, %v4382_v58 }
0x233c   :  { %3079 = vmax.xlane.f32.xlu1 %v3078_v12 }
0x233d   :  { %v3081_v35 = vsel %vm2561_vm11, %v3077_v2, -inf }
0x233e   :  { %3082 = vmax.xlane.f32.xlu0 %v3081_v35 }
0x23c5   :  { %v3080_v10 = vpop.xlane.xlu1 %3079 }
0x23c6   :  { %v3084_v7 = vsub.f32 %v3076_v19, %v3080_v10 }
0x23c7   :  { %v3083_v11 = vpop.xlane.xlu0 %3082 }
0x23c8   :  { %v3086_v17 = vmul.f32 1.442695, %v3084_v7  ;;  %v3085_v47 = vsub.f32 %v3077_v2, %v3083_v11  ;;  %v1878_v2 = vld [vmem:[%s4651_s2 + $0x8] sm:$0xff] }
0x23ca   :  { %3690 = vpow2.f32 %v3086_v17  ;;  %v3088_v28 = vmul.f32 1.442695, %v3085_v47 }
0x23cc   :  { %3692 = vpow2.f32 %v3088_v28 }
0x23d7   :  { %v3691_v34 = vpop.eup %3690 }
0x23d8   :  { %v3090_v14 = vsel %vm2561_vm11, %v3691_v34, 0.0 }
0x23d9   :  { %v3693_v24 = vpop.eup %3692  ;;  %3091 = vadd.xlane.f32.xlu0 %v3090_v14 }
0x23da   :  { %v3093_v33 = vsel %vm2561_vm11, %v3693_v24, 0.0 }
0x23db   :  { %3094 = vadd.xlane.f32.xlu1 %v3093_v33 }
0x23ec   :  { %3114 = vbcast.lane.b32.xlu1 %v3112_v52, 256 }
0x23ef   :  { %3107 = vbcast.lane.b32.xlu0 %v3105_v32, 256 }
0x2462   :  { %v3092_v40 = vpop.xlane.xlu0 %3091 }
0x2463   :  { %3694 = vlog2.f32 %v3092_v40 }
0x2464   :  { %v3095_v44 = vpop.xlane.xlu1 %3094 }
0x2465   :  { %3696 = vlog2.f32 %v3095_v44 }
0x2466   :  { %v3108_v5 = vpop.permute.xlu0 %3107 }
0x2468   :  { %v3115_v6 = vpop.permute.xlu1 %3114 }
0x2470   :  { %v3695_v57 = vpop.eup %3694 }
0x2471   :  { %v3097_v38 = vmul.f32 0.6931472, %v3695_v57 }
0x2472   :  { %v3697_v26 = vpop.eup %3696 }
0x2473   :  { %v3099_v59 = vmul.f32 0.6931472, %v3697_v26  ;;  %v3100_v45 = vadd.f32 %v3097_v38, %v3080_v10 }
0x2475   :  { %v3118_v3 = vadd.f32 %v3108_v5, %v3100_v45  ;;  %v3101_v13 = vadd.f32 %v3099_v59, %v3083_v11 }
0x2477   :  { %v3119_v63 = vadd.f32 %v3115_v6, %v3101_v13  ;;  %3123 = vperm.xlu1 %3514, %v3118_v3  }
0x2479   :  { %3126 = vperm.xlu0 %3515, %v3119_v63  }
0x24f2   :  { %v3124_v56 = vpop.permute.xlu1 %3123 }
0x24f3   :  { %v3131_v18 = vrot.slane %v3124_v56, %v4413_v43 }
0x24f4   :  { %v3127_v4 = vpop.permute.xlu0 %3126 }
0x24f5   :  { %v3135_v23 = vrot.slane %v3127_v4, %v4413_v43 }
0x24f7   :  { %v3136_v30 = vsel %vm2728_vm15, %v3135_v23, %v3131_v18 }
0x24f8   :  { %v4550_v16 = vsel %vm2920_vm3, %v3136_v30, %v3138_v46 }
0x24f9   :  { %v3142_v29 = vcombine.high %v4550_v16, %v4550_v16 }
0x24fb   :  { %v3149_v55 = vrot.slane %v3142_v29, %v4365_v49  ;;  %v3211_v29 = vrot.slane %v4371_v54, %v2803_v22  ;;  %v2464_v22 = vrot.slane %v271_v8, 2 }
0x24fd   :  { %v3157_v50 = vrot.slane %v3149_v55, %v4365_v49  ;;  %v3150_v36 = vcombine.high %v3149_v55, %v3149_v55  ;;  %v3204_v55 = vrot.slane %v4371_v54, %v2796_v1 }
0x24ff   :  { %v3168_v20 = vrot.slane %v3157_v50, %v4377_v60  ;;  %v3164_v21 = vrot.slane %v3150_v36, %v4365_v49  ;;  %v1912_v49 = vsel %vm1910_vm4, %v4382_v58, 0 }
0x2500   :  { %v1945_v35 = vand.u32 4294901760, %v1912_v49 }
0x2501   :  { %v3175_v53 = vadd.f32 %v3168_v20, %v4382_v58  ;;  %v3172_v31 = vrot.slane %v3164_v21, %v4377_v60  ;;  %v1877_v60 = vld [vmem:[%s4651_s2] sm:$0xff] }
0x2502   :  { %v2032_v10 = vsub.f32 %v1912_v49, %v1945_v35  ;;  %3473 = vmatprep.subr.mxu0 %v1945_v35  ;;  %v2481_v49 = vrot.slane %v287_v27, 2 }
0x2503   :  { %v3177_v19 = vsel %vm2561_vm11, %v3175_v53, -inf  ;;  %v3176_v62 = vadd.f32 %v3172_v31, %v4382_v58  ;;  %3474 = vmatpush3.msra.mxu0 %v1945_v35 }
0x2504   :  { %3178 = vmax.xlane.f32.xlu1 %v3177_v19  ;;  %v2033_v7 = vand.u32 4294901760, %v2032_v10  ;;  %3483 = vmatprep.subr.mxu0 %v2032_v10 }
0x2505   :  { %v3180_v12 = vsel %vm2561_vm11, %v3176_v62, -inf }
0x2506   :  { %3181 = vmax.xlane.f32.xlu0 %v3180_v12  ;;  %v2034_v11 = vsub.f32 %v2032_v10, %v2033_v7 }
0x2508   :  { %v2035_v17 = vand.u32 4294901760, %v2034_v11 }
0x250a   :  { %3478 = vmatprep.subr.mxu1 %v2035_v17 }
0x250b   :  { %3479 = vmatpush3.msra.mxu1 %v2035_v17 }
0x250c   :  { %3488 = vmatprep.subr.mxu1 %v1945_v35 }
0x2515   :  { %1883 = vperm.xlu1 %3514, %v1878_v2  }
0x251c   :  { %1880 = vperm.xlu0 %3515, %v1877_v60   ;;  %v2494_v60 = vmul.f32 %v4494_v15, %v2481_v49 }
0x258d   :  { %v4570_v47 = vpop.xlane.xlu1 %3178 }
0x258e   :  { %v3183_v58 = vsub.f32 %v3175_v53, %v4570_v47 }
0x258f   :  { %v4573_v28 = vpop.xlane.xlu0 %3181 }
0x2590   :  { %v3185_v34 = vmul.f32 1.442695, %v3183_v58  ;;  %v3184_v14 = vsub.f32 %v3176_v62, %v4573_v28 }
0x2591   :  { %v1884_v24 = vpop.permute.xlu1 %1883 }
0x2592   :  { %3698 = vpow2.f32 %v3185_v34  ;;  %v3187_v33 = vmul.f32 1.442695, %v3184_v14  ;;  %vm1886_vm5 = vcmp.eq.s32.totalorder %v4409_v41, %v1884_v24 }
0x2593   :  { %v4578_v52 = vsel %vm1886_vm5, 1.0, %v3714_v0 }
0x2594   :  { %3700 = vpow2.f32 %v3187_v33  ;;  %v1904_v32 = vrot.slane %v4578_v52, 2 }
0x2596   :  { %v1908_v40 = vsel %vm1893_vm6, %v1904_v32, 0 }
0x2597   :  { %v1881_v44 = vpop.permute.xlu0 %1880  ;;  %v1990_v57 = vand.u32 4294901760, %v1908_v40 }
0x2598   :  { %vm1885_vm7 = vcmp.eq.s32.totalorder %v4409_v41, %v1881_v44 }
0x2599   :  { %v4584_v38 = vsel %vm1885_vm7, 1.0, %v3714_v0  ;;  %v1991_v59 = vsub.f32 %v1908_v40, %v1990_v57 }
0x259a   :  { %v1903_v26 = vrot.slane %v4584_v38, 2  ;;  %v2437_v58 = vmul.f32 %v4360_v48, %v4584_v38 }
0x259b   :  { %v1992_v6 = vand.u32 4294901760, %v1991_v59 }
0x259c   :  { %v1905_v45 = vsel %vm1902_vm8, %v1903_v26, %v1904_v32  ;;  %v2439_v33 = vsel %vm2438_vm9, %v2437_v58, 0.0 }
0x259d   :  { %v1906_v5 = vsel %vm1893_vm6, %v1905_v45, 0  ;;  %v1993_v18 = vsub.f32 %v1991_v59, %v1992_v6 }
0x259e   :  { %v1980_v3 = vand.u32 4294901760, %v1906_v5 }
0x259f   :  { %v3699_v13 = vpop.eup %3698  ;;  %v1994_v30 = vand.u32 4294901760, %v1993_v18 }
0x25a0   :  { %3480 = vmatprep.mubr.f32.mxu1 %v1980_v3  ;;  %v3189_v63 = vsel %vm2561_vm11, %v3699_v13, 0.0  ;;  %v1981_v56 = vsub.f32 %v1906_v5, %v1980_v3 }
0x25a1   :  { %v3701_v4 = vpop.eup %3700  ;;  %3190 = vadd.xlane.f32.xlu1 %v3189_v63  ;;  %3481 = vmatmul.mubr.f32.vlgmr.msra.gmra.mxu1 %v1990_v57  ;;  %v3237_v63 = vrot.slane %v4550_v16, 6 }
0x25a2   :  { %v3192_v0 = vsel %vm2561_vm11, %v3701_v4, 0.0  ;;  %3489 = vmatpush3.msra.mxu1 %v1945_v35  ;;  %v1982_v41 = vand.u32 4294901760, %v1981_v56  ;;  %vm2408_vm11 = vcmask 37888  }
0x25a3   :  { %3193 = vadd.xlane.f32.xlu0 %v3192_v0  ;;  %3498 = vmatprep.subr.mxu1 %v1945_v35 }
0x25a4   :  { %3490 = vmatprep.mubr.f32.mxu1 %v1982_v41  ;;  %v1983_v23 = vsub.f32 %v1981_v56, %v1982_v41 }
0x25a5   :  { %3491 = vmatmul.mubr.f32.vlgmr.msra.gmra.mxu1 %v1992_v6 }
0x25a6   :  { %3500 = vmatprep.mubr.f32.mxu1 %v1980_v3  ;;  %v1984_v46 = vand.u32 4294901760, %v1983_v23  ;;  %3499 = vmatpush3.msra.mxu1 %v1945_v35  ;;  %v2466_v35 = vmul.f32 %v4404_v9, %v2464_v22 }
0x25a8   :  { %3475 = vmatprep.mubr.f32.mxu0 %v1984_v46 }
0x25a9   :  { %3476 = vmatmul.mubr.f32.vlgmr.msra.gmra.mxu0 %v1994_v30  ;;  %3501 = vmatmul.mubr.f32.vlgmr.msra.gmra.mxu1 %v1990_v57 }
0x25aa   :  { %3485 = vmatprep.mubr.f32.mxu0 %v1981_v56  ;;  %3484 = vmatpush3.msra.mxu0 %v2032_v10  ;;  %v2483_v10 = vmul.f32 %v4404_v9, %v2481_v49  ;;  %v3307_v56 = vld [vmem:[%s4652_s10] ss:$0 sm:$0xff] }
0x25ab   :  { %3493 = vmatprep.subr.mxu0 %v2033_v7 }
0x25ad   :  { %3486 = vmatmul.mubr.f32.vlgmr.msra.gmra.mxu0 %v1991_v59 }
0x25ae   :  { %3495 = vmatprep.mubr.f32.mxu0 %v1980_v3  ;;  %3494 = vmatpush3.msra.mxu0 %v2033_v7  ;;  %v1891_v7 = vmul.f32 %v4584_v38, %v4362_v39 }
0x25b0   :  { %v1894_v27 = vsel %vm1893_vm6, %v1891_v7, 0.0 }
0x25b1   :  { %3496 = vmatmul.mubr.f32.vlgmr.msra.gmra.mxu0 %v1990_v57 }
0x25b2   :  { %3213 = vbcast.lane.b32.xlu1 %v3211_v29, 256 }
0x25b9   :  { %3206 = vbcast.lane.b32.xlu0 %v3204_v55, 256  ;;  %v1892_v55 = vmul.f32 %v4578_v52, %v4371_v54  ;;  %v2509_v54 = vmul.f32 %v4578_v52, %v3865_v51 }
0x262a   :  { %v3191_v50 = vpop.xlane.xlu1 %3190 }
0x262b   :  { %3702 = vlog2.f32 %v3191_v50 }
0x262c   :  { %v3194_v36 = vpop.xlane.xlu0 %3193 }
0x262d   :  { %3704 = vlog2.f32 %v3194_v36 }
0x262e   :  { %v3214_v2 = vpop.permute.xlu1 %3213 }
0x2630   :  { %v3207_v62 = vpop.permute.xlu0 %3206 }
0x2638   :  { %v3703_v20 = vpop.eup %3702 }
0x2639   :  { %v3196_v21 = vmul.f32 0.6931472, %v3703_v20 }
0x263a   :  { %v3705_v53 = vpop.eup %3704 }
0x263b   :  { %v3198_v31 = vmul.f32 0.6931472, %v3705_v53  ;;  %v3199_v19 = vadd.f32 %v3196_v21, %v4570_v47 }
0x263d   :  { %v3200_v12 = vadd.f32 %v3198_v31, %v4573_v28  ;;  %v3217_v37 = vadd.f32 %v3207_v62, %v3199_v19  ;;  %v1897_v31 = vsel %vm1893_vm6, %v1892_v55, 0.0 }
0x263f   :  { %v3218_v1 = vadd.f32 %v3214_v2, %v3200_v12  ;;  %3222 = vperm.xlu1 %3514, %v3217_v37  }
0x2641   :  { %3225 = vperm.xlu0 %3515, %v3218_v1  }
0x2645   :  { %2469 = vperm.xlu0 %3515, %v2466_v35  }
0x2649   :  { %2486 = vperm.xlu0 %3515, %v2483_v10  }
0x264d   :  { %2497 = vperm.xlu0 %3515, %v2494_v60   ;;  %v2511_v60 = vrot.slane %v2509_v54, 6 }
0x2661   :  { %v3482_v42 = vpop.f32.mrf.mxu1 }
0x2663   :  { %v2072_v8 = vpop.f32.mrf.mxu1 }
0x2665   :  { %v3492_v47 = vpop.f32.mrf.mxu1 }
0x2667   :  { %v2233_v14 = vpop.f32.mrf.mxu1 }
0x2669   :  { %v3477_v11 = vpop.f32.mrf.mxu0  ;;  %v3502_v44 = vpop.f32.mrf.mxu1 }
0x266a   :  { %v2079_v17 = vadd.f32 %v3482_v42, %v3477_v11 }
0x266b   :  { %v1986_v25 = vpop.f32.mrf.mxu0  ;;  %v2393_v30 = vpop.f32.mrf.mxu1 }
0x266c   :  { %1895 = vadd.xlane.f32.xlu0 %v1894_v27  ;;  %v2073_v26 = vadd.f32 %v2072_v8, %v1986_v25 }
0x266d   :  { %v3487_v28 = vpop.f32.mrf.mxu0 }
0x266e   :  { %v2160_v34 = vadd.f32 %v3487_v28, %v2079_v17 }
0x266f   :  { %v2152_v24 = vpop.f32.mrf.mxu0 }
0x2670   :  { %2440 = vadd.xlane.f32.xlu0 %v2439_v33  ;;  %v2242_v32 = vadd.f32 %v3492_v47, %v2160_v34  ;;  %v2153_v59 = vadd.f32 %v2152_v24, %v2073_v26 }
0x2671   :  { %v3497_v39 = vpop.f32.mrf.mxu0 }
0x2672   :  { %v2322_v40 = vadd.f32 %v3497_v39, %v2242_v32  ;;  %v2234_v5 = vadd.f32 %v2233_v14, %v2153_v59 }
0x2673   :  { %v2315_v3 = vpop.f32.mrf.mxu0 }
0x2674   :  { %v2400_v57 = vadd.f32 %v3502_v44, %v2322_v40  ;;  %v2316_v4 = vadd.f32 %v2315_v3, %v2234_v5 }
0x2676   :  { %v2394_v29 = vadd.f32 %v2393_v30, %v2316_v4  ;;  %v2404_v25 = vmul.f32 %v4578_v52, %v2400_v57 }
0x2678   :  { %v2403_v19 = vmul.f32 %v4584_v38, %v2394_v29  ;;  %v2409_v27 = vsel %vm2408_vm11, %v2404_v25, 0.0 }
0x267a   :  { %v2405_v1 = vsel %vm1893_vm6, %v2403_v19, 0.0 }
0x26ba   :  { %v3223_v45 = vpop.permute.xlu1 %3222 }
0x26bb   :  { %v3230_v13 = vrot.slane %v3223_v45, %v4413_v43 }
0x26bc   :  { %v3226_v48 = vpop.permute.xlu0 %3225 }
0x26bd   :  { %v3234_v6 = vrot.slane %v3226_v48, %v4413_v43 }
0x26bf   :  { %v3235_v0 = vsel %vm2828_vm0, %v3234_v6, %v3230_v13 }
0x26c0   :  { %v2470_v41 = vpop.permute.xlu0 %2469  ;;  %v3239_v18 = vsel %vm2920_vm3, %v3235_v0, %v3237_v63 }
0x26c1   :  { %v2472_v23 = vmul.f32 %v4584_v38, %v2470_v41  ;;  %v3240_v46 = vadd.f32 %v3307_v56, %v3239_v18 }
0x26c3   :  { %v2475_v43 = vrot.slane %v2472_v23, 2  ;;  %v3242_v16 = vsel %vm3241_vm10, %v3240_v46, -inf  ;;  %v2478_v20 = vrot.slane %v2472_v23, 4 }
0x26c4   :  { %3243 = vmax.xlane.f32.xlu1 %v3242_v16  ;;  %v2487_v50 = vpop.permute.xlu0 %2486 }
0x26c5   :  { %v2477_v36 = vadd.f32 %v2475_v43, %v2472_v23  ;;  %v2489_v21 = vmul.f32 %v4584_v38, %v2487_v50 }
0x26c7   :  { %v2480_v61 = vadd.f32 %v2478_v20, %v2477_v36  ;;  %v2491_v53 = vrot.slane %v2489_v21, 6 }
0x26c8   :  { %1898 = vadd.xlane.f32.xlu1 %v1897_v31  ;;  %v2498_v62 = vpop.permute.xlu0 %2497 }
0x26c9   :  { %v2493_v22 = vadd.f32 %v2491_v53, %v2480_v61  ;;  %v2500_v12 = vmul.f32 %v4578_v52, %v2498_v62 }
0x26cb   :  { %v2501_v37 = vadd.f32 %v2500_v12, %v2493_v22  ;;  %v2503_v2 = vrot.slane %v2500_v12, 2  ;;  %v2506_v35 = vrot.slane %v2500_v12, 4 }
0x26cc   :  { %2406 = vadd.xlane.f32.xlu1 %v2405_v1 }
0x26cd   :  { %v2505_v49 = vadd.f32 %v2503_v2, %v2501_v37 }
0x26cf   :  { %v2508_v10 = vadd.f32 %v2506_v35, %v2505_v49 }
0x26d1   :  { %v2513_v42 = vadd.f32 %v2511_v60, %v2508_v10 }
0x26d3   :  { %v2520_v8 = vmul.f32 %v3307_v56, %v2513_v42 }
0x26d5   :  { %v2521_v38 = vsel %vm2438_vm9, %v2520_v8, 0.0 }
0x26d6   :  { %2522 = vadd.xlane.f32.xlu0 %v2521_v38 }
0x26f5   :  { %v1896_v28 = vpop.xlane.xlu0 %1895 }
0x26f6   :  { %v2414_v14 = vrot.slane %v1896_v28, 2 }
0x26f9   :  { %v2441_v44 = vpop.xlane.xlu0 %2440 }
0x26fa   :  { %v2442_v59 = vadd.f32 %v2441_v44, %v1896_v28 }
0x274d   :  { %v3244_v7 = vpop.xlane.xlu1 %3243 }
0x274e   :  { %v3245_v11 = vsub.f32 %v3240_v46, %v3244_v7 }
0x2750   :  { %v3246_v17 = vmul.f32 1.442695, %v3245_v11 }
0x2751   :  { %v1899_v58 = vpop.xlane.xlu1 %1898 }
0x2752   :  { %3706 = vpow2.f32 %v3246_v17  ;;  %v2415_v34 = vrot.slane %v1899_v58, 2 }
0x2754   :  { %v2416_v24 = vsel %vm1902_vm8, %v2414_v14, %v2415_v34 }
0x2755   :  { %v2407_v33 = vpop.xlane.xlu1 %2406 }
0x2756   :  { %v2419_v32 = vadd.f32 %v2416_v24, %v2407_v33 }
0x2758   :  { %v2424_v39 = vrot.slane %v2419_v32, 6 }
0x275a   :  { %v2429_v40 = vmul.f32 %v4404_v9, %v2424_v39 }
0x275c   :  { %v2444_v26 = vrot.slane %v2429_v40, 2  ;;  %v2447_v57 = vrot.slane %v2429_v40, 4  ;;  %v2450_v6 = vrot.slane %v2429_v40, 6 }
0x275e   :  { %v2446_v52 = vadd.f32 %v2444_v26, %v2442_v59 }
0x275f   :  { %v3707_v47 = vpop.eup %3706  ;;  %v2523_v55 = vpop.xlane.xlu0 %2522 }
0x2760   :  { %v3248_v51 = vsel %vm3241_vm10, %v3707_v47, 0.0  ;;  %v2449_v48 = vadd.f32 %v2447_v57, %v2446_v52 }
0x2761   :  { %3249 = vadd.xlane.f32.xlu1 %v3248_v51 }
0x2762   :  { %v2452_v56 = vadd.f32 %v2450_v6, %v2449_v48 }
0x2765   :  { %2410 = vadd.xlane.f32.xlu1 %v2409_v27 }
0x27ea   :  { %v3250_v45 = vpop.xlane.xlu1 %3249 }
0x27eb   :  { %3708 = vlog2.f32 %v3250_v45 }
0x27ee   :  { %v2411_v5 = vpop.xlane.xlu1 %2410 }
0x27ef   :  { %v2420_v3 = vadd.f32 %v2415_v34, %v2411_v5 }
0x27f1   :  { %v2425_v13 = vrot.slane %v2420_v3, 6 }
0x27f3   :  { %v2426_v63 = vsel %vm2423_vm12, %v2424_v39, %v2425_v13 }
0x27f4   :  { %v2430_v4 = vmul.f32 %v4494_v15, %v2426_v63 }
0x27f6   :  { %v2453_v0 = vadd.f32 %v2452_v56, %v2430_v4  ;;  %v2455_v41 = vrot.slane %v2430_v4, 2  ;;  %v2458_v23 = vrot.slane %v2430_v4, 4  ;;  %v2461_v29 = vrot.slane %v2430_v4, 6 }
0x27f8   :  { %v3709_v9 = vpop.eup %3708  ;;  %v2457_v18 = vadd.f32 %v2455_v41, %v2453_v0 }
0x27f9   :  { %v3252_v46 = vmul.f32 0.6931472, %v3709_v9 }
0x27fa   :  { %v2460_v30 = vadd.f32 %v2458_v23, %v2457_v18 }
0x27fb   :  { %v3253_v43 = vadd.f32 %v3252_v46, %v3244_v7 }
0x27fc   :  { %v2463_v16 = vadd.f32 %v2461_v29, %v2460_v30 }
0x27fd   :  { %v3255_v50 = vrot.slane %v3253_v43, 6 }
0x27fe   :  { %v2524_v36 = vadd.f32 %v2523_v55, %v2463_v16 }
0x2800   :  { %v3257_v20 = vsub.f32 %v2524_v36, %v3255_v50 }
0x2802   :  { %3259 = vst.msk [vmem:[%s4653_s12] sm:$0x3] %vm3258_vm13, %v3257_v20 }

</bundles_post_ra>
